<compile_context>
chip_gen: v7x
topology: tpu7x:2x2x1
jax: 0.10.0
libtpu: 0.0.40
codegen_flags: <defaults>
</compile_context>

<pallas_src>
import math

import jax
import jax.numpy as jnp
from jax import lax
from jax.experimental import pallas as pl
from jax.experimental.pallas import tpu as pltpu

# ----------------------- scaled-down BERT config -----------------------------
VOCAB = 1000
HIDDEN = 128
N_LAYERS = 2
N_HEADS = 4
HEAD_DIM = HIDDEN // N_HEADS
INTERMEDIATE = 256
MAX_POS = 64
PROJ_HIDDEN = 256      # stands in for 1024
OUTPUT_DIM = 64        # projection output_dim
LN_EPS = 1e-12         # BERT LayerNorm eps
BM = 2                 # sequences per grid step (amortizes per-layer weight DMA)


# ----------------------------- in-kernel helpers ------------------------------
def _erf(x):
    # Abramowitz & Stegun 7.1.26 rational approximation; the divide is routed
    # to the EUP slot via pl.reciprocal(approx=True) per the perf review
    # (small ~1e-3-level deviation vs exact erf, acceptable for embeddings).
    a1, a2, a3 = 0.254829592, -0.284496736, 1.421413741
    a4, a5, pc = -1.453152027, 1.061405429, 0.3275911
    ax = jnp.abs(x)
    t = pl.reciprocal(1.0 + pc * ax, approx=True)
    poly = ((((a5 * t + a4) * t + a3) * t + a2) * t + a1) * t
    y = 1.0 - poly * jnp.exp(-ax * ax)
    return jnp.where(x >= 0.0, y, -y)


def _gelu(x):
    # erf-based GELU, as in HF BERT
    return 0.5 * x * (1.0 + _erf(x * (1.0 / math.sqrt(2.0))))


def _layernorm(x, g, b, eps=LN_EPS):
    mu = jnp.mean(x, axis=-1, keepdims=True)
    var = jnp.mean(jnp.square(x - mu), axis=-1, keepdims=True)
    return (x - mu) * lax.rsqrt(var + eps) * g + b


# ------------------------- fused encoder-stack kernel -------------------------
def _encoder_stack_kernel(emb_ref, mask_ref, embg_ref, embb_ref,
                          wqkv_ref, bqkv_ref, wo_ref, bo_ref,
                          ln1g_ref, ln1b_ref, win_ref, bin_ref,
                          wout_ref, bout_ref, ln2g_ref, ln2b_ref,
                          cls_ref, carry_ref, ctx_ref):
    # grid = (B // BM, N_LAYERS).  BM sequences stay resident in VMEM
    # (carry_ref) across the whole layer axis; per-layer weights are selected by
    # the BlockSpec index_map.  Output (CLS rows) is written only at the last
    # layer -- its block index is constant across the "arbitrary" layer axis,
    # which is what makes output-revisiting semantics valid here.
    layer = pl.program_id(1)
    scale = 1.0 / math.sqrt(HEAD_DIM)
    bm, s, hdim = carry_ref.shape

    # layer-0 prologue: seed the carry with the LayerNorm'd embeddings.
    # TODO(synk): fuse the word/pos/type embedding gather here via scalar
    # prefetch of input_ids to avoid materializing (B,S,H) embeddings in HBM.
    @pl.when(layer == 0)
    def _():
        carry_ref[...] = _layernorm(emb_ref[...], embg_ref[...], embb_ref[...])

    x = carry_ref[...]                          # (BM, S, H) f32 hidden state
    mask = mask_ref[...]                        # (BM, 1, S) additive mask

    # ---- fused QKV projection: one (BM*S, H) x (H, 3H) bf16 matmul ------------
    x_rows = x.astype(jnp.bfloat16).reshape(bm * s, hdim)
    qkv = (jnp.dot(x_rows, wqkv_ref[0], preferred_element_type=jnp.float32)
           + bqkv_ref[0])
    qkv = qkv.reshape(bm, s, 3 * hdim)
    q = qkv[:, :, 0 * hdim:1 * hdim].astype(jnp.bfloat16)
    k = qkv[:, :, 1 * hdim:2 * hdim].astype(jnp.bfloat16)
    v = qkv[:, :, 2 * hdim:3 * hdim].astype(jnp.bfloat16)

    # ---- multi-head self-attention: each head's context goes straight into a
    # VMEM scratch lane-slice (no concat shuffle).  At real dims, prefer a
    # head-batched einsum to bound live ranges of the unrolled loop.
    for h in range(N_HEADS):
        lo = h * HEAD_DIM
        qh = q[:, :, lo:lo + HEAD_DIM]
        kh = k[:, :, lo:lo + HEAD_DIM]
        vh = v[:, :, lo:lo + HEAD_DIM]
        sc = jnp.einsum('bqd,bkd->bqk', qh, kh,
                        preferred_element_type=jnp.float32) * scale + mask
        m = jnp.max(sc, axis=-1, keepdims=True)
        p = jnp.exp(sc - m)
        denom = jnp.sum(p, axis=-1, keepdims=True)
        p = p * pl.reciprocal(denom, approx=True)            # EUP, frees VPU
        ctx_ref[:, :, lo:lo + HEAD_DIM] = jnp.einsum(
            'bqk,bkd->bqd', p.astype(jnp.bfloat16), vh,
            preferred_element_type=jnp.float32)

    # ---- attention output projection + residual + LayerNorm -------------------
    ctx_rows = ctx_ref[...].astype(jnp.bfloat16).reshape(bm * s, hdim)
    attn = (jnp.dot(ctx_rows, wo_ref[0], preferred_element_type=jnp.float32)
            + bo_ref[0]).reshape(bm, s, hdim)
    h1 = _layernorm(attn + x, ln1g_ref[0], ln1b_ref[0])

    # ---- feed-forward (GELU) + residual + LayerNorm; FF act never leaves VMEM -
    h1_rows = h1.astype(jnp.bfloat16).reshape(bm * s, hdim)
    ff = (jnp.dot(h1_rows, win_ref[0], preferred_element_type=jnp.float32)
          + bin_ref[0])
    ff = _gelu(ff)
    ff = (jnp.dot(ff.astype(jnp.bfloat16), wout_ref[0],
                  preferred_element_type=jnp.float32)
          + bout_ref[0]).reshape(bm, s, hdim)
    out = _layernorm(ff + h1, ln2g_ref[0], ln2b_ref[0])

    carry_ref[...] = out

    # Only the CLS rows ever leave VMEM (no (B,S,H) HBM writeback / re-read).
    @pl.when(layer == pl.num_programs(1) - 1)
    def _():
        cls_ref[...] = out[:, 0, :].astype(cls_ref.dtype)


def encoder_stack(emb, add_mask, p, *, bm=BM):
    """emb: (B, S, H) f32, add_mask: (B, 1, S) f32 -> (B, H) CLS hidden state."""
    B, S, H = emb.shape
    L = p["wqkv"].shape[0]
    F = INTERMEDIATE
    assert B % bm == 0
    # (bm, H) CLS output block: second-minor dim must be a multiple of 8 or the
    # full batch dim (TPU sublane rule).
    assert bm == B or bm % 8 == 0

    x_map = lambda b, l: (b, 0, 0)       # per-batch block, constant over layers
    w_map = lambda b, l: (l, 0, 0)       # per-layer weight selection
    g_map = lambda b, l: (0, 0)          # shared embedding-LN params

    in_specs = [
        pl.BlockSpec((bm, S, H), x_map),            # embeddings (read at layer 0)
        pl.BlockSpec((bm, 1, S), x_map),            # additive attention mask
        pl.BlockSpec((1, H), g_map),                # emb_ln_g
        pl.BlockSpec((1, H), g_map),                # emb_ln_b
        pl.BlockSpec((1, H, 3 * H), w_map),         # wqkv  (bf16)
        pl.BlockSpec((1, 1, 3 * H), w_map),         # bqkv
        pl.BlockSpec((1, H, H), w_map),             # wo    (bf16)
        pl.BlockSpec((1, 1, H), w_map),             # bo
        pl.BlockSpec((1, 1, H), w_map),             # ln1_g
        pl.BlockSpec((1, 1, H), w_map),             # ln1_b
        pl.BlockSpec((1, H, F), w_map),             # w_in  (bf16)
        pl.BlockSpec((1, 1, F), w_map),             # b_in
        pl.BlockSpec((1, F, H), w_map),             # w_out (bf16)
        pl.BlockSpec((1, 1, H), w_map),             # b_out
        pl.BlockSpec((1, 1, H), w_map),             # ln2_g
        pl.BlockSpec((1, 1, H), w_map),             # ln2_b
    ]
    return pl.pallas_call(
        _encoder_stack_kernel,
        out_shape=jax.ShapeDtypeStruct((B, H), jnp.float32),
        grid=(B // bm, L),
        in_specs=in_specs,
        out_specs=pl.BlockSpec((bm, H), lambda b, l: (b, 0)),
        scratch_shapes=[pltpu.VMEM((bm, S, H), jnp.float32),   # layer carry
                        pltpu.VMEM((bm, S, H), jnp.float32)],  # per-head context
        compiler_params=pltpu.CompilerParams(
            dimension_semantics=("parallel", "arbitrary"),
            # re-derive at real dims: ~2x per-layer bf16 weights + carry + scores
            vmem_limit_bytes=32 * 1024 * 1024),
    )(emb, add_mask, p["emb_ln_g"], p["emb_ln_b"],
      p["wqkv"], p["bqkv"], p["wo"], p["bo"], p["ln1_g"], p["ln1_b"],
      p["w_in"], p["b_in"], p["w_out"], p["b_out"], p["ln2_g"], p["ln2_b"])


# ---------------- fused CLS projection + L2-normalize kernel -------------------
def _cls_project_normalize_kernel(cls_ref, w1_ref, b1_ref, w2_ref, b2_ref, o_ref):
    cls = cls_ref[...].astype(jnp.bfloat16)                         # (B, H)
    h = jnp.dot(cls, w1_ref[...], preferred_element_type=jnp.float32) + b1_ref[...]
    h = jnp.maximum(h, 0.0)                                         # ReLU
    y = jnp.dot(h.astype(jnp.bfloat16), w2_ref[...],
                preferred_element_type=jnp.float32) + b2_ref[...]
    # F.normalize(dim=-1): x / max(||x||_2, eps), eps = 1e-12.  Padded output
    # columns are exactly zero (zero weights/bias), so the norm is unchanged.
    norm = jnp.maximum(jnp.sqrt(jnp.sum(y * y, axis=-1, keepdims=True)), 1e-12)
    o_ref[...] = (y / norm).astype(o_ref.dtype)


def cls_project_normalize(cls_hidden, w1, b1, w2, b2):
    B, H = cls_hidden.shape
    P1 = w1.shape[1]
    DO = w2.shape[1]
    # Lane-dense output: pad projection columns to a multiple of 128 with zeros
    # so the final store is unmasked; slice the real columns back outside.
    DOP = ((DO + 127) // 128) * 128
    w2p = jnp.pad(w2, ((0, 0), (0, DOP - DO)))
    b2p = jnp.pad(b2, ((0, 0), (0, DOP - DO)))
    out = pl.pallas_call(
        _cls_project_normalize_kernel,
        out_shape=jax.ShapeDtypeStruct((B, DOP), jnp.float32),
        grid=(1,),
        in_specs=[pl.BlockSpec((B, H), lambda i: (0, 0)),
                  pl.BlockSpec((H, P1), lambda i: (0, 0)),
                  pl.BlockSpec((1, P1), lambda i: (0, 0)),
                  pl.BlockSpec((P1, DOP), lambda i: (0, 0)),
                  pl.BlockSpec((1, DOP), lambda i: (0, 0))],
        out_specs=pl.BlockSpec((B, DOP), lambda i: (0, 0)),
    )(cls_hidden, w1, b1, w2p, b2p)
    return out[:, :DO]


# ------------------------------ parameters ------------------------------------
def init_params(key):
    # TODO(synk): pretrained bert-base-uncased weights are not loadable here;
    # deterministic synthetic init of matching structure is used instead.
    def nrm(k, shape, dtype=jnp.bfloat16, scale=0.02):
        return (scale * jax.random.normal(k, shape, dtype=jnp.float32)).astype(dtype)

    ks = jax.random.split(key, 9)
    L, H, F = N_LAYERS, HIDDEN, INTERMEDIATE
    return {
        # embeddings + LN params / biases stay f32; matmul weights are bf16
        # (in-kernel dots accumulate in f32 via preferred_element_type).
        "word_emb": nrm(ks[0], (VOCAB, H), jnp.float32),
        "pos_emb": nrm(ks[1], (MAX_POS, H), jnp.float32),
        "type_emb": nrm(ks[2], (2, H), jnp.float32),
        "emb_ln_g": jnp.ones((1, H), jnp.float32),
        "emb_ln_b": jnp.zeros((1, H), jnp.float32),
        # per-layer weights stacked along a leading layer axis (index_map select)
        "wqkv": nrm(ks[3], (L, H, 3 * H)),          # [wq | wk | wv] fused
        "bqkv": jnp.zeros((L, 1, 3 * H), jnp.float32),
        "wo": nrm(ks[4], (L, H, H)),
        "bo": jnp.zeros((L, 1, H), jnp.float32),
        "ln1_g": jnp.ones((L, 1, H), jnp.float32),
        "ln1_b": jnp.zeros((L, 1, H), jnp.float32),
        "w_in": nrm(ks[5], (L, H, F)),
        "b_in": jnp.zeros((L, 1, F), jnp.float32),
        "w_out": nrm(ks[6], (L, F, H)),
        "b_out": jnp.zeros((L, 1, H), jnp.float32),
        "ln2_g": jnp.ones((L, 1, H), jnp.float32),
        "ln2_b": jnp.zeros((L, 1, H), jnp.float32),
        "proj_w1": nrm(ks[7], (H, PROJ_HIDDEN)),
        "proj_b1": jnp.zeros((1, PROJ_HIDDEN), jnp.float32),
        "proj_w2": nrm(ks[8], (PROJ_HIDDEN, OUTPUT_DIM)),
        "proj_b2": jnp.zeros((1, OUTPUT_DIM), jnp.float32),
    }


# ------------------------------- forward --------------------------------------
def text_encoder_forward(p, input_ids, attention_mask):
    B, S = input_ids.shape

    # BERT embeddings: table gathers are JAX glue; everything downstream is Pallas.
    pos_ids = jnp.arange(S)
    emb = (jnp.take(p["word_emb"], input_ids, axis=0)
           + p["pos_emb"][pos_ids][None, :, :]
           + p["type_emb"][0][None, None, :])                 # (B, S, H) f32
    # extended additive attention mask, as in HF BERT (token_type_ids == 0)
    add_mask = ((1.0 - attention_mask.astype(jnp.float32)) * -10000.0
                ).reshape(B, 1, S)

    cls = encoder_stack(emb, add_mask, p)                     # (B, H), one call
    # CLS -> Linear -> ReLU -> Linear -> F.normalize, fused in one pallas_call
    return cls_project_normalize(cls, p["proj_w1"], p["proj_b1"],
                                 p["proj_w2"], p["proj_b2"])


# --------------------------------- main ---------------------------------------
if __name__ == "__main__":
    key = jax.random.PRNGKey(0)
    pkey, ikey = jax.random.split(key)
    params = init_params(pkey)

    B, S = 2, 8
    input_ids = jax.random.randint(ikey, (B, S), 0, VOCAB, dtype=jnp.int32)
    attention_mask = jnp.array([[1, 1, 1, 1, 1, 1, 1, 1],
                                [1, 1, 1, 1, 1, 1, 0, 0]], dtype=jnp.int32)

    out = jax.jit(text_encoder_forward)(params, input_ids, attention_mask)
    out = jax.block_until_ready(out)

    assert out.shape == (B, OUTPUT_DIM), out.shape
    assert bool(jnp.all(jnp.isfinite(out)))
    # rows are L2-normalized
    assert bool(jnp.allclose(jnp.linalg.norm(out, axis=-1), 1.0, atol=1e-3))
    print("KERNEL_OK")
</pallas_src>

<mosaic_0001>
module attributes {stable_mosaic.version = 11 : i64} {
  func.func @_cls_project_normalize_kernel(%arg0: i32, %arg1: memref<2x128xf32, #tpu.memory_space<vmem>>, %arg2: memref<128x256xbf16, #tpu.memory_space<vmem>>, %arg3: memref<1x256xf32, #tpu.memory_space<vmem>>, %arg4: memref<256x128xbf16, #tpu.memory_space<vmem>>, %arg5: memref<1x128xf32, #tpu.memory_space<vmem>>, %arg6: memref<2x128xf32, #tpu.memory_space<vmem>>) attributes {dimension_semantics = [#tpu.dimension_semantics<arbitrary>], iteration_bounds = array<i64: 1>, scalar_prefetch = 0 : i64, scratch_operands = 0 : i64, tpu.core_type = #tpu.core_type<tc>, window_params = [{pipeline_mode = #tpu.pipeline_mode<synchronous>, transform_indices = @transform_0, window_bounds = array<i64: 2, 128>}, {pipeline_mode = #tpu.pipeline_mode<synchronous>, transform_indices = @transform_1, window_bounds = array<i64: 128, 256>}, {pipeline_mode = #tpu.pipeline_mode<synchronous>, transform_indices = @transform_2, window_bounds = array<i64: 1, 256>}, {pipeline_mode = #tpu.pipeline_mode<synchronous>, transform_indices = @transform_3, window_bounds = array<i64: 256, 128>}, {pipeline_mode = #tpu.pipeline_mode<synchronous>, transform_indices = @transform_4, window_bounds = array<i64: 1, 128>}, {pipeline_mode = #tpu.pipeline_mode<synchronous>, transform_indices = @transform_5, window_bounds = array<i64: 2, 128>}]} {
    %c0 = arith.constant 0 : index
    %c0_0 = arith.constant 0 : index
    %0 = vector.load %arg1[%c0, %c0_0] : memref<2x128xf32, #tpu.memory_space<vmem>>, vector<2x128xf32>
    %1 = arith.truncf %0 : vector<2x128xf32> to vector<2x128xbf16>
    %c0_1 = arith.constant 0 : index
    %c0_2 = arith.constant 0 : index
    %2 = vector.load %arg2[%c0_1, %c0_2] : memref<128x256xbf16, #tpu.memory_space<vmem>>, vector<128x256xbf16>
    %cst = arith.constant dense<0.000000e+00> : vector<2x256xf32>
    %3 = tpu.matmul %1, %2, %cst {dimension_numbers = #tpu.dot_dimension_numbers<[1], [0], [0], [1], [0, 0, 1, 1], [], []>} : vector<2x128xbf16>, vector<128x256xbf16>, vector<2x256xf32> -> vector<2x256xf32>
    %c0_3 = arith.constant 0 : index
    %c0_4 = arith.constant 0 : index
    %4 = vector.load %arg3[%c0_3, %c0_4] : memref<1x256xf32, #tpu.memory_space<vmem>>, vector<1x256xf32>
    %5 = vector.broadcast %4 : vector<1x256xf32> to vector<2x256xf32>
    %6 = arith.addf %3, %5 : vector<2x256xf32>
    %cst_5 = arith.constant 0.000000e+00 : f32
    %7 = vector.broadcast %cst_5 : f32 to vector<2x256xf32>
    %8 = arith.maximumf %6, %7 : vector<2x256xf32>
    %9 = arith.truncf %8 : vector<2x256xf32> to vector<2x256xbf16>
    %c0_6 = arith.constant 0 : index
    %c0_7 = arith.constant 0 : index
    %10 = vector.load %arg4[%c0_6, %c0_7] : memref<256x128xbf16, #tpu.memory_space<vmem>>, vector<256x128xbf16>
    %cst_8 = arith.constant dense<0.000000e+00> : vector<2x128xf32>
    %11 = tpu.matmul %9, %10, %cst_8 {dimension_numbers = #tpu.dot_dimension_numbers<[1], [0], [0], [1], [0, 0, 1, 1], [], []>} : vector<2x256xbf16>, vector<256x128xbf16>, vector<2x128xf32> -> vector<2x128xf32>
    %c0_9 = arith.constant 0 : index
    %c0_10 = arith.constant 0 : index
    %12 = vector.load %arg5[%c0_9, %c0_10] : memref<1x128xf32, #tpu.memory_space<vmem>>, vector<1x128xf32>
    %13 = vector.broadcast %12 : vector<1x128xf32> to vector<2x128xf32>
    %14 = arith.addf %11, %13 : vector<2x128xf32>
    %15 = arith.mulf %14, %14 : vector<2x128xf32>
    %cst_11 = arith.constant dense<0.000000e+00> : vector<2xf32>
    %16 = vector.multi_reduction <add>, %15, %cst_11 [1] : vector<2x128xf32> to vector<2xf32>
    %17 = vector.shape_cast %16 : vector<2xf32> to vector<2x1xf32>
    %18 = math.sqrt %17 : vector<2x1xf32>
    %cst_12 = arith.constant 9.99999996E-13 : f32
    %19 = vector.broadcast %cst_12 : f32 to vector<2x1xf32>
    %20 = arith.maximumf %18, %19 : vector<2x1xf32>
    %21 = vector.broadcast %20 : vector<2x1xf32> to vector<2x128xf32>
    %22 = arith.divf %14, %21 : vector<2x128xf32>
    %c0_13 = arith.constant 0 : index
    %c0_14 = arith.constant 0 : index
    %23 = vector.load %arg6[%c0_13, %c0_14] : memref<2x128xf32, #tpu.memory_space<vmem>>, vector<2x128xf32>
    tpu.vector_store %arg6[%c0_13, %c0_14], %22 {strides = array<i32>} : memref<2x128xf32, #tpu.memory_space<vmem>>, vector<2x128xf32>,
    return
  }
  func.func @transform_0(%arg0: i32) -> (i32, i32) {
    %c0_i32 = arith.constant 0 : i32
    %c0_i32_0 = arith.constant 0 : i32
    %c0_i32_1 = arith.constant 0 : i32
    return %c0_i32, %c0_i32_0 : i32, i32
  }
  func.func @transform_1(%arg0: i32) -> (i32, i32) {
    %c0_i32 = arith.constant 0 : i32
    %c0_i32_0 = arith.constant 0 : i32
    %c0_i32_1 = arith.constant 0 : i32
    return %c0_i32, %c0_i32_0 : i32, i32
  }
  func.func @transform_2(%arg0: i32) -> (i32, i32) {
    %c0_i32 = arith.constant 0 : i32
    %c0_i32_0 = arith.constant 0 : i32
    %c0_i32_1 = arith.constant 0 : i32
    return %c0_i32, %c0_i32_0 : i32, i32
  }
  func.func @transform_3(%arg0: i32) -> (i32, i32) {
    %c0_i32 = arith.constant 0 : i32
    %c0_i32_0 = arith.constant 0 : i32
    %c0_i32_1 = arith.constant 0 : i32
    return %c0_i32, %c0_i32_0 : i32, i32
  }
  func.func @transform_4(%arg0: i32) -> (i32, i32) {
    %c0_i32 = arith.constant 0 : i32
    %c0_i32_0 = arith.constant 0 : i32
    %c0_i32_1 = arith.constant 0 : i32
    return %c0_i32, %c0_i32_0 : i32, i32
  }
  func.func @transform_5(%arg0: i32) -> (i32, i32) {
    %c0_i32 = arith.constant 0 : i32
    %c0_i32_0 = arith.constant 0 : i32
    %c0_i32_1 = arith.constant 0 : i32
    return %c0_i32, %c0_i32_0 : i32, i32
  }
}

module attributes {stable_mosaic.version = 11 : i64} {
  func.func @_encoder_stack_kernel(%arg0: i32, %arg1: i32, %arg2: memref<2x8x128xf32, #tpu.memory_space<vmem>>, %arg3: memref<2x1x8xf32, #tpu.memory_space<vmem>>, %arg4: memref<1x128xf32, #tpu.memory_space<vmem>>, %arg5: memref<1x128xf32, #tpu.memory_space<vmem>>, %arg6: memref<1x128x384xbf16, #tpu.memory_space<vmem>>, %arg7: memref<1x1x384xf32, #tpu.memory_space<vmem>>, %arg8: memref<1x128x128xbf16, #tpu.memory_space<vmem>>, %arg9: memref<1x1x128xf32, #tpu.memory_space<vmem>>, %arg10: memref<1x1x128xf32, #tpu.memory_space<vmem>>, %arg11: memref<1x1x128xf32, #tpu.memory_space<vmem>>, %arg12: memref<1x128x256xbf16, #tpu.memory_space<vmem>>, %arg13: memref<1x1x256xf32, #tpu.memory_space<vmem>>, %arg14: memref<1x256x128xbf16, #tpu.memory_space<vmem>>, %arg15: memref<1x1x128xf32, #tpu.memory_space<vmem>>, %arg16: memref<1x1x128xf32, #tpu.memory_space<vmem>>, %arg17: memref<1x1x128xf32, #tpu.memory_space<vmem>>, %arg18: memref<2x128xf32, #tpu.memory_space<vmem>>, %arg19: memref<2x8x128xf32, #tpu.memory_space<vmem>>, %arg20: memref<2x8x128xf32, #tpu.memory_space<vmem>>) attributes {dimension_semantics = [#tpu.dimension_semantics<parallel>, #tpu.dimension_semantics<arbitrary>], iteration_bounds = array<i64: 1, 2>, scalar_prefetch = 0 : i64, scratch_operands = 2 : i64, tpu.core_type = #tpu.core_type<tc>, window_params = [{transform_indices = @transform_0, window_bounds = array<i64: 2, 8, 128>}, {transform_indices = @transform_1, window_bounds = array<i64: 2, 1, 8>}, {pipeline_mode = #tpu.pipeline_mode<synchronous>, transform_indices = @transform_2, window_bounds = array<i64: 1, 128>}, {pipeline_mode = #tpu.pipeline_mode<synchronous>, transform_indices = @transform_3, window_bounds = array<i64: 1, 128>}, {transform_indices = @transform_4, window_bounds = array<i64: 1, 128, 384>}, {transform_indices = @transform_5, window_bounds = array<i64: 1, 1, 384>}, {transform_indices = @transform_6, window_bounds = array<i64: 1, 128, 128>}, {transform_indices = @transform_7, window_bounds = array<i64: 1, 1, 128>}, {transform_indices = @transform_8, window_bounds = array<i64: 1, 1, 128>}, {transform_indices = @transform_9, window_bounds = array<i64: 1, 1, 128>}, {transform_indices = @transform_10, window_bounds = array<i64: 1, 128, 256>}, {transform_indices = @transform_11, window_bounds = array<i64: 1, 1, 256>}, {transform_indices = @transform_12, window_bounds = array<i64: 1, 256, 128>}, {transform_indices = @transform_13, window_bounds = array<i64: 1, 1, 128>}, {transform_indices = @transform_14, window_bounds = array<i64: 1, 1, 128>}, {transform_indices = @transform_15, window_bounds = array<i64: 1, 1, 128>}, {transform_indices = @transform_16, window_bounds = array<i64: 2, 128>}]} {
    %c0_i32 = arith.constant 0 : i32
    %0 = arith.cmpi eq, %arg1, %c0_i32 : i32
    %1 = arith.extui %0 : i1 to i32
    %c0_i32_0 = arith.constant 0 : i32
    %2 = arith.cmpi ne, %1, %c0_i32_0 : i32
    scf.if %2 {
      %c0_105 = arith.constant 0 : index
      %c0_106 = arith.constant 0 : index
      %c0_107 = arith.constant 0 : index
      %235 = vector.load %arg2[%c0_105, %c0_106, %c0_107] : memref<2x8x128xf32, #tpu.memory_space<vmem>>, vector<2x8x128xf32>
      %c0_108 = arith.constant 0 : index
      %c0_109 = arith.constant 0 : index
      %236 = vector.load %arg4[%c0_108, %c0_109] : memref<1x128xf32, #tpu.memory_space<vmem>>, vector<1x128xf32>
      %c0_110 = arith.constant 0 : index
      %c0_111 = arith.constant 0 : index
      %237 = vector.load %arg5[%c0_110, %c0_111] : memref<1x128xf32, #tpu.memory_space<vmem>>, vector<1x128xf32>
      %cst_112 = arith.constant dense<0.000000e+00> : vector<2x8xf32>
      %238 = vector.multi_reduction <add>, %235, %cst_112 [2] : vector<2x8x128xf32> to vector<2x8xf32>
      %239 = vector.shape_cast %238 : vector<2x8xf32> to vector<2x8x1xf32>
      %cst_113 = arith.constant 1.280000e+02 : f32
      %240 = vector.broadcast %cst_113 : f32 to vector<2x8x1xf32>
      %241 = arith.divf %239, %240 : vector<2x8x1xf32>
      %242 = vector.broadcast %241 : vector<2x8x1xf32> to vector<2x8x128xf32>
      %243 = arith.subf %235, %242 : vector<2x8x128xf32>
      %244 = arith.mulf %243, %243 : vector<2x8x128xf32>
      %cst_114 = arith.constant dense<0.000000e+00> : vector<2x8xf32>
      %245 = vector.multi_reduction <add>, %244, %cst_114 [2] : vector<2x8x128xf32> to vector<2x8xf32>
      %246 = vector.shape_cast %245 : vector<2x8xf32> to vector<2x8x1xf32>
      %cst_115 = arith.constant 1.280000e+02 : f32
      %247 = vector.broadcast %cst_115 : f32 to vector<2x8x1xf32>
      %248 = arith.divf %246, %247 : vector<2x8x1xf32>
      %249 = vector.broadcast %241 : vector<2x8x1xf32> to vector<2x8x128xf32>
      %250 = arith.subf %235, %249 : vector<2x8x128xf32>
      %cst_116 = arith.constant 9.99999996E-13 : f32
      %251 = vector.broadcast %cst_116 : f32 to vector<2x8x1xf32>
      %252 = arith.addf %248, %251 : vector<2x8x1xf32>
      %253 = math.rsqrt %252 : vector<2x8x1xf32>
      %254 = vector.broadcast %253 : vector<2x8x1xf32> to vector<2x8x128xf32>
      %255 = arith.mulf %250, %254 : vector<2x8x128xf32>
      %256 = vector.shape_cast %236 : vector<1x128xf32> to vector<1x1x128xf32>
      %257 = vector.broadcast %256 : vector<1x1x128xf32> to vector<2x8x128xf32>
      %258 = arith.mulf %255, %257 : vector<2x8x128xf32>
      %259 = vector.shape_cast %237 : vector<1x128xf32> to vector<1x1x128xf32>
      %260 = vector.broadcast %259 : vector<1x1x128xf32> to vector<2x8x128xf32>
      %261 = arith.addf %258, %260 : vector<2x8x128xf32>
      %c0_117 = arith.constant 0 : index
      %c0_118 = arith.constant 0 : index
      %c0_119 = arith.constant 0 : index
      %262 = vector.load %arg19[%c0_117, %c0_118, %c0_119] : memref<2x8x128xf32, #tpu.memory_space<vmem>>, vector<2x8x128xf32>
      tpu.vector_store %arg19[%c0_117, %c0_118, %c0_119], %261 {strides = array<i32>} : memref<2x8x128xf32, #tpu.memory_space<vmem>>, vector<2x8x128xf32>,
    } else {
    }
    %c0 = arith.constant 0 : index
    %c0_1 = arith.constant 0 : index
    %c0_2 = arith.constant 0 : index
    %3 = vector.load %arg19[%c0, %c0_1, %c0_2] : memref<2x8x128xf32, #tpu.memory_space<vmem>>, vector<2x8x128xf32>
    %c0_3 = arith.constant 0 : index
    %c0_4 = arith.constant 0 : index
    %c0_5 = arith.constant 0 : index
    %4 = vector.load %arg3[%c0_3, %c0_4, %c0_5] : memref<2x1x8xf32, #tpu.memory_space<vmem>>, vector<2x1x8xf32>
    %5 = arith.truncf %3 : vector<2x8x128xf32> to vector<2x8x128xbf16>
    %6 = vector.shape_cast %5 : vector<2x8x128xbf16> to vector<16x128xbf16>
    %c0_6 = arith.constant 0 : index
    %c0_7 = arith.constant 0 : index
    %c0_8 = arith.constant 0 : index
    %7 = vector.load %arg6[%c0_6, %c0_7, %c0_8] : memref<1x128x384xbf16, #tpu.memory_space<vmem>>, vector<1x128x384xbf16>
    %8 = vector.shape_cast %7 : vector<1x128x384xbf16> to vector<128x384xbf16>
    %cst = arith.constant dense<0.000000e+00> : vector<16x384xf32>
    %9 = tpu.matmul %6, %8, %cst {dimension_numbers = #tpu.dot_dimension_numbers<[1], [0], [0], [1], [0, 0, 1, 1], [], []>} : vector<16x128xbf16>, vector<128x384xbf16>, vector<16x384xf32> -> vector<16x384xf32>
    %c0_9 = arith.constant 0 : index
    %c0_10 = arith.constant 0 : index
    %c0_11 = arith.constant 0 : index
    %10 = vector.load %arg7[%c0_9, %c0_10, %c0_11] : memref<1x1x384xf32, #tpu.memory_space<vmem>>, vector<1x1x384xf32>
    %11 = vector.shape_cast %10 : vector<1x1x384xf32> to vector<1x384xf32>
    %12 = vector.broadcast %11 : vector<1x384xf32> to vector<16x384xf32>
    %13 = arith.addf %9, %12 : vector<16x384xf32>
    %14 = vector.shape_cast %13 : vector<16x384xf32> to vector<2x8x384xf32>
    %15 = vector.extract_strided_slice %14 {offsets = [0, 0, 0], sizes = [2, 8, 128], strides = [1, 1, 1]} : vector<2x8x384xf32> to vector<2x8x128xf32>
    %16 = arith.truncf %15 : vector<2x8x128xf32> to vector<2x8x128xbf16>
    %17 = vector.extract_strided_slice %14 {offsets = [0, 0, 128], sizes = [2, 8, 128], strides = [1, 1, 1]} : vector<2x8x384xf32> to vector<2x8x128xf32>
    %18 = arith.truncf %17 : vector<2x8x128xf32> to vector<2x8x128xbf16>
    %19 = vector.extract_strided_slice %14 {offsets = [0, 0, 256], sizes = [2, 8, 128], strides = [1, 1, 1]} : vector<2x8x384xf32> to vector<2x8x128xf32>
    %20 = arith.truncf %19 : vector<2x8x128xf32> to vector<2x8x128xbf16>
    %21 = vector.extract_strided_slice %16 {offsets = [0, 0, 0], sizes = [2, 8, 32], strides = [1, 1, 1]} : vector<2x8x128xbf16> to vector<2x8x32xbf16>
    %22 = vector.extract_strided_slice %18 {offsets = [0, 0, 0], sizes = [2, 8, 32], strides = [1, 1, 1]} : vector<2x8x128xbf16> to vector<2x8x32xbf16>
    %23 = vector.extract_strided_slice %20 {offsets = [0, 0, 0], sizes = [2, 8, 32], strides = [1, 1, 1]} : vector<2x8x128xbf16> to vector<2x8x32xbf16>
    "tpu.trace_start"() <{level = 10 : i32, message = "bqd,bkd->bqk"}> : () -> ()
    %cst_12 = arith.constant dense<0.000000e+00> : vector<2x8x8xf32>
    %24 = tpu.matmul %21, %22, %cst_12 {dimension_numbers = #tpu.dot_dimension_numbers<[2], [2], [1], [1], [0, 0, 0, 1, 1, 1], [0], [0]>} : vector<2x8x32xbf16>, vector<2x8x32xbf16>, vector<2x8x8xf32> -> vector<2x8x8xf32>
    "tpu.trace_stop"() : () -> ()
    %cst_13 = arith.constant 0.176776692 : f32
    %25 = vector.broadcast %cst_13 : f32 to vector<2x8x8xf32>
    %26 = arith.mulf %24, %25 : vector<2x8x8xf32>
    %27 = vector.broadcast %4 : vector<2x1x8xf32> to vector<2x8x8xf32>
    %28 = arith.addf %26, %27 : vector<2x8x8xf32>
    %cst_14 = arith.constant dense<0xFF800000> : vector<2x8xf32>
    %29 = vector.multi_reduction <maximumf>, %28, %cst_14 [2] : vector<2x8x8xf32> to vector<2x8xf32>
    %30 = vector.shape_cast %29 : vector<2x8xf32> to vector<2x8x1xf32>
    %31 = vector.broadcast %30 : vector<2x8x1xf32> to vector<2x8x8xf32>
    %32 = arith.subf %28, %31 : vector<2x8x8xf32>
    %33 = math.exp %32 : vector<2x8x8xf32>
    %cst_15 = arith.constant dense<0.000000e+00> : vector<2x8xf32>
    %34 = vector.multi_reduction <add>, %33, %cst_15 [2] : vector<2x8x8xf32> to vector<2x8xf32>
    %35 = vector.shape_cast %34 : vector<2x8xf32> to vector<2x8x1xf32>
    %36 = tpu.reciprocal %35 {approx = true} : vector<2x8x1xf32> -> vector<2x8x1xf32>
    %37 = vector.broadcast %36 : vector<2x8x1xf32> to vector<2x8x8xf32>
    %38 = arith.mulf %33, %37 : vector<2x8x8xf32>
    %39 = arith.truncf %38 : vector<2x8x8xf32> to vector<2x8x8xbf16>
    "tpu.trace_start"() <{level = 10 : i32, message = "bqk,bkd->bqd"}> : () -> ()
    %cst_16 = arith.constant dense<0.000000e+00> : vector<2x8x32xf32>
    %40 = tpu.matmul %39, %23, %cst_16 {dimension_numbers = #tpu.dot_dimension_numbers<[2], [1], [1], [2], [0, 0, 0, 1, 1, 2], [0], [0]>} : vector<2x8x8xbf16>, vector<2x8x32xbf16>, vector<2x8x32xf32> -> vector<2x8x32xf32>
    "tpu.trace_stop"() : () -> ()
    %c0_17 = arith.constant 0 : index
    %c0_18 = arith.constant 0 : index
    %c0_19 = arith.constant 0 : index
    %41 = vector.load %arg20[%c0_17, %c0_18, %c0_19] : memref<2x8x128xf32, #tpu.memory_space<vmem>>, vector<2x8x32xf32>
    tpu.vector_store %arg20[%c0_17, %c0_18, %c0_19], %40 {strides = array<i32>} : memref<2x8x128xf32, #tpu.memory_space<vmem>>, vector<2x8x32xf32>,
    %42 = vector.extract_strided_slice %16 {offsets = [0, 0, 32], sizes = [2, 8, 32], strides = [1, 1, 1]} : vector<2x8x128xbf16> to vector<2x8x32xbf16>
    %43 = vector.extract_strided_slice %18 {offsets = [0, 0, 32], sizes = [2, 8, 32], strides = [1, 1, 1]} : vector<2x8x128xbf16> to vector<2x8x32xbf16>
    %44 = vector.extract_strided_slice %20 {offsets = [0, 0, 32], sizes = [2, 8, 32], strides = [1, 1, 1]} : vector<2x8x128xbf16> to vector<2x8x32xbf16>
    "tpu.trace_start"() <{level = 10 : i32, message = "bqd,bkd->bqk"}> : () -> ()
    %cst_20 = arith.constant dense<0.000000e+00> : vector<2x8x8xf32>
    %45 = tpu.matmul %42, %43, %cst_20 {dimension_numbers = #tpu.dot_dimension_numbers<[2], [2], [1], [1], [0, 0, 0, 1, 1, 1], [0], [0]>} : vector<2x8x32xbf16>, vector<2x8x32xbf16>, vector<2x8x8xf32> -> vector<2x8x8xf32>
    "tpu.trace_stop"() : () -> ()
    %cst_21 = arith.constant 0.176776692 : f32
    %46 = vector.broadcast %cst_21 : f32 to vector<2x8x8xf32>
    %47 = arith.mulf %45, %46 : vector<2x8x8xf32>
    %48 = vector.broadcast %4 : vector<2x1x8xf32> to vector<2x8x8xf32>
    %49 = arith.addf %47, %48 : vector<2x8x8xf32>
    %cst_22 = arith.constant dense<0xFF800000> : vector<2x8xf32>
    %50 = vector.multi_reduction <maximumf>, %49, %cst_22 [2] : vector<2x8x8xf32> to vector<2x8xf32>
    %51 = vector.shape_cast %50 : vector<2x8xf32> to vector<2x8x1xf32>
    %52 = vector.broadcast %51 : vector<2x8x1xf32> to vector<2x8x8xf32>
    %53 = arith.subf %49, %52 : vector<2x8x8xf32>
    %54 = math.exp %53 : vector<2x8x8xf32>
    %cst_23 = arith.constant dense<0.000000e+00> : vector<2x8xf32>
    %55 = vector.multi_reduction <add>, %54, %cst_23 [2] : vector<2x8x8xf32> to vector<2x8xf32>
    %56 = vector.shape_cast %55 : vector<2x8xf32> to vector<2x8x1xf32>
    %57 = tpu.reciprocal %56 {approx = true} : vector<2x8x1xf32> -> vector<2x8x1xf32>
    %58 = vector.broadcast %57 : vector<2x8x1xf32> to vector<2x8x8xf32>
    %59 = arith.mulf %54, %58 : vector<2x8x8xf32>
    %60 = arith.truncf %59 : vector<2x8x8xf32> to vector<2x8x8xbf16>
    "tpu.trace_start"() <{level = 10 : i32, message = "bqk,bkd->bqd"}> : () -> ()
    %cst_24 = arith.constant dense<0.000000e+00> : vector<2x8x32xf32>
    %61 = tpu.matmul %60, %44, %cst_24 {dimension_numbers = #tpu.dot_dimension_numbers<[2], [1], [1], [2], [0, 0, 0, 1, 1, 2], [0], [0]>} : vector<2x8x8xbf16>, vector<2x8x32xbf16>, vector<2x8x32xf32> -> vector<2x8x32xf32>
    "tpu.trace_stop"() : () -> ()
    %c0_25 = arith.constant 0 : index
    %c0_26 = arith.constant 0 : index
    %c32 = arith.constant 32 : index
    %62 = vector.load %arg20[%c0_25, %c0_26, %c32] : memref<2x8x128xf32, #tpu.memory_space<vmem>>, vector<2x8x32xf32>
    tpu.vector_store %arg20[%c0_25, %c0_26, %c32], %61 {strides = array<i32>} : memref<2x8x128xf32, #tpu.memory_space<vmem>>, vector<2x8x32xf32>,
    %63 = vector.extract_strided_slice %16 {offsets = [0, 0, 64], sizes = [2, 8, 32], strides = [1, 1, 1]} : vector<2x8x128xbf16> to vector<2x8x32xbf16>
    %64 = vector.extract_strided_slice %18 {offsets = [0, 0, 64], sizes = [2, 8, 32], strides = [1, 1, 1]} : vector<2x8x128xbf16> to vector<2x8x32xbf16>
    %65 = vector.extract_strided_slice %20 {offsets = [0, 0, 64], sizes = [2, 8, 32], strides = [1, 1, 1]} : vector<2x8x128xbf16> to vector<2x8x32xbf16>
    "tpu.trace_start"() <{level = 10 : i32, message = "bqd,bkd->bqk"}> : () -> ()
    %cst_27 = arith.constant dense<0.000000e+00> : vector<2x8x8xf32>
    %66 = tpu.matmul %63, %64, %cst_27 {dimension_numbers = #tpu.dot_dimension_numbers<[2], [2], [1], [1], [0, 0, 0, 1, 1, 1], [0], [0]>} : vector<2x8x32xbf16>, vector<2x8x32xbf16>, vector<2x8x8xf32> -> vector<2x8x8xf32>
    "tpu.trace_stop"() : () -> ()
    %cst_28 = arith.constant 0.176776692 : f32
    %67 = vector.broadcast %cst_28 : f32 to vector<2x8x8xf32>
    %68 = arith.mulf %66, %67 : vector<2x8x8xf32>
    %69 = vector.broadcast %4 : vector<2x1x8xf32> to vector<2x8x8xf32>
    %70 = arith.addf %68, %69 : vector<2x8x8xf32>
    %cst_29 = arith.constant dense<0xFF800000> : vector<2x8xf32>
    %71 = vector.multi_reduction <maximumf>, %70, %cst_29 [2] : vector<2x8x8xf32> to vector<2x8xf32>
    %72 = vector.shape_cast %71 : vector<2x8xf32> to vector<2x8x1xf32>
    %73 = vector.broadcast %72 : vector<2x8x1xf32> to vector<2x8x8xf32>
    %74 = arith.subf %70, %73 : vector<2x8x8xf32>
    %75 = math.exp %74 : vector<2x8x8xf32>
    %cst_30 = arith.constant dense<0.000000e+00> : vector<2x8xf32>
    %76 = vector.multi_reduction <add>, %75, %cst_30 [2] : vector<2x8x8xf32> to vector<2x8xf32>
    %77 = vector.shape_cast %76 : vector<2x8xf32> to vector<2x8x1xf32>
    %78 = tpu.reciprocal %77 {approx = true} : vector<2x8x1xf32> -> vector<2x8x1xf32>
    %79 = vector.broadcast %78 : vector<2x8x1xf32> to vector<2x8x8xf32>
    %80 = arith.mulf %75, %79 : vector<2x8x8xf32>
    %81 = arith.truncf %80 : vector<2x8x8xf32> to vector<2x8x8xbf16>
    "tpu.trace_start"() <{level = 10 : i32, message = "bqk,bkd->bqd"}> : () -> ()
    %cst_31 = arith.constant dense<0.000000e+00> : vector<2x8x32xf32>
    %82 = tpu.matmul %81, %65, %cst_31 {dimension_numbers = #tpu.dot_dimension_numbers<[2], [1], [1], [2], [0, 0, 0, 1, 1, 2], [0], [0]>} : vector<2x8x8xbf16>, vector<2x8x32xbf16>, vector<2x8x32xf32> -> vector<2x8x32xf32>
    "tpu.trace_stop"() : () -> ()
    %c0_32 = arith.constant 0 : index
    %c0_33 = arith.constant 0 : index
    %c64 = arith.constant 64 : index
    %83 = vector.load %arg20[%c0_32, %c0_33, %c64] : memref<2x8x128xf32, #tpu.memory_space<vmem>>, vector<2x8x32xf32>
    tpu.vector_store %arg20[%c0_32, %c0_33, %c64], %82 {strides = array<i32>} : memref<2x8x128xf32, #tpu.memory_space<vmem>>, vector<2x8x32xf32>,
    %84 = vector.extract_strided_slice %16 {offsets = [0, 0, 96], sizes = [2, 8, 32], strides = [1, 1, 1]} : vector<2x8x128xbf16> to vector<2x8x32xbf16>
    %85 = vector.extract_strided_slice %18 {offsets = [0, 0, 96], sizes = [2, 8, 32], strides = [1, 1, 1]} : vector<2x8x128xbf16> to vector<2x8x32xbf16>
    %86 = vector.extract_strided_slice %20 {offsets = [0, 0, 96], sizes = [2, 8, 32], strides = [1, 1, 1]} : vector<2x8x128xbf16> to vector<2x8x32xbf16>
    "tpu.trace_start"() <{level = 10 : i32, message = "bqd,bkd->bqk"}> : () -> ()
    %cst_34 = arith.constant dense<0.000000e+00> : vector<2x8x8xf32>
    %87 = tpu.matmul %84, %85, %cst_34 {dimension_numbers = #tpu.dot_dimension_numbers<[2], [2], [1], [1], [0, 0, 0, 1, 1, 1], [0], [0]>} : vector<2x8x32xbf16>, vector<2x8x32xbf16>, vector<2x8x8xf32> -> vector<2x8x8xf32>
    "tpu.trace_stop"() : () -> ()
    %cst_35 = arith.constant 0.176776692 : f32
    %88 = vector.broadcast %cst_35 : f32 to vector<2x8x8xf32>
    %89 = arith.mulf %87, %88 : vector<2x8x8xf32>
    %90 = vector.broadcast %4 : vector<2x1x8xf32> to vector<2x8x8xf32>
    %91 = arith.addf %89, %90 : vector<2x8x8xf32>
    %cst_36 = arith.constant dense<0xFF800000> : vector<2x8xf32>
    %92 = vector.multi_reduction <maximumf>, %91, %cst_36 [2] : vector<2x8x8xf32> to vector<2x8xf32>
    %93 = vector.shape_cast %92 : vector<2x8xf32> to vector<2x8x1xf32>
    %94 = vector.broadcast %93 : vector<2x8x1xf32> to vector<2x8x8xf32>
    %95 = arith.subf %91, %94 : vector<2x8x8xf32>
    %96 = math.exp %95 : vector<2x8x8xf32>
    %cst_37 = arith.constant dense<0.000000e+00> : vector<2x8xf32>
    %97 = vector.multi_reduction <add>, %96, %cst_37 [2] : vector<2x8x8xf32> to vector<2x8xf32>
    %98 = vector.shape_cast %97 : vector<2x8xf32> to vector<2x8x1xf32>
    %99 = tpu.reciprocal %98 {approx = true} : vector<2x8x1xf32> -> vector<2x8x1xf32>
    %100 = vector.broadcast %99 : vector<2x8x1xf32> to vector<2x8x8xf32>
    %101 = arith.mulf %96, %100 : vector<2x8x8xf32>
    %102 = arith.truncf %101 : vector<2x8x8xf32> to vector<2x8x8xbf16>
    "tpu.trace_start"() <{level = 10 : i32, message = "bqk,bkd->bqd"}> : () -> ()
    %cst_38 = arith.constant dense<0.000000e+00> : vector<2x8x32xf32>
    %103 = tpu.matmul %102, %86, %cst_38 {dimension_numbers = #tpu.dot_dimension_numbers<[2], [1], [1], [2], [0, 0, 0, 1, 1, 2], [0], [0]>} : vector<2x8x8xbf16>, vector<2x8x32xbf16>, vector<2x8x32xf32> -> vector<2x8x32xf32>
    "tpu.trace_stop"() : () -> ()
    %c0_39 = arith.constant 0 : index
    %c0_40 = arith.constant 0 : index
    %c96 = arith.constant 96 : index
    %104 = vector.load %arg20[%c0_39, %c0_40, %c96] : memref<2x8x128xf32, #tpu.memory_space<vmem>>, vector<2x8x32xf32>
    tpu.vector_store %arg20[%c0_39, %c0_40, %c96], %103 {strides = array<i32>} : memref<2x8x128xf32, #tpu.memory_space<vmem>>, vector<2x8x32xf32>,
    %c0_41 = arith.constant 0 : index
    %c0_42 = arith.constant 0 : index
    %c0_43 = arith.constant 0 : index
    %105 = vector.load %arg20[%c0_41, %c0_42, %c0_43] : memref<2x8x128xf32, #tpu.memory_space<vmem>>, vector<2x8x128xf32>
    %106 = arith.truncf %105 : vector<2x8x128xf32> to vector<2x8x128xbf16>
    %107 = vector.shape_cast %106 : vector<2x8x128xbf16> to vector<16x128xbf16>
    %c0_44 = arith.constant 0 : index
    %c0_45 = arith.constant 0 : index
    %c0_46 = arith.constant 0 : index
    %108 = vector.load %arg8[%c0_44, %c0_45, %c0_46] : memref<1x128x128xbf16, #tpu.memory_space<vmem>>, vector<1x128x128xbf16>
    %109 = vector.shape_cast %108 : vector<1x128x128xbf16> to vector<128x128xbf16>
    %cst_47 = arith.constant dense<0.000000e+00> : vector<16x128xf32>
    %110 = tpu.matmul %107, %109, %cst_47 {dimension_numbers = #tpu.dot_dimension_numbers<[1], [0], [0], [1], [0, 0, 1, 1], [], []>} : vector<16x128xbf16>, vector<128x128xbf16>, vector<16x128xf32> -> vector<16x128xf32>
    %c0_48 = arith.constant 0 : index
    %c0_49 = arith.constant 0 : index
    %c0_50 = arith.constant 0 : index
    %111 = vector.load %arg9[%c0_48, %c0_49, %c0_50] : memref<1x1x128xf32, #tpu.memory_space<vmem>>, vector<1x1x128xf32>
    %112 = vector.shape_cast %111 : vector<1x1x128xf32> to vector<1x128xf32>
    %113 = vector.broadcast %112 : vector<1x128xf32> to vector<16x128xf32>
    %114 = arith.addf %110, %113 : vector<16x128xf32>
    %115 = vector.shape_cast %114 : vector<16x128xf32> to vector<2x8x128xf32>
    %116 = arith.addf %115, %3 : vector<2x8x128xf32>
    %c0_51 = arith.constant 0 : index
    %c0_52 = arith.constant 0 : index
    %c0_53 = arith.constant 0 : index
    %117 = vector.load %arg10[%c0_51, %c0_52, %c0_53] : memref<1x1x128xf32, #tpu.memory_space<vmem>>, vector<1x1x128xf32>
    %118 = vector.shape_cast %117 : vector<1x1x128xf32> to vector<1x128xf32>
    %c0_54 = arith.constant 0 : index
    %c0_55 = arith.constant 0 : index
    %c0_56 = arith.constant 0 : index
    %119 = vector.load %arg11[%c0_54, %c0_55, %c0_56] : memref<1x1x128xf32, #tpu.memory_space<vmem>>, vector<1x1x128xf32>
    %120 = vector.shape_cast %119 : vector<1x1x128xf32> to vector<1x128xf32>
    %cst_57 = arith.constant dense<0.000000e+00> : vector<2x8xf32>
    %121 = vector.multi_reduction <add>, %116, %cst_57 [2] : vector<2x8x128xf32> to vector<2x8xf32>
    %122 = vector.shape_cast %121 : vector<2x8xf32> to vector<2x8x1xf32>
    %cst_58 = arith.constant 1.280000e+02 : f32
    %123 = vector.broadcast %cst_58 : f32 to vector<2x8x1xf32>
    %124 = arith.divf %122, %123 : vector<2x8x1xf32>
    %125 = vector.broadcast %124 : vector<2x8x1xf32> to vector<2x8x128xf32>
    %126 = arith.subf %116, %125 : vector<2x8x128xf32>
    %127 = arith.mulf %126, %126 : vector<2x8x128xf32>
    %cst_59 = arith.constant dense<0.000000e+00> : vector<2x8xf32>
    %128 = vector.multi_reduction <add>, %127, %cst_59 [2] : vector<2x8x128xf32> to vector<2x8xf32>
    %129 = vector.shape_cast %128 : vector<2x8xf32> to vector<2x8x1xf32>
    %cst_60 = arith.constant 1.280000e+02 : f32
    %130 = vector.broadcast %cst_60 : f32 to vector<2x8x1xf32>
    %131 = arith.divf %129, %130 : vector<2x8x1xf32>
    %132 = vector.broadcast %124 : vector<2x8x1xf32> to vector<2x8x128xf32>
    %133 = arith.subf %116, %132 : vector<2x8x128xf32>
    %cst_61 = arith.constant 9.99999996E-13 : f32
    %134 = vector.broadcast %cst_61 : f32 to vector<2x8x1xf32>
    %135 = arith.addf %131, %134 : vector<2x8x1xf32>
    %136 = math.rsqrt %135 : vector<2x8x1xf32>
    %137 = vector.broadcast %136 : vector<2x8x1xf32> to vector<2x8x128xf32>
    %138 = arith.mulf %133, %137 : vector<2x8x128xf32>
    %139 = vector.shape_cast %118 : vector<1x128xf32> to vector<1x1x128xf32>
    %140 = vector.broadcast %139 : vector<1x1x128xf32> to vector<2x8x128xf32>
    %141 = arith.mulf %138, %140 : vector<2x8x128xf32>
    %142 = vector.shape_cast %120 : vector<1x128xf32> to vector<1x1x128xf32>
    %143 = vector.broadcast %142 : vector<1x1x128xf32> to vector<2x8x128xf32>
    %144 = arith.addf %141, %143 : vector<2x8x128xf32>
    %145 = arith.truncf %144 : vector<2x8x128xf32> to vector<2x8x128xbf16>
    %146 = vector.shape_cast %145 : vector<2x8x128xbf16> to vector<16x128xbf16>
    %c0_62 = arith.constant 0 : index
    %c0_63 = arith.constant 0 : index
    %c0_64 = arith.constant 0 : index
    %147 = vector.load %arg12[%c0_62, %c0_63, %c0_64] : memref<1x128x256xbf16, #tpu.memory_space<vmem>>, vector<1x128x256xbf16>
    %148 = vector.shape_cast %147 : vector<1x128x256xbf16> to vector<128x256xbf16>
    %cst_65 = arith.constant dense<0.000000e+00> : vector<16x256xf32>
    %149 = tpu.matmul %146, %148, %cst_65 {dimension_numbers = #tpu.dot_dimension_numbers<[1], [0], [0], [1], [0, 0, 1, 1], [], []>} : vector<16x128xbf16>, vector<128x256xbf16>, vector<16x256xf32> -> vector<16x256xf32>
    %c0_66 = arith.constant 0 : index
    %c0_67 = arith.constant 0 : index
    %c0_68 = arith.constant 0 : index
    %150 = vector.load %arg13[%c0_66, %c0_67, %c0_68] : memref<1x1x256xf32, #tpu.memory_space<vmem>>, vector<1x1x256xf32>
    %151 = vector.shape_cast %150 : vector<1x1x256xf32> to vector<1x256xf32>
    %152 = vector.broadcast %151 : vector<1x256xf32> to vector<16x256xf32>
    %153 = arith.addf %149, %152 : vector<16x256xf32>
    %cst_69 = arith.constant 5.000000e-01 : f32
    %154 = vector.broadcast %cst_69 : f32 to vector<16x256xf32>
    %155 = arith.mulf %154, %153 : vector<16x256xf32>
    %cst_70 = arith.constant 0.707106769 : f32
    %156 = vector.broadcast %cst_70 : f32 to vector<16x256xf32>
    %157 = arith.mulf %153, %156 : vector<16x256xf32>
    %158 = math.absf %157 : vector<16x256xf32>
    %cst_71 = arith.constant 0.327591091 : f32
    %159 = vector.broadcast %cst_71 : f32 to vector<16x256xf32>
    %160 = arith.mulf %159, %158 : vector<16x256xf32>
    %cst_72 = arith.constant 1.000000e+00 : f32
    %161 = vector.broadcast %cst_72 : f32 to vector<16x256xf32>
    %162 = arith.addf %161, %160 : vector<16x256xf32>
    %163 = tpu.reciprocal %162 {approx = true} : vector<16x256xf32> -> vector<16x256xf32>
    %cst_73 = arith.constant 1.06140542 : f32
    %164 = vector.broadcast %cst_73 : f32 to vector<16x256xf32>
    %165 = arith.mulf %164, %163 : vector<16x256xf32>
    %cst_74 = arith.constant -1.45315206 : f32
    %166 = vector.broadcast %cst_74 : f32 to vector<16x256xf32>
    %167 = arith.addf %165, %166 : vector<16x256xf32>
    %168 = arith.mulf %167, %163 : vector<16x256xf32>
    %cst_75 = arith.constant 1.42141378 : f32
    %169 = vector.broadcast %cst_75 : f32 to vector<16x256xf32>
    %170 = arith.addf %168, %169 : vector<16x256xf32>
    %171 = arith.mulf %170, %163 : vector<16x256xf32>
    %cst_76 = arith.constant -0.284496725 : f32
    %172 = vector.broadcast %cst_76 : f32 to vector<16x256xf32>
    %173 = arith.addf %171, %172 : vector<16x256xf32>
    %174 = arith.mulf %173, %163 : vector<16x256xf32>
    %cst_77 = arith.constant 0.254829586 : f32
    %175 = vector.broadcast %cst_77 : f32 to vector<16x256xf32>
    %176 = arith.addf %174, %175 : vector<16x256xf32>
    %177 = arith.mulf %176, %163 : vector<16x256xf32>
    %cst_78 = arith.constant 0.000000e+00 : f32
    %178 = vector.broadcast %cst_78 : f32 to vector<16x256xf32>
    %179 = arith.subf %178, %158 : vector<16x256xf32>
    %180 = arith.mulf %179, %158 : vector<16x256xf32>
    %181 = math.exp %180 : vector<16x256xf32>
    %182 = arith.mulf %177, %181 : vector<16x256xf32>
    %cst_79 = arith.constant 1.000000e+00 : f32
    %183 = vector.broadcast %cst_79 : f32 to vector<16x256xf32>
    %184 = arith.subf %183, %182 : vector<16x256xf32>
    %cst_80 = arith.constant 0.000000e+00 : f32
    %185 = vector.broadcast %cst_80 : f32 to vector<16x256xf32>
    %186 = arith.cmpf oge, %157, %185 : vector<16x256xf32>
    %cst_81 = arith.constant 0.000000e+00 : f32
    %187 = vector.broadcast %cst_81 : f32 to vector<16x256xf32>
    %188 = arith.subf %187, %184 : vector<16x256xf32>
    %189 = arith.select %186, %184, %188 : vector<16x256xi1>, vector<16x256xf32>
    %cst_82 = arith.constant 1.000000e+00 : f32
    %190 = vector.broadcast %cst_82 : f32 to vector<16x256xf32>
    %191 = arith.addf %190, %189 : vector<16x256xf32>
    %192 = arith.mulf %155, %191 : vector<16x256xf32>
    %193 = arith.truncf %192 : vector<16x256xf32> to vector<16x256xbf16>
    %c0_83 = arith.constant 0 : index
    %c0_84 = arith.constant 0 : index
    %c0_85 = arith.constant 0 : index
    %194 = vector.load %arg14[%c0_83, %c0_84, %c0_85] : memref<1x256x128xbf16, #tpu.memory_space<vmem>>, vector<1x256x128xbf16>
    %195 = vector.shape_cast %194 : vector<1x256x128xbf16> to vector<256x128xbf16>
    %cst_86 = arith.constant dense<0.000000e+00> : vector<16x128xf32>
    %196 = tpu.matmul %193, %195, %cst_86 {dimension_numbers = #tpu.dot_dimension_numbers<[1], [0], [0], [1], [0, 0, 1, 1], [], []>} : vector<16x256xbf16>, vector<256x128xbf16>, vector<16x128xf32> -> vector<16x128xf32>
    %c0_87 = arith.constant 0 : index
    %c0_88 = arith.constant 0 : index
    %c0_89 = arith.constant 0 : index
    %197 = vector.load %arg15[%c0_87, %c0_88, %c0_89] : memref<1x1x128xf32, #tpu.memory_space<vmem>>, vector<1x1x128xf32>
    %198 = vector.shape_cast %197 : vector<1x1x128xf32> to vector<1x128xf32>
    %199 = vector.broadcast %198 : vector<1x128xf32> to vector<16x128xf32>
    %200 = arith.addf %196, %199 : vector<16x128xf32>
    %201 = vector.shape_cast %200 : vector<16x128xf32> to vector<2x8x128xf32>
    %202 = arith.addf %201, %144 : vector<2x8x128xf32>
    %c0_90 = arith.constant 0 : index
    %c0_91 = arith.constant 0 : index
    %c0_92 = arith.constant 0 : index
    %203 = vector.load %arg16[%c0_90, %c0_91, %c0_92] : memref<1x1x128xf32, #tpu.memory_space<vmem>>, vector<1x1x128xf32>
    %204 = vector.shape_cast %203 : vector<1x1x128xf32> to vector<1x128xf32>
    %c0_93 = arith.constant 0 : index
    %c0_94 = arith.constant 0 : index
    %c0_95 = arith.constant 0 : index
    %205 = vector.load %arg17[%c0_93, %c0_94, %c0_95] : memref<1x1x128xf32, #tpu.memory_space<vmem>>, vector<1x1x128xf32>
    %206 = vector.shape_cast %205 : vector<1x1x128xf32> to vector<1x128xf32>
    %cst_96 = arith.constant dense<0.000000e+00> : vector<2x8xf32>
    %207 = vector.multi_reduction <add>, %202, %cst_96 [2] : vector<2x8x128xf32> to vector<2x8xf32>
    %208 = vector.shape_cast %207 : vector<2x8xf32> to vector<2x8x1xf32>
    %cst_97 = arith.constant 1.280000e+02 : f32
    %209 = vector.broadcast %cst_97 : f32 to vector<2x8x1xf32>
    %210 = arith.divf %208, %209 : vector<2x8x1xf32>
    %211 = vector.broadcast %210 : vector<2x8x1xf32> to vector<2x8x128xf32>
    %212 = arith.subf %202, %211 : vector<2x8x128xf32>
    %213 = arith.mulf %212, %212 : vector<2x8x128xf32>
    %cst_98 = arith.constant dense<0.000000e+00> : vector<2x8xf32>
    %214 = vector.multi_reduction <add>, %213, %cst_98 [2] : vector<2x8x128xf32> to vector<2x8xf32>
    %215 = vector.shape_cast %214 : vector<2x8xf32> to vector<2x8x1xf32>
    %cst_99 = arith.constant 1.280000e+02 : f32
    %216 = vector.broadcast %cst_99 : f32 to vector<2x8x1xf32>
    %217 = arith.divf %215, %216 : vector<2x8x1xf32>
    %218 = vector.broadcast %210 : vector<2x8x1xf32> to vector<2x8x128xf32>
    %219 = arith.subf %202, %218 : vector<2x8x128xf32>
    %cst_100 = arith.constant 9.99999996E-13 : f32
    %220 = vector.broadcast %cst_100 : f32 to vector<2x8x1xf32>
    %221 = arith.addf %217, %220 : vector<2x8x1xf32>
    %222 = math.rsqrt %221 : vector<2x8x1xf32>
    %223 = vector.broadcast %222 : vector<2x8x1xf32> to vector<2x8x128xf32>
    %224 = arith.mulf %219, %223 : vector<2x8x128xf32>
    %225 = vector.shape_cast %204 : vector<1x128xf32> to vector<1x1x128xf32>
    %226 = vector.broadcast %225 : vector<1x1x128xf32> to vector<2x8x128xf32>
    %227 = arith.mulf %224, %226 : vector<2x8x128xf32>
    %228 = vector.shape_cast %206 : vector<1x128xf32> to vector<1x1x128xf32>
    %229 = vector.broadcast %228 : vector<1x1x128xf32> to vector<2x8x128xf32>
    %230 = arith.addf %227, %229 : vector<2x8x128xf32>
    %c0_101 = arith.constant 0 : index
    %c0_102 = arith.constant 0 : index
    %c0_103 = arith.constant 0 : index
    %231 = vector.load %arg19[%c0_101, %c0_102, %c0_103] : memref<2x8x128xf32, #tpu.memory_space<vmem>>, vector<2x8x128xf32>
    tpu.vector_store %arg19[%c0_101, %c0_102, %c0_103], %230 {strides = array<i32>} : memref<2x8x128xf32, #tpu.memory_space<vmem>>, vector<2x8x128xf32>,
    %c1_i32 = arith.constant 1 : i32
    %232 = arith.cmpi eq, %arg1, %c1_i32 : i32
    %233 = arith.extui %232 : i1 to i32
    %c0_i32_104 = arith.constant 0 : i32
    %234 = arith.cmpi ne, %233, %c0_i32_104 : i32
    scf.if %234 {
      %235 = vector.extract_strided_slice %230 {offsets = [0, 0, 0], sizes = [2, 1, 128], strides = [1, 1, 1]} : vector<2x8x128xf32> to vector<2x1x128xf32>
      %236 = vector.shape_cast %235 : vector<2x1x128xf32> to vector<2x128xf32>
      %c0_105 = arith.constant 0 : index
      %c0_106 = arith.constant 0 : index
      %237 = vector.load %arg18[%c0_105, %c0_106] : memref<2x128xf32, #tpu.memory_space<vmem>>, vector<2x128xf32>
      tpu.vector_store %arg18[%c0_105, %c0_106], %236 {strides = array<i32>} : memref<2x128xf32, #tpu.memory_space<vmem>>, vector<2x128xf32>,
    } else {
    }
    return
  }
  func.func @transform_0(%arg0: i32, %arg1: i32) -> (i32, i32, i32) {
    %c0_i32 = arith.constant 0 : i32
    %c0_i32_0 = arith.constant 0 : i32
    %c0_i32_1 = arith.constant 0 : i32
    return %arg0, %c0_i32, %c0_i32_0 : i32, i32, i32
  }
  func.func @transform_1(%arg0: i32, %arg1: i32) -> (i32, i32, i32) {
    %c0_i32 = arith.constant 0 : i32
    %c0_i32_0 = arith.constant 0 : i32
    %c0_i32_1 = arith.constant 0 : i32
    return %arg0, %c0_i32, %c0_i32_0 : i32, i32, i32
  }
  func.func @transform_2(%arg0: i32, %arg1: i32) -> (i32, i32) {
    %c0_i32 = arith.constant 0 : i32
    %c0_i32_0 = arith.constant 0 : i32
    %c0_i32_1 = arith.constant 0 : i32
    return %c0_i32, %c0_i32_0 : i32, i32
  }
  func.func @transform_3(%arg0: i32, %arg1: i32) -> (i32, i32) {
    %c0_i32 = arith.constant 0 : i32
    %c0_i32_0 = arith.constant 0 : i32
    %c0_i32_1 = arith.constant 0 : i32
    return %c0_i32, %c0_i32_0 : i32, i32
  }
  func.func @transform_4(%arg0: i32, %arg1: i32) -> (i32, i32, i32) {
    %c0_i32 = arith.constant 0 : i32
    %c0_i32_0 = arith.constant 0 : i32
    %c0_i32_1 = arith.constant 0 : i32
    return %arg1, %c0_i32, %c0_i32_0 : i32, i32, i32
  }
  func.func @transform_5(%arg0: i32, %arg1: i32) -> (i32, i32, i32) {
    %c0_i32 = arith.constant 0 : i32
    %c0_i32_0 = arith.constant 0 : i32
    %c0_i32_1 = arith.constant 0 : i32
    return %arg1, %c0_i32, %c0_i32_0 : i32, i32, i32
  }
  func.func @transform_6(%arg0: i32, %arg1: i32) -> (i32, i32, i32) {
    %c0_i32 = arith.constant 0 : i32
    %c0_i32_0 = arith.constant 0 : i32
    %c0_i32_1 = arith.constant 0 : i32
    return %arg1, %c0_i32, %c0_i32_0 : i32, i32, i32
  }
  func.func @transform_7(%arg0: i32, %arg1: i32) -> (i32, i32, i32) {
    %c0_i32 = arith.constant 0 : i32
    %c0_i32_0 = arith.constant 0 : i32
    %c0_i32_1 = arith.constant 0 : i32
    return %arg1, %c0_i32, %c0_i32_0 : i32, i32, i32
  }
  func.func @transform_8(%arg0: i32, %arg1: i32) -> (i32, i32, i32) {
    %c0_i32 = arith.constant 0 : i32
    %c0_i32_0 = arith.constant 0 : i32
    %c0_i32_1 = arith.constant 0 : i32
    return %arg1, %c0_i32, %c0_i32_0 : i32, i32, i32
  }
  func.func @transform_9(%arg0: i32, %arg1: i32) -> (i32, i32, i32) {
    %c0_i32 = arith.constant 0 : i32
    %c0_i32_0 = arith.constant 0 : i32
    %c0_i32_1 = arith.constant 0 : i32
    return %arg1, %c0_i32, %c0_i32_0 : i32, i32, i32
  }
  func.func @transform_10(%arg0: i32, %arg1: i32) -> (i32, i32, i32) {
    %c0_i32 = arith.constant 0 : i32
    %c0_i32_0 = arith.constant 0 : i32
    %c0_i32_1 = arith.constant 0 : i32
    return %arg1, %c0_i32, %c0_i32_0 : i32, i32, i32
  }
  func.func @transform_11(%arg0: i32, %arg1: i32) -> (i32, i32, i32) {
    %c0_i32 = arith.constant 0 : i32
    %c0_i32_0 = arith.constant 0 : i32
    %c0_i32_1 = arith.constant 0 : i32
    return %arg1, %c0_i32, %c0_i32_0 : i32, i32, i32
  }
  func.func @transform_12(%arg0: i32, %arg1: i32) -> (i32, i32, i32) {
    %c0_i32 = arith.constant 0 : i32
    %c0_i32_0 = arith.constant 0 : i32
    %c0_i32_1 = arith.constant 0 : i32
    return %arg1, %c0_i32, %c0_i32_0 : i32, i32, i32
  }
  func.func @transform_13(%arg0: i32, %arg1: i32) -> (i32, i32, i32) {
    %c0_i32 = arith.constant 0 : i32
    %c0_i32_0 = arith.constant 0 : i32
    %c0_i32_1 = arith.constant 0 : i32
    return %arg1, %c0_i32, %c0_i32_0 : i32, i32, i32
  }
  func.func @transform_14(%arg0: i32, %arg1: i32) -> (i32, i32, i32) {
    %c0_i32 = arith.constant 0 : i32
    %c0_i32_0 = arith.constant 0 : i32
    %c0_i32_1 = arith.constant 0 : i32
    return %arg1, %c0_i32, %c0_i32_0 : i32, i32, i32
  }
  func.func @transform_15(%arg0: i32, %arg1: i32) -> (i32, i32, i32) {
    %c0_i32 = arith.constant 0 : i32
    %c0_i32_0 = arith.constant 0 : i32
    %c0_i32_1 = arith.constant 0 : i32
    return %arg1, %c0_i32, %c0_i32_0 : i32, i32, i32
  }
  func.func @transform_16(%arg0: i32, %arg1: i32) -> (i32, i32) {
    %c0_i32 = arith.constant 0 : i32
    %c0_i32_0 = arith.constant 0 : i32
    return %arg0, %c0_i32 : i32, i32
  }
}

</mosaic_0001>

<bundles_post_ra>
// kernel: text_encoder_forward.3
= control target key start
LH: loop header
LB: loop body
LE: loop exit
PB: predicated region body
PF: predicated region fallthrough
CT: control target
= control target key end

     0   :  { %v507_v2 = vmov 0   ;;  %s656_s0 = inlined_call_operand.vmem [shape: f32[2,128], index: 0, kind: input, shape index: {}]   ;;  %s657_s1 = inlined_call_operand.vmem [shape: bf16[128,256], index: 1, kind: input, shape index: {}]   ;;  %s658_s2 = inlined_call_operand.vmem [shape: f32[1,256], index: 2, kind: input, shape index: {}]   ;;  %s659_s3 = inlined_call_operand.vmem [shape: bf16[256,128], index: 3, kind: input, shape index: {}]   ;;  %s660_s4 = inlined_call_operand.vmem [shape: f32[1,128], index: 4, kind: input, shape index: {}]   ;;  %s661_s5 = inlined_call_operand.hbm [shape: f32[2,128], index: 5, kind: output, shape index: {}]  }
   0x1   :  { %v439_v0 = vld [vmem:[%s657_s1 + $0x4] ss:$8 sps:$4 sm:$0xff]   ;;  %v441_v1 = vld [vmem:[%s657_s1] ss:$8 sps:$4 sm:$0xff]   ;;  %164 = vmatprep.mubr.bf16.mxu0 %v507_v2  ;;  %v442_v3 = vld [vmem:[%s657_s1 + $0x14] ss:$8 sps:$4 sm:$0xff]  }
   0x2   :  { %132 = vmatprep.subr.bf16.mxu0 %v439_v0  ;;  %v444_v4 = vld [vmem:[%s657_s1 + $0x10] ss:$8 sps:$4 sm:$0xff]   ;;  %v445_v5 = vld [vmem:[%s657_s1 + $0x24] ss:$8 sps:$4 sm:$0xff]   ;;  %v447_v6 = vld [vmem:[%s657_s1 + $0x20] ss:$8 sps:$4 sm:$0xff]  }
   0x3   :  { %133 = vmatpush1.bf16.msra.mxu0 %v441_v1  ;;  %v448_v7 = vld [vmem:[%s657_s1 + $0x34] ss:$8 sps:$4 sm:$0xff]   ;;  %v450_v8 = vld [vmem:[%s657_s1 + $0x30] ss:$8 sps:$4 sm:$0xff]   ;;  %v451_v9 = vld [vmem:[%s657_s1 + $0x44] ss:$8 sps:$4 sm:$0xff]  }
   0x4   :  { %134 = vmatprep.subr.bf16.mxu0 %v442_v3  ;;  %v463_v10 = vld [vmem:[%s659_s3 + $0x40] sm:$0xff]   ;;  %v465_v13 = vld [vmem:[%s659_s3 + $0x48] sm:$0xff]   ;;  %v467_v15 = vld [vmem:[%s659_s3 + $0x50] sm:$0xff]  }
   0x5   :  { %v464_v11 = vld [vmem:[%s659_s3] sm:$0xff]   ;;  %415 = vmatprep.subr.bf16.mxu1 %v463_v10  ;;  %v466_v14 = vld [vmem:[%s659_s3 + $0x8] sm:$0xff]   ;;  %v454_v16 = vld [vmem:[%s657_s1 + $0x54] ss:$8 sps:$4 sm:$0xff]  }
   0x6   :  { %v453_v12 = vld [vmem:[%s657_s1 + $0x40] ss:$8 sps:$4 sm:$0xff]   ;;  %416 = vmatpush3.bf16.msra.mxu1 %v464_v11  ;;  %v456_v17 = vld [vmem:[%s657_s1 + $0x50] ss:$8 sps:$4 sm:$0xff]   ;;  %v457_v20 = vld [vmem:[%s657_s1 + $0x64] ss:$8 sps:$4 sm:$0xff]  }
   0x7   :  { %135 = vmatpush1.bf16.msra.mxu0 %v444_v4  ;;  %417 = vmatprep.subr.bf16.mxu1 %v465_v13  ;;  %v468_v18 = vld [vmem:[%s659_s3 + $0x10] sm:$0xff]   ;;  %v469_v19 = vld [vmem:[%s659_s3 + $0x58] sm:$0xff]   ;;  %v459_v21 = vld [vmem:[%s657_s1 + $0x60] ss:$8 sps:$4 sm:$0xff]  }
   0x8   :  { %136 = vmatprep.subr.bf16.mxu0 %v445_v5  ;;  %v460_v22 = vld [vmem:[%s657_s1 + $0x74] ss:$8 sps:$4 sm:$0xff]   ;;  %v471_v24 = vld [vmem:[%s659_s3 + $0x60] sm:$0xff]  }
   0x9   :  { %v470_v23 = vld [vmem:[%s659_s3 + $0x18] sm:$0xff]   ;;  %v472_v25 = vld [vmem:[%s659_s3 + $0x20] sm:$0xff]  }
   0xa   :  { %418 = vmatpush3.bf16.msra.mxu1 %v466_v14 }
   0xb   :  { %137 = vmatpush1.bf16.msra.mxu0 %v447_v6  ;;  %419 = vmatprep.subr.bf16.mxu1 %v467_v15 }
   0xc   :  { %138 = vmatprep.subr.bf16.mxu0 %v448_v7 }
   0xe   :  { %420 = vmatpush3.bf16.msra.mxu1 %v468_v18 }
   0xf   :  { %139 = vmatpush1.bf16.msra.mxu0 %v450_v8  ;;  %421 = vmatprep.subr.bf16.mxu1 %v469_v19 }
  0x10   :  { %140 = vmatprep.subr.bf16.mxu0 %v451_v9 }
  0x12   :  { %422 = vmatpush3.bf16.msra.mxu1 %v470_v23 }
  0x13   :  { %141 = vmatpush1.bf16.msra.mxu0 %v453_v12 }
  0x14   :  { %142 = vmatprep.subr.bf16.mxu0 %v454_v16 }
  0x17   :  { %143 = vmatpush1.bf16.msra.mxu0 %v456_v17 }
  0x18   :  { %144 = vmatprep.subr.bf16.mxu0 %v457_v20 }
  0x19   :  { %10 = vsyncpa [#allocation3], 0  ;;  %v462_v26 = vld [vmem:[%s657_s1 + $0x70] ss:$8 sps:$4 sm:$0xff]   ;;  %v22_v27 = vld [vmem:[%s656_s0] sm:$0x3]  ;;  %423 = vmatprep.subr.bf16.mxu1 %v471_v24  ;;  %v42_v35 = vlaneseq }
  0x1a   :  { %v473_v28 = vld [vmem:[%s659_s3 + $0x68] sm:$0xff]   ;;  %v23_v29 = vpack.c.bf16 %v22_v27, %v22_v27  ;;  %424 = vmatpush3.bf16.msra.mxu1 %v472_v25  ;;  %v475_v31 = vld [vmem:[%s659_s3 + $0x70] sm:$0xff]   ;;  %v477_v33 = vld [vmem:[%s659_s3 + $0x78] sm:$0xff]   ;;  %vm353_vm0 = vcmask 1041408  }
  0x1b   :  { %145 = vmatpush1.bf16.msra.mxu0 %v459_v21  ;;  %v474_v30 = vld [vmem:[%s659_s3 + $0x28] sm:$0xff]   ;;  %425 = vmatprep.subr.bf16.mxu1 %v473_v28  ;;  %v476_v32 = vld [vmem:[%s659_s3 + $0x30] sm:$0xff]   ;;  %v478_v34 = vld [vmem:[%s659_s3 + $0x38] sm:$0xff]   ;;  %v43_v36 = vshrl.u32 %v42_v35, 7 }
  0x1c   :  { %146 = vmatprep.subr.bf16.mxu0 %v460_v22  ;;  %v40_v38 = vld [vmem:[%s658_s2] sm:$0x3]  ;;  %s508_s2 = smov [#allocation2]  }
  0x1d   :  { %v44_v37 = vsub.s32 0, %v43_v36  ;;  %v48_v39 = vsub.s32 1, %v43_v36  ;;  %v398_v53 = vld [vmem:[%s660_s4] ss:$0 sm:$0xff]  ;;  %s374_s4 = sshll.u32 %s508_s2, 4  ;;  %s375_s4 = int_to_ptr.vmem [resolvable:$true] %s374_s4 }
  0x1e   :  { %426 = vmatpush3.bf16.msra.mxu1 %v474_v30  ;;  %s483_s10 = scalar_lea.vmem %s375_s4, 32  ;;  %p488_p1 = scmp.lt.s32.totalorder %s375_s4, %s375_s4 }
  0x1f   :  { %147 = vmatpush1.bf16.msra.mxu0 %v462_v26  ;;  %427 = vmatprep.subr.bf16.mxu1 %v475_v31  ;;  %v45_v40 = vrot.slane %v40_v38, %v44_v37  ;;  %v49_v41 = vrot.slane %v40_v38, %v48_v39  ;;  %p484_p0 = scmp.ne.s32.totalorder %s375_s4, %s483_s10  ;;  %p489_p2 = scmp.lt.s32.totalorder %s483_s10, %s483_s10 }
  0x21   :  { %p490_p3 = por %p489_p2, %p488_p1 }
  0x22   :  { %165 = vmatmul.mubr.bf16.vlgmr.msra.gmra.mrb[0].mxu0 %v23_v29  ;;  %428 = vmatpush3.bf16.msra.mxu1 %v476_v32 }
  0x23   :  { %429 = vmatprep.subr.bf16.mxu1 %v477_v33  ;;  %p491_p4 = pnand %p490_p3, %p484_p0 }
  0x26   :  { %430 = vmatpush3.bf16.msra.mxu1 %v478_v34 }
  0xf5   :  { %v166_v42 = vpop.f32.mrb[0].mxu0 }
  0xf6   :  { %v167_v43 = vadd.f32 %v166_v42, %v45_v40  ;;  %v168_v44 = vpop.f32.mrb[1].mxu0 }
  0xf7   :  { %v169_v45 = vadd.f32 %v168_v44, %v49_v41  ;;  %v170_v46 = vpop.f32.mrb[2].mxu0 }
  0xf8   :  { %v173_v47 = vmax.f32 %v167_v43, 0.0  ;;  %v171_v48 = vpop.f32.mrb[3].mxu0 }
  0xf9   :  { %v174_v49 = vmax.f32 %v169_v45, 0.0 }
  0xfa   :  { %v175_v51 = vpack.c.bf16 %v173_v47, %v173_v47 }
  0xfb   :  { %v176_v50 = vpack.c.bf16 %v174_v49, %v174_v49 }
  0xfd   :  { %344 = vmatprep.mubr.bf16.mxu1 %v176_v50 }
  0xfe   :  { %345 = vmatmul.mubr.bf16.vlgmr.msra.gmra.mrb[0].mxu1 %v175_v51 }
 0x1d1   :  { %v431_v52 = vpop.f32.mrb[0].mxu1 }
 0x1d2   :  { %v432_v54 = vpop.f32.mrb[1].mxu1 }
 0x1d3   :  { %v433_v55 = vadd.f32 %v432_v54, %v431_v52  ;;  %v434_v56 = vpop.f32.mrb[2].mxu1 }
 0x1d4   :  { %v435_v57 = vpop.f32.mrb[3].mxu1 }
 0x1d5   :  { %v347_v58 = vadd.f32 %v433_v55, %v398_v53 }
 0x1d7   :  { %v352_v59 = vmul.f32 %v347_v58, %v347_v58 }
 0x1d9   :  { %v354_v60 = vsel %vm353_vm0, %v352_v59, 0.0 }
 0x1da   :  { %355 = vadd.xlane.f32.xlu0 %v354_v60 }
 0x267   :  { %v356_v61 = vpop.xlane.xlu0 %355 }
 0x268   :  { %479 = vrsqrt.f32 %v356_v61  ;;  %vm359_vm1 = vcmp.eq.f32.partialorder %v356_v61, inf  ;;  %v362_v0 = vand.u32 2147483648, %v356_v61  ;;  %vm361_vm2 = vcmp.eq.f32.partialorder %v356_v61, 0.0 }
 0x272   :  { %v480_v62 = vpop.eup %479 }
 0x273   :  { %v358_v63 = vmul.f32 %v480_v62, %v356_v61 }
 0x275   :  { %v360_v1 = vsel %vm359_vm1, %v356_v61, %v358_v63 }
 0x276   :  { %v363_v2 = vsel %vm361_vm2, %v362_v0, %v360_v1 }
 0x277   :  { %v364_v3 = vmax.f32 %v363_v2, 1e-12 }
 0x279   :  { %481 = vrcp.f32 %v364_v3 }
 0x283   :  { %v482_v4 = vpop.eup %481 }
 0x284   :  { %v366_v5 = vmul.f32 %v482_v4, %v347_v58 }
 0x286   :  { %367 = vst [vmem:[#allocation2] sm:$0x3] %v366_v5 }
 0x287   :  { %494 = shalt.err (!%p491_p4)
}
 0x288   :  { %s495_s13 = scalar_lea.hbm %s661_s5, 32 }
 0x289   :  { %p496_p5 = scmp.ne.s32.totalorder %s661_s5, %s495_s13  ;;  %p499_p6 = scmp.lt.u32.totalorder %s495_s13, %s661_s5 }
 0x28b   :  { %p501_p7 = pnand %p499_p6, %p496_p5 }
 0x28d   :  { %504 = shalt.err (!%p501_p7)
}
 0x28e   :  { %377 = dma.vmem_to_hbm [thread:$0]  %s375_s4, 32, %s661_s5, [#allocation3]  }
 0x28f   :  { %505 = dma.done.wait [#allocation3], 32  }
 0x290   :  { %506 = vsyncadd [#allocation3], 4294967264 }
 0x291   :  { %381 = vsyncpa [#allocation3], 1 }

// kernel: text_encoder_forward.2
= control target key start
LH: loop header
LB: loop body
LE: loop exit
PB: predicated region body
PF: predicated region fallthrough
CT: control target
= control target key end

     0   :  { %s4968_s0 = inlined_call_operand.vmem [shape: f32[2,8,128], index: 0, kind: input, shape index: {}]   ;;  %s4969_s1 = inlined_call_operand.vmem [shape: f32[2,1,8], index: 1, kind: input, shape index: {}]   ;;  %s4970_s2 = inlined_call_operand.hbm [shape: f32[1,128], index: 2, kind: input, shape index: {}]   ;;  %s4971_s3 = inlined_call_operand.hbm [shape: f32[1,128], index: 3, kind: input, shape index: {}]   ;;  %s4972_s4 = inlined_call_operand.vmem [shape: bf16[2,128,384], index: 4, kind: input, shape index: {}]   ;;  %s4973_s5 = inlined_call_operand.vmem [shape: f32[2,1,384], index: 5, kind: input, shape index: {}]   ;;  %s4974_s6 = inlined_call_operand.vmem [shape: bf16[2,128,128], index: 6, kind: input, shape index: {}]   ;;  %s4975_s7 = inlined_call_operand.hbm [shape: f32[2,1,128], index: 7, kind: input, shape index: {}]   ;;  %s4976_s8 = inlined_call_operand.hbm [shape: f32[2,1,128], index: 8, kind: input, shape index: {}]   ;;  %s4977_s9 = inlined_call_operand.hbm [shape: f32[2,1,128], index: 9, kind: input, shape index: {}]   ;;  %s4978_s10 = inlined_call_operand.vmem [shape: bf16[2,128,256], index: 10, kind: input, shape index: {}]   ;;  %s4979_s11 = inlined_call_operand.hbm [shape: f32[2,1,256], index: 11, kind: input, shape index: {}]   ;;  %s4980_s12 = inlined_call_operand.hbm [shape: bf16[2,256,128], index: 12, kind: input, shape index: {}]   ;;  %s4981_s13 = inlined_call_operand.hbm [shape: f32[2,1,128], index: 13, kind: input, shape index: {}]   ;;  %s4982_s14 = inlined_call_operand.hbm [shape: f32[2,1,128], index: 14, kind: input, shape index: {}]   ;;  %s4983_s15 = inlined_call_operand.hbm [shape: f32[2,1,128], index: 15, kind: input, shape index: {}]   ;;  %s4984_s16 = inlined_call_operand.vmem [shape: f32[2,128], index: 16, kind: output, shape index: {}]  }
   0x1   :  { %5006 = sst [smem:[#allocation24_spill]] %s4968_s0 }
   0x2   :  { %5007 = sst [smem:[#allocation25_spill]] %s4969_s1 }
   0x3   :  { %5008 = sst [smem:[#allocation26_spill]] %s4970_s2 }
   0x4   :  { %5009 = sst [smem:[#allocation27_spill]] %s4971_s3 }
   0x5   :  { %5010 = sst [smem:[#allocation28_spill]] %s4972_s4 }
   0x6   :  { %5011 = sst [smem:[#allocation29_spill]] %s4973_s5 }
   0x7   :  { %5012 = sst [smem:[#allocation30_spill]] %s4974_s6 }
   0x8   :  { %5013 = sst [smem:[#allocation31_spill]] %s4975_s7 }
   0x9   :  { %5014 = sst [smem:[#allocation32_spill]] %s4976_s8 }
   0xa   :  { %5015 = sst [smem:[#allocation33_spill]] %s4977_s9 }
   0xb   :  { %5016 = sst [smem:[#allocation34_spill]] %s4978_s10 }
   0xc   :  { %5017 = sst [smem:[#allocation35_spill]] %s4979_s11 }
   0xd   :  { %5018 = sst [smem:[#allocation36_spill]] %s4980_s12 }
   0xe   :  { %5019 = sst [smem:[#allocation37_spill]] %s4981_s13 }
   0xf   :  { %5020 = sst [smem:[#allocation38_spill]] %s4984_s16 }
  0x10   :  { %21 = vsyncpa [#allocation5], 0 }
  0x11   :  { %22 = vsyncpa [#allocation7], 0  ;;  %s4192_s21 = smov 0   ;;  %s4194_s22 = smov 0  }
  0x12   :  { %s4196_s23 = smov 0   ;;  %s4198_s24 = smov 0  }
  0x13   :  { %s4200_s25 = smov 0   ;;  %s4202_s26 = smov 0  }
  0x14 LB: > { %5021 = sst [smem:[#allocation19_spill]] %s4075_s23  ;;  %s4986_s27 = sadd.s32 4294967295, %s4087_s26   ;;  %s4087_s26 = sphi %s4202_s26, %s28_s26   ;;  %s4083_s25 = sphi %s4200_s25, %s5072_s25   ;;  %s4079_s24 = sphi %s4198_s24, %s5071_s24   ;;  %s4075_s23 = sphi %s4196_s23, %s5067_s23   ;;  %s4071_s22 = sphi %s4194_s22, %s5070_s22   ;;  %s4067_s21 = sphi %s4192_s21, %s5069_s21  }
  0x15   : > { %5022 = sst [smem:[#allocation20_spill]] %s4079_s24  ;;  %s37_s28 = sadd.s32 1, %s4083_s25 }
  0x16   : > { %p38_p0 = scmp.ge.s32.totalorder %s37_s28, 2  ;;  %s219_s29 = sadd.s32 1, %s4075_s23 }
  0x17   : > { %p226_p1 = scmp.ne.s32.totalorder %s4075_s23, %s4071_s22  ;;  %p227_p2 = scmp.eq.s32.totalorder %s4087_s26, 0 }
  0x18   : > { %s5074_s28 = smov (%p38_p0, %s37_s28), 0  ;;  %p232_p4 = scmp.ne.s32.totalorder %s4071_s22, %s4067_s21 }
  0x19   : > { %5023 = sst [smem:[#allocation21_spill]] %s5074_s28  ;;  %p4228_p3 = por %p227_p2, %p226_p1 }
  0x1a   : > { %s216_s0 = ssub.s32 %s4083_s25, %s5074_s28  ;;  %p4237_p5 = scmp.eq.s32.totalorder %s4986_s27, 0 }
  0x1b   : > { %p217_p6 = scmp.eq.s32.totalorder %s216_s0, 0  ;;  %p3131_p7 = scmp.ge.s32.totalorder %s4087_s26, 1 }
  0x1c   : > { %s5025_s17 = scalar_select %p4237_p5, 1, 0 }
  0x1d   : > { %p4244_p8 = por %p4237_p5, %p232_p4  ;;  %p477_p9 = scmp.lt.s32.totalorder %s4087_s26, 3 }
  0x1e   : > { %s4250_s19 = scalar_select %p217_p6, %s4075_s23, %s219_s29  }
  0x1f   : > { %s5026_s18 = scalar_select %p4244_p8, 1, 0 }
  0x20   : > { %5028 = sst [smem:[#allocation23_spill]] %s4250_s19  ;;  %p4252_p10 = pnand %p3131_p7, %p477_p9 }
  0x21   : > { %5027 = sst [smem:[#allocation22_spill]] %s5026_s18  ;;  %s4089_s21 = smov [#allocation4]  }
  0x22   : > { %s5029_s20 = scalar_select %p4252_p10, 1, 0 }
  0x23   : > { %p3498_p11 = pneg %p4252_p10  ;;  %s507_s27 = sshll.u32 %s4089_s21, 4  ;;  %s508_s27 = int_to_ptr.vmem [resolvable:$true] %s507_s27 }
  0x24   : > { %p3532_p12 = scmp.lt.s32.totalorder %s4087_s26, 2  ;;  %s4266_s29 = sand.u32 1, %s4075_s23  }
  0x25   : > { %p4261_p13 = pnand %p3498_p11, %p4237_p5  ;;  %s552_s19 = sand.u32 1, %s4087_s26  }
  0x26   : > { %p4270_p0 = pnand %p3532_p12, %p4228_p3  ;;  %s5032_s2 = sld [smem:[#allocation26_spill]] }
  0x27   : > { %s5030_s0 = scalar_select %p4261_p13, 1, 0 }
  0x28   : > { %s5031_s28 = scalar_select %p4270_p0, 1, 0 }
  0x29   : > { %p4995_p2 = pneg %p4261_p13 }
  0x2c   : > { %s3733_s21 = scalar_lea.hbm %s5032_s2, 16 }
  0x2d   : > { %p3734_p1 = scmp.ne.s32.totalorder %s5032_s2, %s3733_s21  ;;  %p3740_p3 = scmp.lt.u32.totalorder %s3733_s21, %s5032_s2 }
  0x2f   : > { %p3736_p4 = pnand %p4995_p2, %p3734_p1 }
  0x31   : > { %p3737_p6 = pneg %p3736_p4 }
  0x33   : > { %p3742_p7 = pnand %p3740_p3, %p3737_p6 }
  0x35   : > { %3745 = shalt.err (!%p3742_p7)
}
  0x36   : > { %s3746_s4 = scalar_lea.vmem %s508_s27, 16  ;;  %s3753_s1 = scalar_lea.vmem %s508_s27, 32 }
  0x37   : > { %p3747_p9 = scmp.ne.s32.totalorder %s508_s27, %s3746_s4  ;;  %p3754_p8 = scmp.lt.s32.totalorder %s508_s27, %s508_s27 }
  0x38   : > { %p3755_p5 = scmp.lt.s32.totalorder %s3753_s1, %s3746_s4 }
  0x39   : > { %p3749_p11 = pnand %p3747_p9, %p4995_p2 }
  0x3a   : > { %p3756_p10 = por %p3755_p5, %p3754_p8 }
  0x3b   : > { %p3750_p12 = pneg %p3749_p11 }
  0x3d   : > { %p3757_p0 = pnand %p3756_p10, %p3750_p12 }
  0x3f   : > { %3760 = shalt.err (!%p3757_p0)
}
  0x40   : > { %3501 = dma.hbm_to_vmem [thread:$0]  (!%p4261_p13), %s5032_s2, 16, %s508_s27, [#allocation5]  }
  0x41   : > { %s4298_s16 = sshll.u32 %s4083_s25, 4  ;;  %s555_s23 = scalar_lea.vmem [#allocation8], %s4266_s29 }
  0x42   : > { %s562_s21 = sshll.u32 %s555_s23, 4  ;;  %s5033_s7 = sld [smem:[#allocation31_spill]]  ;;  %s4307_s21 = int_to_ptr.vmem [resolvable:$true] %s562_s21 }
  0x43   : > { %s4309_s1 = scalar_lea.sflag [#allocation5], %s552_s19  ;;  %p5034_p8 = scmp.ne.s32.totalorder %s5031_s28, 0 }
  0x45   : > { %p4315_p10 = pneg %p5034_p8 }
  0x47   : > { %s5035_s27 = scalar_select %p4315_p10, 1, 0 }
  0x48   : > { %s4305_s4 = scalar_lea.hbm %s5033_s7, %s4298_s16  ;;  %s3766_s23 = scalar_lea.hbm %s5033_s7, 32 }
  0x49   : > { %s3761_s5 = scalar_lea.hbm %s4305_s4, 16  ;;  %p3767_p4 = scmp.lt.u32.totalorder %s4305_s4, %s5033_s7 }
  0x4a   : > { %p3762_p5 = scmp.ne.s32.totalorder %s4305_s4, %s3761_s5  ;;  %p3768_p6 = scmp.lt.u32.totalorder %s3766_s23, %s3761_s5 }
  0x4b   : > { %p3770_p7 = scmp.lt.u32.totalorder %s3761_s5, %s4305_s4 }
  0x4c   : > { %p3764_p0 = pnand %p4315_p10, %p3762_p5  ;;  %p3769_p3 = por %p3768_p6, %p3767_p4 }
  0x4e   : > { %p3765_p1 = pneg %p3764_p0  ;;  %p3771_p9 = por %p3770_p7, %p3769_p3 }
  0x50   : > { %p3772_p11 = pnand %p3771_p9, %p3765_p1 }
  0x52   : > { %3775 = shalt.err (!%p3772_p11)
}
  0x53   : > { %s3776_s19 = scalar_lea.vmem %s4307_s21, 16  ;;  %s4090_s6 = smov [#allocation8]  }
  0x54   : > { %p3777_p12 = scmp.ne.s32.totalorder %s4307_s21, %s3776_s19  ;;  %s3781_s10 = sshll.u32 %s4090_s6, 4  ;;  %s3782_s10 = int_to_ptr.vmem [resolvable:$false] %s3781_s10 }
  0x55   : > { %s3783_s2 = scalar_lea.vmem %s3782_s10, 32  ;;  %p3784_p2 = scmp.lt.s32.totalorder %s4307_s21, %s3782_s10 }
  0x56   : > { %p3779_p5 = pnand %p3777_p12, %p4315_p10  ;;  %p3785_p13 = scmp.lt.s32.totalorder %s3783_s2, %s3776_s19 }
  0x58   : > { %p3780_p0 = pneg %p3779_p5  ;;  %p3786_p4 = por %p3785_p13, %p3784_p2 }
  0x5a   : > { %p3787_p6 = pnand %p3786_p4, %p3780_p0 }
  0x5c   : > { %3790 = shalt.err (!%p3787_p6)
}
  0x5d   : > { %3508 = dma.hbm_to_vmem [thread:$0]  (!%p5034_p8), %s4305_s4, 16, %s4307_s21, %s4309_s1  }
  0x5e   : > { %s5036_s8 = sld [smem:[#allocation32_spill]]  ;;  %s572_s19 = scalar_lea.vmem [#allocation9], %s4266_s29 }
  0x5f   : > { %s579_s6 = sshll.u32 %s572_s19, 4  ;;  %s5037_s9 = sld [smem:[#allocation33_spill]]  ;;  %s580_s6 = int_to_ptr.vmem [resolvable:$true] %s579_s6 }
  0x64   : > { %s4343_s30 = scalar_lea.hbm %s5036_s8, %s4298_s16  ;;  %s3796_s5 = scalar_lea.hbm %s5036_s8, 32 }
  0x65   : > { %s4350_s7 = scalar_lea.hbm %s5037_s9, %s4298_s16  ;;  %s3791_s24 = scalar_lea.hbm %s4343_s30, 16 }
  0x66   : > { %p3792_p13 = scmp.ne.s32.totalorder %s4343_s30, %s3791_s24  ;;  %p3797_p3 = scmp.lt.u32.totalorder %s4343_s30, %s5036_s8 }
  0x67   : > { %p3798_p7 = scmp.lt.u32.totalorder %s3796_s5, %s3791_s24  ;;  %p3800_p11 = scmp.lt.u32.totalorder %s3791_s24, %s4343_s30 }
  0x68   : > { %p3794_p2 = pnand %p3792_p13, %p4315_p10 }
  0x69   : > { %p3799_p9 = por %p3798_p7, %p3797_p3 }
  0x6a   : > { %p3795_p1 = pneg %p3794_p2 }
  0x6b   : > { %p3801_p12 = por %p3800_p11, %p3799_p9 }
  0x6d   : > { %p3802_p5 = pnand %p3801_p12, %p3795_p1 }
  0x6f   : > { %3805 = shalt.err (!%p3802_p5)
}
  0x70   : > { %s3806_s19 = scalar_lea.vmem %s580_s6, 16  ;;  %s4091_s10 = smov [#allocation9]  }
  0x71   : > { %p3807_p0 = scmp.ne.s32.totalorder %s580_s6, %s3806_s19  ;;  %s3811_s2 = sshll.u32 %s4091_s10, 4  ;;  %s3812_s2 = int_to_ptr.vmem [resolvable:$false] %s3811_s2 }
  0x72   : > { %s3813_s21 = scalar_lea.vmem %s3812_s2, 32  ;;  %p3814_p13 = scmp.lt.s32.totalorder %s580_s6, %s3812_s2 }
  0x73   : > { %p3809_p4 = pnand %p3807_p0, %p4315_p10  ;;  %p3815_p2 = scmp.lt.s32.totalorder %s3813_s21, %s3806_s19 }
  0x75   : > { %p3810_p6 = pneg %p3809_p4  ;;  %p3816_p8 = por %p3815_p2, %p3814_p13 }
  0x77   : > { %p3817_p3 = pnand %p3816_p8, %p3810_p6 }
  0x79   : > { %3820 = shalt.err (!%p3817_p3)
}
  0x7a   : > { %p5038_p7 = scmp.ne.s32.totalorder %s5031_s28, 0  ;;  %s589_s24 = scalar_lea.vmem [#allocation10], %s4266_s29 }
  0x7b   : > { %s596_s18 = sshll.u32 %s589_s24, 4  ;;  %s3140_s4 = sshll.u32 %s4266_s29, 1  ;;  %s597_s18 = int_to_ptr.vmem [resolvable:$true] %s596_s18 }
  0x7c   : > { %3511 = dma.hbm_to_vmem [thread:$0]  (!%p5038_p7), %s4343_s30, 16, %s580_s6, %s4309_s1  }
  0x7d   : > { %s3821_s5 = scalar_lea.hbm %s4350_s7, 16  ;;  %s3826_s10 = scalar_lea.hbm %s5037_s9, 32 }
  0x7e   : > { %p3822_p1 = scmp.ne.s32.totalorder %s4350_s7, %s3821_s5  ;;  %p3827_p11 = scmp.lt.u32.totalorder %s4350_s7, %s5037_s9 }
  0x7f   : > { %p3828_p12 = scmp.lt.u32.totalorder %s3826_s10, %s3821_s5  ;;  %p3830_p0 = scmp.lt.u32.totalorder %s3821_s5, %s4350_s7 }
  0x80   : > { %p3824_p8 = pnand %p3822_p1, %p4315_p10 }
  0x81   : > { %p3829_p5 = por %p3828_p12, %p3827_p11 }
  0x82   : > { %p3825_p9 = pneg %p3824_p8 }
  0x83   : > { %p3831_p4 = por %p3830_p0, %p3829_p5 }
  0x85   : > { %p3832_p6 = pnand %p3831_p4, %p3825_p9 }
  0x87   : > { %3835 = shalt.err (!%p3832_p6)
}
  0x88   : > { %s3836_s30 = scalar_lea.vmem %s597_s18, 16  ;;  %s4092_s6 = smov [#allocation10]  }
  0x89   : > { %p3837_p13 = scmp.ne.s32.totalorder %s597_s18, %s3836_s30  ;;  %s3841_s24 = sshll.u32 %s4092_s6, 4  ;;  %s3842_s24 = int_to_ptr.vmem [resolvable:$false] %s3841_s24 }
  0x8a   : > { %s3843_s23 = scalar_lea.vmem %s3842_s24, 32  ;;  %p3844_p1 = scmp.lt.s32.totalorder %s597_s18, %s3842_s24 }
  0x8b   : > { %p3839_p2 = pnand %p3837_p13, %p4315_p10  ;;  %p3845_p8 = scmp.lt.s32.totalorder %s3843_s23, %s3836_s30 }
  0x8d   : > { %p3840_p3 = pneg %p3839_p2  ;;  %p3846_p7 = por %p3845_p8, %p3844_p1 }
  0x8f   : > { %p3847_p11 = pnand %p3846_p7, %p3840_p3 }
  0x91   : > { %3850 = shalt.err (!%p3847_p11)
}
  0x92   : > { %p5039_p12 = scmp.ne.s32.totalorder %s5031_s28, 0  ;;  %s3257_s5 = sshll.u32 %s4083_s25, 5 }
  0x93   : > { %s615_s19 = scalar_lea.vmem [#allocation11], %s3140_s4  ;;  %s5040_s11 = sld [smem:[#allocation35_spill]] }
  0x94   : > { %3514 = dma.hbm_to_vmem [thread:$0]  (!%p5039_p12), %s4350_s7, 16, %s597_s18, %s4309_s1  }
  0x95   : > { %s623_s10 = sshll.u32 %s615_s19, 4  ;;  %s624_s10 = int_to_ptr.vmem [resolvable:$true] %s623_s10 }
  0x99   : > { %s621_s6 = scalar_lea.hbm %s5040_s11, %s3257_s5  ;;  %s3856_s8 = scalar_lea.hbm %s5040_s11, 64 }
  0x9a   : > { %s3851_s30 = scalar_lea.hbm %s621_s6, 32  ;;  %p3857_p0 = scmp.lt.u32.totalorder %s621_s6, %s5040_s11 }
  0x9b   : > { %p3852_p7 = scmp.ne.s32.totalorder %s621_s6, %s3851_s30  ;;  %p3858_p4 = scmp.lt.u32.totalorder %s3856_s8, %s3851_s30 }
  0x9c   : > { %p3860_p13 = scmp.lt.u32.totalorder %s3851_s30, %s621_s6 }
  0x9d   : > { %p3854_p9 = pnand %p3852_p7, %p4315_p10  ;;  %p3859_p6 = por %p3858_p4, %p3857_p0 }
  0x9f   : > { %p3855_p5 = pneg %p3854_p9  ;;  %p3861_p2 = por %p3860_p13, %p3859_p6 }
  0xa1   : > { %p3862_p3 = pnand %p3861_p2, %p3855_p5 }
  0xa3   : > { %3865 = shalt.err (!%p3862_p3)
}
  0xa4   : > { %s3866_s18 = scalar_lea.vmem %s624_s10, 32  ;;  %s4093_s4 = smov [#allocation11]  }
  0xa5   : > { %p3867_p1 = scmp.ne.s32.totalorder %s624_s10, %s3866_s18  ;;  %s3871_s5 = sshll.u32 %s4093_s4, 4  ;;  %s3872_s5 = int_to_ptr.vmem [resolvable:$false] %s3871_s5 }
  0xa6   : > { %s3873_s19 = scalar_lea.vmem %s3872_s5, 64  ;;  %p3874_p7 = scmp.lt.s32.totalorder %s624_s10, %s3872_s5 }
  0xa7   : > { %p3869_p8 = pnand %p3867_p1, %p4315_p10  ;;  %p3875_p9 = scmp.lt.s32.totalorder %s3873_s19, %s3866_s18 }
  0xa9   : > { %p3870_p11 = pneg %p3869_p8  ;;  %p3876_p12 = por %p3875_p9, %p3874_p7 }
  0xab   : > { %p3877_p0 = pnand %p3876_p12, %p3870_p11 }
  0xad   : > { %3880 = shalt.err (!%p3877_p0)
}
  0xae   : > { %p5041_p4 = scmp.ne.s32.totalorder %s5031_s28, 0  ;;  %s3143_s8 = sshll.u32 %s4266_s29, 7 }
  0xaf   : > { %s3258_s9 = sshll.u32 %s4083_s25, 11  ;;  %s5042_s12 = sld [smem:[#allocation36_spill]] }
  0xb0   : > { %3517 = dma.hbm_to_vmem [thread:$0]  (!%p5041_p4), %s621_s6, 32, %s624_s10, %s4309_s1  }
  0xb1   : > { %s634_s24 = scalar_lea.vmem [#allocation12], %s3143_s8 }
  0xb2   : > { %s641_s23 = sshll.u32 %s634_s24, 4  ;;  %s4416_s23 = int_to_ptr.vmem [resolvable:$true] %s641_s23 }
  0xb5   : > { %s4414_s30 = scalar_lea.hbm %s5042_s12, %s3258_s9  ;;  %s3886_s18 = scalar_lea.hbm %s5042_s12, 4096 }
  0xb6   : > { %s3881_s7 = scalar_lea.hbm %s4414_s30, 2048  ;;  %p3887_p13 = scmp.lt.u32.totalorder %s4414_s30, %s5042_s12 }
  0xb7   : > { %p3882_p12 = scmp.ne.s32.totalorder %s4414_s30, %s3881_s7  ;;  %p3888_p2 = scmp.lt.u32.totalorder %s3886_s18, %s3881_s7 }
  0xb8   : > { %p3890_p1 = scmp.lt.u32.totalorder %s3881_s7, %s4414_s30 }
  0xb9   : > { %p3884_p5 = pnand %p3882_p12, %p4315_p10  ;;  %p3889_p3 = por %p3888_p2, %p3887_p13 }
  0xbb   : > { %p3885_p6 = pneg %p3884_p5  ;;  %p3891_p8 = por %p3890_p1, %p3889_p3 }
  0xbd   : > { %p3892_p11 = pnand %p3891_p8, %p3885_p6 }
  0xbf   : > { %3895 = shalt.err (!%p3892_p11)
}
  0xc0   : > { %s3896_s19 = scalar_lea.vmem %s4416_s23, 2048  ;;  %s4094_s8 = smov [#allocation12]  }
  0xc1   : > { %p3897_p7 = scmp.ne.s32.totalorder %s4416_s23, %s3896_s19  ;;  %s3901_s9 = sshll.u32 %s4094_s8, 4  ;;  %s3902_s9 = int_to_ptr.vmem [resolvable:$false] %s3901_s9 }
  0xc2   : > { %s3903_s2 = scalar_lea.vmem %s3902_s9, 4096  ;;  %p3904_p12 = scmp.lt.s32.totalorder %s4416_s23, %s3902_s9 }
  0xc3   : > { %p3899_p9 = pnand %p3897_p7, %p4315_p10  ;;  %p3905_p5 = scmp.lt.s32.totalorder %s3903_s2, %s3896_s19 }
  0xc5   : > { %p3900_p0 = pneg %p3899_p9  ;;  %p3906_p13 = por %p3905_p5, %p3904_p12 }
  0xc7   : > { %p3907_p2 = pnand %p3906_p13, %p3900_p0 }
  0xc9   : > { %3910 = shalt.err (!%p3907_p2)
}
  0xca   : > { %s4095_s21 = smov 64   ;;  %s4096_s24 = smov 4  }
  0xcb   : > { %3520 = dma.hbm_to_vmem [thread:$0]  (!%p5041_p4), %s4414_s30, 2048, %s4416_s23, %s4309_s1, %s4095_s21, %s4095_s21, %s4096_s24  }
  0xcc   : > { %s5043_s13 = sld [smem:[#allocation37_spill]]  ;;  %s654_s18 = scalar_lea.vmem [#allocation13], %s4266_s29 }
  0xcd   : > { %s661_s4 = sshll.u32 %s654_s18, 4  ;;  %s4451_s8 = scalar_lea.hbm %s4982_s14, %s4298_s16  ;;  %s662_s4 = int_to_ptr.vmem [resolvable:$true] %s661_s4 }
  0xd2   : > { %s4444_s6 = scalar_lea.hbm %s5043_s13, %s4298_s16  ;;  %s3916_s2 = scalar_lea.hbm %s5043_s13, 32 }
  0xd3   : > { %s3911_s9 = scalar_lea.hbm %s4444_s6, 16  ;;  %p3917_p8 = scmp.lt.u32.totalorder %s4444_s6, %s5043_s13 }
  0xd4   : > { %p3912_p6 = scmp.ne.s32.totalorder %s4444_s6, %s3911_s9  ;;  %p3918_p11 = scmp.lt.u32.totalorder %s3916_s2, %s3911_s9 }
  0xd5   : > { %p3920_p9 = scmp.lt.u32.totalorder %s3911_s9, %s4444_s6 }
  0xd6   : > { %p3914_p3 = pnand %p3912_p6, %p4315_p10  ;;  %p3919_p7 = por %p3918_p11, %p3917_p8 }
  0xd8   : > { %p3915_p1 = pneg %p3914_p3  ;;  %p3921_p0 = por %p3920_p9, %p3919_p7 }
  0xda   : > { %p3922_p12 = pnand %p3921_p0, %p3915_p1 }
  0xdc   : > { %3925 = shalt.err (!%p3922_p12)
}
  0xdd   : > { %s3926_s7 = scalar_lea.vmem %s662_s4, 16  ;;  %s4097_s10 = smov [#allocation13]  }
  0xde   : > { %p3927_p5 = scmp.ne.s32.totalorder %s662_s4, %s3926_s7  ;;  %s3931_s18 = sshll.u32 %s4097_s10, 4  ;;  %s3932_s18 = int_to_ptr.vmem [resolvable:$false] %s3931_s18 }
  0xdf   : > { %s3933_s5 = scalar_lea.vmem %s3932_s18, 32  ;;  %p3934_p6 = scmp.lt.s32.totalorder %s662_s4, %s3932_s18 }
  0xe0   : > { %p3929_p13 = pnand %p3927_p5, %p4315_p10  ;;  %p3935_p3 = scmp.lt.s32.totalorder %s3933_s5, %s3926_s7 }
  0xe2   : > { %p3930_p2 = pneg %p3929_p13  ;;  %p3936_p4 = por %p3935_p3, %p3934_p6 }
  0xe4   : > { %p3937_p8 = pnand %p3936_p4, %p3930_p2 }
  0xe6   : > { %3940 = shalt.err (!%p3937_p8)
}
  0xe7   : > { %p5044_p11 = scmp.ne.s32.totalorder %s5031_s28, 0  ;;  %s671_s19 = scalar_lea.vmem [#allocation14], %s4266_s29 }
  0xe8   : > { %s678_s9 = sshll.u32 %s671_s19, 4  ;;  %s4098_s30 = smov [#allocation6]   ;;  %s4472_s9 = int_to_ptr.vmem [resolvable:$true] %s678_s9 }
  0xe9   : > { %3523 = dma.hbm_to_vmem [thread:$0]  (!%p5044_p11), %s4444_s6, 16, %s662_s4, %s4309_s1  }
  0xea   : > { %s518_s23 = sshll.u32 %s4098_s30, 4  ;;  %s3941_s2 = scalar_lea.hbm %s4451_s8, 16  ;;  %s519_s23 = int_to_ptr.vmem [resolvable:$true] %s518_s23 }
  0xeb   : > { %p3942_p4 = scmp.ne.s32.totalorder %s4451_s8, %s3941_s2  ;;  %s3946_s7 = scalar_lea.hbm %s4982_s14, 32 }
  0xec   : > { %p3947_p9 = scmp.lt.u32.totalorder %s4451_s8, %s4982_s14  ;;  %p3948_p0 = scmp.lt.u32.totalorder %s3946_s7, %s3941_s2 }
  0xed   : > { %p3944_p1 = pnand %p3942_p4, %p4315_p10  ;;  %p3950_p5 = scmp.lt.u32.totalorder %s3941_s2, %s4451_s8 }
  0xee   : > { %p3949_p12 = por %p3948_p0, %p3947_p9 }
  0xef   : > { %p3945_p7 = pneg %p3944_p1 }
  0xf0   : > { %p3951_p13 = por %p3950_p5, %p3949_p12 }
  0xf2   : > { %p3952_p2 = pnand %p3951_p13, %p3945_p7 }
  0xf4   : > { %3955 = shalt.err (!%p3952_p2)
}
  0xf5   : > { %s3956_s6 = scalar_lea.vmem %s4472_s9, 16  ;;  %s4099_s4 = smov [#allocation14]  }
  0xf6   : > { %p3957_p6 = scmp.ne.s32.totalorder %s4472_s9, %s3956_s6  ;;  %s3961_s5 = sshll.u32 %s4099_s4, 4  ;;  %s3962_s5 = int_to_ptr.vmem [resolvable:$false] %s3961_s5 }
  0xf7   : > { %s3963_s19 = scalar_lea.vmem %s3962_s5, 32  ;;  %p3964_p4 = scmp.lt.s32.totalorder %s4472_s9, %s3962_s5 }
  0xf8   : > { %p3959_p3 = pnand %p3957_p6, %p4315_p10  ;;  %p3965_p1 = scmp.lt.s32.totalorder %s3963_s19, %s3956_s6 }
  0xfa   : > { %p3960_p8 = pneg %p3959_p3  ;;  %p3966_p9 = por %p3965_p1, %p3964_p4 }
  0xfc   : > { %p3967_p0 = pnand %p3966_p9, %p3960_p8 }
  0xfe   : > { %3970 = shalt.err (!%p3967_p0)
}
  0xff   : > { %3526 = dma.hbm_to_vmem [thread:$0]  (!%p5044_p11), %s4451_s8, 16, %s4472_s9, %s4309_s1  }
 0x100   : > { %s5045_s3 = sld [smem:[#allocation27_spill]]  ;;  %p5046_p12 = scmp.ne.s32.totalorder %s5030_s0, 0 }
 0x102   : > { %p5047_p5 = pneg %p5046_p12 }
 0x106   : > { %s3971_s21 = scalar_lea.hbm %s5045_s3, 16 }
 0x107   : > { %p3972_p7 = scmp.ne.s32.totalorder %s5045_s3, %s3971_s21  ;;  %p3978_p6 = scmp.lt.u32.totalorder %s3971_s21, %s5045_s3 }
 0x109   : > { %p3974_p13 = pnand %p3972_p7, %p5047_p5 }
 0x10b   : > { %p3975_p2 = pneg %p3974_p13 }
 0x10d   : > { %p3980_p3 = pnand %p3978_p6, %p3975_p2 }
 0x10f   : > { %3983 = shalt.err (!%p3980_p3)
}
 0x110   : > { %s3984_s8 = scalar_lea.vmem %s519_s23, 16  ;;  %p5048_p4 = pmov %p5047_p5 }
 0x111   : > { %p3985_p8 = scmp.ne.s32.totalorder %s519_s23, %s3984_s8  ;;  %s3991_s9 = scalar_lea.vmem %s519_s23, 32 }
 0x112   : > { %p3992_p0 = scmp.lt.s32.totalorder %s519_s23, %s519_s23  ;;  %p3993_p11 = scmp.lt.s32.totalorder %s3991_s9, %s3984_s8 }
 0x113   : > { %p3987_p1 = pnand %p3985_p8, %p5048_p4 }
 0x114   : > { %p3994_p10 = por %p3993_p11, %p3992_p0 }
 0x115   : > { %p3988_p9 = pneg %p3987_p1 }
 0x117   : > { %p3995_p5 = pnand %p3994_p10, %p3988_p9 }
 0x119   : > { %3998 = shalt.err (!%p3995_p5)
}
 0x11a   : > { %3504 = dma.hbm_to_vmem [thread:$0]  (!%p5046_p12), %s5045_s3, 16, %s519_s23, [#allocation7]  }
 0x11b   : > { %s4520_s30 = scalar_lea.hbm %s4983_s15, %s4298_s16  ;;  %s688_s2 = scalar_lea.vmem [#allocation15], %s4266_s29 }
 0x11c   : > { %s695_s21 = sshll.u32 %s688_s2, 4  ;;  %s3999_s0 = scalar_lea.hbm %s4520_s30, 16  ;;  %s696_s21 = int_to_ptr.vmem [resolvable:$true] %s695_s21 }
 0x11d   : > { %p4000_p10 = scmp.ne.s32.totalorder %s4520_s30, %s3999_s0  ;;  %p5049_p11 = scmp.ne.s32.totalorder %s5035_s27, 0 }
 0x11e   : > { %s4004_s23 = scalar_lea.hbm %s4983_s15, 32  ;;  %p4005_p12 = scmp.lt.u32.totalorder %s4520_s30, %s4983_s15 }
 0x11f   : > { %p4002_p7 = pnand %p4000_p10, %p5049_p11  ;;  %p4006_p2 = scmp.lt.u32.totalorder %s4004_s23, %s3999_s0 }
 0x120   : > { %p4008_p3 = scmp.lt.u32.totalorder %s3999_s0, %s4520_s30 }
 0x121   : > { %p4003_p13 = pneg %p4002_p7  ;;  %p4007_p6 = por %p4006_p2, %p4005_p12 }
 0x123   : > { %p4009_p8 = por %p4008_p3, %p4007_p6 }
 0x125   : > { %p4010_p4 = pnand %p4009_p8, %p4003_p13 }
 0x127   : > { %4013 = shalt.err (!%p4010_p4)
}
 0x128   : > { %s4014_s29 = scalar_lea.vmem %s696_s21, 16  ;;  %s4100_s16 = smov [#allocation15]  }
 0x129   : > { %p4015_p1 = scmp.ne.s32.totalorder %s696_s21, %s4014_s29  ;;  %s4019_s8 = sshll.u32 %s4100_s16, 4  ;;  %s4020_s8 = int_to_ptr.vmem [resolvable:$false] %s4019_s8 }
 0x12a   : > { %s4021_s9 = scalar_lea.vmem %s4020_s8, 32  ;;  %p4022_p5 = scmp.lt.s32.totalorder %s696_s21, %s4020_s8 }
 0x12b   : > { %p4017_p9 = pnand %p4015_p1, %p5049_p11  ;;  %p4023_p10 = scmp.lt.s32.totalorder %s4021_s9, %s4014_s29 }
 0x12d   : > { %p4018_p0 = pneg %p4017_p9  ;;  %p4024_p7 = por %p4023_p10, %p4022_p5 }
 0x12f   : > { %p4025_p2 = pnand %p4024_p7, %p4018_p0 }
 0x131   : > { %4028 = shalt.err (!%p4025_p2)
}
 0x132   : > { %p5050_p12 = scmp.ne.s32.totalorder %s5031_s28, 0  ;;  %p5051_p13 = scmp.ne.s32.totalorder %s5029_s20, 0 }
 0x133   : > { %p5052_p11 = scmp.ne.s32.totalorder (!%p5051_p13), %s5025_s17, 0 }
 0x134   : > { %3529 = dma.hbm_to_vmem [thread:$0]  (!%p5050_p12), %s4520_s30, 16, %s696_s21, %s4309_s1  }
 0x135   : > { %704 = sbr.rel (%p5051_p13) target bundleno = 4800 (0x12c0), region = 84 }
 0x13c   : > { %4054 = dma.done.wait (%p5052_p11), [#allocation5], 16  }
 0x13d   : > { %4056 = vsyncadd (%p5052_p11), [#allocation5], 4294967280 }
 0x13e   : > { %4058 = dma.done.wait (%p5052_p11), [#allocation7], 16  }
 0x13f   : > { %4060 = vsyncadd (%p5052_p11), [#allocation7], 4294967280  ;;  %s5053_s28 = sadd.s32 4294967295, %s4087_s26   ;;  %s5054_s27 = sld [smem:[#allocation22_spill]] }
 0x140   : > { %s714_s1 = sand.u32 1, %s5053_s28   ;;  %s4554_s6 = sand.u32 1, %s4071_s22  }
 0x141   : > { %s715_s20 = scalar_lea.sflag [#allocation5], %s714_s1 }
 0x145   : > { %p5055_p6 = scmp.ne.s32.totalorder %s5054_s27, 0 }
 0x147   : > { %4062 = dma.done.wait (%p5055_p6), %s715_s20, 2176  }
 0x148   : > { %4064 = vsyncadd (%p5055_p6), %s715_s20, 4294965120  ;;  %s5056_s5 = sld [smem:[#allocation20_spill]]  ;;  %s3152_s17 = sshll.u32 %s4554_s6, 1 }
 0x149   : > { %s3153_s19 = sshll.u32 %s4554_s6, 7  ;;  %s5057_s23 = sld [smem:[#allocation30_spill]] }
 0x14a   : > { %s5058_s16 = sld [smem:[#allocation28_spill]]  ;;  %s5059_s1 = sld [smem:[#allocation29_spill]] }
 0x14b   : > { %s5060_s11 = sld [smem:[#allocation34_spill]]  ;;  %s725_s13 = scalar_lea.vmem [#allocation9], %s4554_s6 }
 0x14c   : > { %s733_s24 = scalar_lea.vmem [#allocation10], %s4554_s6  ;;  %s4589_s7 = scalar_lea.vmem [#allocation12], %s3153_s19 }
 0x14d   : > { %s775_s18 = scalar_lea.vmem [#allocation15], %s4554_s6 }
 0x14e   : > { %p891_p3 = scmp.lt.s32.totalorder %s5056_s5, 1  ;;  %p3159_p8 = scmp.ne.s32.totalorder %s5056_s5, 0 }
 0x14f   : > { %s5061_s29 = sld [smem:[#allocation24_spill]] (!%p3159_p8)  ;;  %v3160_v17 = vld [vmem:[#allocation4] ss:$0 sm:$0xff] (!%p3159_p8)  ;;  %v3161_v19 = vld [vmem:[#allocation6] ss:$0 sm:$0xff] (!%p3159_p8) }
 0x150   : > { %s892_s30 = scalar_select %p891_p3, %s5056_s5, 1 }
 0x151   : > { %918 = sbr.rel (%p3159_p8) target bundleno = 658 (0x292), region = 128 }
 0x152   : > { %s3472_s2 = smul.u32 192, %s892_s30  ;;  %s3259_s21 = sshll.u32 %s892_s30, 6 }
 0x153   : > { %s3473_s0 = smul.u32 3, %s892_s30  ;;  %s4568_s10 = scalar_lea.vmem %s5057_s23, %s3259_s21 }
 0x154   : > { %s4573_s8 = scalar_lea.vmem %s5058_s16, %s3472_s2  ;;  %s3260_s9 = sshll.u32 %s892_s30, 7 }
 0x155   : > { %s4578_s20 = scalar_lea.vmem %s5059_s1, %s3473_s0  ;;  %s4583_s12 = scalar_lea.vmem %s5060_s11, %s3260_s9  ;;  %v919_v0 = vld [vmem:[%s5061_s29] sm:$0xff] (!%p3159_p8)  ;;  %v920_v1 = vld [vmem:[%s5061_s29 + $0x8] sm:$0xff] (!%p3159_p8) }
 0x156   : > { %s4587_s21 = scalar_lea.vmem [#allocation11], %s3152_s17  ;;  %s759_s23 = scalar_lea.vmem [#allocation13], %s4554_s6  ;;  %923 = vadd.xlane.f32.xlu0 (!%p3159_p8), %v919_v0 }
 0x157   : > { %s767_s2 = scalar_lea.vmem [#allocation14], %s4554_s6 }
 0x15a   : > { %925 = vadd.xlane.f32.xlu0 %v920_v1 }
 0x1e3   : > { %v924_v2 = vpop.xlane.xlu0 %923 }
 0x1e4   : > { %v928_v3 = vmul.f32 0.0078125, %v924_v2 }
 0x1e6   : > { %v930_v4 = vsub.f32 %v919_v0, %v928_v3 }
 0x1e7   : > { %v926_v5 = vpop.xlane.xlu0 %925 }
 0x1e8   : > { %v929_v6 = vmul.f32 0.0078125, %v926_v5  ;;  %v932_v7 = vmul.f32 %v930_v4, %v930_v4 }
 0x1ea   : > { %v931_v8 = vsub.f32 %v920_v1, %v929_v6  ;;  %934 = vadd.xlane.f32.xlu1 %v932_v7 }
 0x1ec   : > { %v933_v9 = vmul.f32 %v931_v8, %v931_v8 }
 0x1ee   : > { %936 = vadd.xlane.f32.xlu1 %v933_v9 }
 0x277   : > { %v935_v10 = vpop.xlane.xlu1 %934 }
 0x278   : > { %v938_v11 = vmul.f32 0.0078125, %v935_v10 }
 0x27a   : > { %v940_v12 = vadd.f32 1e-12, %v938_v11 }
 0x27b   : > { %v937_v13 = vpop.xlane.xlu1 %936 }
 0x27c   : > { %3593 = vrsqrt.f32 %v940_v12  ;;  %v939_v14 = vmul.f32 0.0078125, %v937_v13 }
 0x27e   : > { %v941_v15 = vadd.f32 1e-12, %v939_v14 }
 0x280   : > { %3595 = vrsqrt.f32 %v941_v15 }
 0x286   : > { %v3594_v16 = vpop.eup %3593 }
 0x287   : > { %v944_v18 = vmul.f32 %v3594_v16, %v930_v4 }
 0x289   : > { %v952_v20 = vmul.f32 %v3160_v17, %v944_v18 }
 0x28a   : > { %v3596_v21 = vpop.eup %3595 }
 0x28b   : > { %v960_v22 = vadd.f32 %v3161_v19, %v952_v20  ;;  %v945_v23 = vmul.f32 %v3596_v21, %v931_v8 }
 0x28d   : > { %962 = vst [vmem:[#allocation2] sm:$0xff] %v960_v22  ;;  %v953_v24 = vmul.f32 %v3160_v17, %v945_v23 }
 0x28f   : > { %v961_v25 = vadd.f32 %v3161_v19, %v953_v24 }
 0x291   : > { %963 = vst [vmem:[#allocation2 + $0x8] sm:$0xff] %v961_v25 }
 0x292 PF: > { %v3597_v26 = vld [vmem:[%s4573_s8 + $0x4] ss:$12 sps:$4 sm:$0xff]   ;;  %v3599_v27 = vld [vmem:[%s4573_s8] ss:$12 sps:$4 sm:$0xff]   ;;  %v4101_v28 = vmov 0   ;;  %v4102_v29 = vmov 0.0   ;;  %v1004_v55 = vlaneseq }
 0x293   : > { %1185 = vmatprep.mubr.bf16.mxu0 %v4101_v28  ;;  %3336 = vmatprep.subr.bf16.mxu1 %v4102_v29  ;;  %v3600_v30 = vld [vmem:[%s4573_s8 + $0x1c] ss:$12 sps:$4 sm:$0xff]   ;;  %v3602_v31 = vld [vmem:[%s4573_s8 + $0x18] ss:$12 sps:$4 sm:$0xff]   ;;  %v3603_v32 = vld [vmem:[%s4573_s8 + $0x34] ss:$12 sps:$4 sm:$0xff]  }
 0x294   : > { %1153 = vmatprep.subr.bf16.mxu0 %v3597_v26  ;;  %v3605_v33 = vld [vmem:[%s4573_s8 + $0x30] ss:$12 sps:$4 sm:$0xff]   ;;  %v3606_v34 = vld [vmem:[%s4573_s8 + $0x4c] ss:$12 sps:$4 sm:$0xff]   ;;  %v3608_v35 = vld [vmem:[%s4573_s8 + $0x48] ss:$12 sps:$4 sm:$0xff]  }
 0x295   : > { %1154 = vmatpush1.bf16.msra.mxu0 %v3599_v27  ;;  %v3609_v36 = vld [vmem:[%s4573_s8 + $0x64] ss:$12 sps:$4 sm:$0xff]   ;;  %v3621_v37 = vld [vmem:[%s4573_s8 + $0x8] ss:$12 sps:$4 sm:$0xff]   ;;  %v3622_v38 = vld [vmem:[%s4573_s8 + $0x20] ss:$12 sps:$4 sm:$0xff]  }
 0x296   : > { %1155 = vmatprep.subr.bf16.mxu0 %v3600_v30  ;;  %3337 = vmatpush3.bf16.msra.mxu1 %v3621_v37  ;;  %v3611_v39 = vld [vmem:[%s4573_s8 + $0x60] ss:$12 sps:$4 sm:$0xff]   ;;  %v3612_v40 = vld [vmem:[%s4573_s8 + $0x7c] ss:$12 sps:$4 sm:$0xff]   ;;  %v3623_v41 = vld [vmem:[%s4573_s8 + $0x38] ss:$12 sps:$4 sm:$0xff]  }
 0x297   : > { %3338 = vmatprep.subr.bf16.mxu1 %v4102_v29  ;;  %v3614_v42 = vld [vmem:[%s4573_s8 + $0x78] ss:$12 sps:$4 sm:$0xff]   ;;  %v3615_v43 = vld [vmem:[%s4573_s8 + $0x94] ss:$12 sps:$4 sm:$0xff]   ;;  %v3624_v44 = vld [vmem:[%s4573_s8 + $0x50] ss:$12 sps:$4 sm:$0xff]  }
 0x298   : > { %v3617_v45 = vld [vmem:[%s4573_s8 + $0x90] ss:$12 sps:$4 sm:$0xff]   ;;  %v3618_v46 = vld [vmem:[%s4573_s8 + $0xac] ss:$12 sps:$4 sm:$0xff]   ;;  %v3625_v47 = vld [vmem:[%s4573_s8 + $0x68] ss:$12 sps:$4 sm:$0xff]  }
 0x299   : > { %1156 = vmatpush1.bf16.msra.mxu0 %v3602_v31  ;;  %v3620_v48 = vld [vmem:[%s4573_s8 + $0xa8] ss:$12 sps:$4 sm:$0xff]   ;;  %v4627_v49 = vld [vmem:[#allocation2] sm:$0xff]  ;;  %v3628_v54 = vld [vmem:[%s4573_s8 + $0xb0] ss:$12 sps:$4 sm:$0xff]   ;;  %vm4103_vm0 = vmmov 0  }
 0x29a   : > { %1157 = vmatprep.subr.bf16.mxu0 %v3603_v32  ;;  %3339 = vmatpush3.bf16.msra.mxu1 %v3622_v38  ;;  %v4629_v50 = vld [vmem:[#allocation2 + $0x8] sm:$0xff]  ;;  %v3627_v53 = vld [vmem:[%s4573_s8 + $0x98] ss:$12 sps:$4 sm:$0xff]   ;;  %v4648_v56 = vshrl.u32 %v1004_v55, 7  ;;  %v1002_v58 = vld [vmem:[%s4578_s20] sm:$0x7] }
 0x29b   : > { %3340 = vmatprep.subr.bf16.mxu1 %v4102_v29  ;;  %v3626_v51 = vld [vmem:[%s4573_s8 + $0x80] ss:$12 sps:$4 sm:$0xff]   ;;  %v3261_v52 = vpack.c.bf16 %v4629_v50, %v4627_v49  ;;  %3352 = vmatprep.mubr.msk.bf16.mxu1 %vm4103_vm0, %v4102_v29  ;;  %vm1243_vm1 = vcmask 261120   ;;  %vm1380_vm2 = vcmask 1043456   ;;  %s5062_s17 = sld [smem:[#allocation25_spill]]  ;;  %vm1352_vm3 = vcmask 64512  }
 0x29c   : > { %v1010_v57 = vsub.s32 1, %v4648_v56  ;;  %v1006_v60 = vsub.s32 0, %v4648_v56  ;;  %v1014_v12 = vsub.s32 2, %v4648_v56  ;;  %s4104_s8 = smov 96   ;;  %s4105_s9 = smov 64   ;;  %vm1710_vm4 = vcmask 523520  }
 0x29d   : > { %1158 = vmatpush1.bf16.msra.mxu0 %v3605_v33  ;;  %s4106_s28 = smov 32   ;;  %vm1945_vm5 = vcmask 785920   ;;  %vm2180_vm6 = vcmask 1048320  }
 0x29e   : > { %1159 = vmatprep.subr.bf16.mxu0 %v3606_v34  ;;  %3341 = vmatpush3.bf16.msra.mxu1 %v3623_v41  ;;  %v1011_v59 = vrot.slane %v1002_v58, %v1010_v57  ;;  %v1007_v2 = vrot.slane %v1002_v58, %v1006_v60  ;;  %v1015_v13 = vrot.slane %v1002_v58, %v1014_v12 }
 0x29f   : > { %3342 = vmatprep.subr.bf16.mxu1 %v4102_v29 }
 0x2a1   : > { %1160 = vmatpush1.bf16.msra.mxu0 %v3608_v35  ;;  %v4688_v23 = vld [vmem:[%s5062_s17] ss:$0 sm:$0xff]  ;;  %v4695_v33 = vld [vmem:[%s5062_s17 + $0x1] ss:$0 sm:$0xff] }
 0x2a2   : > { %1161 = vmatprep.subr.bf16.mxu0 %v3609_v36  ;;  %3343 = vmatpush3.bf16.msra.mxu1 %v3624_v44 }
 0x2a3   : > { %3344 = vmatprep.subr.bf16.mxu1 %v4102_v29 }
 0x2a5   : > { %1162 = vmatpush1.bf16.msra.mxu0 %v3611_v39 }
 0x2a6   : > { %1163 = vmatprep.subr.bf16.mxu0 %v3612_v40  ;;  %3345 = vmatpush3.bf16.msra.mxu1 %v3625_v47 }
 0x2a7   : > { %3346 = vmatprep.subr.bf16.mxu1 %v4102_v29 }
 0x2a9   : > { %1164 = vmatpush1.bf16.msra.mxu0 %v3614_v42 }
 0x2aa   : > { %1165 = vmatprep.subr.bf16.mxu0 %v3615_v43  ;;  %3347 = vmatpush3.bf16.msra.mxu1 %v3626_v51 }
 0x2ab   : > { %3348 = vmatprep.subr.bf16.mxu1 %v4102_v29 }
 0x2ad   : > { %1166 = vmatpush1.bf16.msra.mxu0 %v3617_v45 }
 0x2ae   : > { %1167 = vmatprep.subr.bf16.mxu0 %v3618_v46  ;;  %3349 = vmatpush3.bf16.msra.mxu1 %v3627_v53 }
 0x2af   : > { %3350 = vmatprep.subr.bf16.mxu1 %v4102_v29 }
 0x2b1   : > { %1168 = vmatpush1.bf16.msra.mxu0 %v3620_v48 }
 0x2b2   : > { %3380 = vmatprep.subr.bf16.mxu0 %v4102_v29  ;;  %3351 = vmatpush3.bf16.msra.mxu1 %v3628_v54 }
 0x2b3   : > { %3356 = vmatprep.subr.bf16.mxu1 %v4102_v29 }
 0x2b4   : > { %1186 = vmatmul.mubr.bf16.vlgmr.msra.gmra.mrb[0].mxu0 %v3261_v52 }
 0x2b5   : > { %3382 = vmatprep.mubr.msk.bf16.mxu0 %vm4103_vm0, %v4102_v29  ;;  %3353 = vmatmul.mubr.bf16.vlgmr.msra.gmra.mrb[0].mxu1 %v3261_v52 }
 0x2b6   : > { %3358 = vmatprep.mubr.msk.bf16.mxu1 %vm4103_vm0, %v4102_v29 }
 0x387   : > { %v1187_v61 = vpop.f32.mrb[0].mxu0 }
 0x388   : > { %v1189_v62 = vpop.f32.mrb[1].mxu0  ;;  %v1188_v6 = vadd.f32 %v1187_v61, %v1007_v2  ;;  %v1230_v14 = vpop.f32.mrb[0].mxu1 }
 0x389   : > { %v1190_v63 = vadd.f32 %v1189_v62, %v1011_v59  ;;  %v1191_v0 = vpop.f32.mrb[2].mxu0  ;;  %v1231_v15 = vadd.f32 %v1230_v14, %v1015_v13  ;;  %v3354_v16 = vpop.f32.mrb[1].mxu1 }
 0x38a   : > { %v1193_v1 = vpop.f32.mrb[3].mxu0  ;;  %v4664_v8 = vpack.c.bf16 %v1188_v6, %v1188_v6  ;;  %v1192_v10 = vadd.f32 %v1191_v0, %v1007_v2  ;;  %v1233_v17 = vpop.f32.mrb[2].mxu1 }
 0x38b   : > { %v4657_v3 = vpack.c.bf16 %v1190_v63, %v1190_v63  ;;  %v1194_v4 = vadd.f32 %v1193_v1, %v1011_v59  ;;  %v4680_v18 = vpack.c.bf16 %v1231_v15, %v1231_v15  ;;  %v1234_v19 = vadd.f32 %v1233_v17, %v1015_v13  ;;  %v3355_v20 = vpop.f32.mrb[3].mxu1 }
 0x38c   : > { %v4673_v11 = vpack.c.bf16 %v1192_v10, %v1192_v10 }
 0x38d   : > { %v1248_v5 = vsel %vm1243_vm1, %v4657_v3, 0  ;;  %v4662_v7 = vpack.c.bf16 %v1194_v4, %v1194_v4  ;;  %v1382_v21 = vsel %vm1380_vm2, %v4680_v18, 0  ;;  %v4711_v58 = vpack.c.bf16 %v1234_v19, %v1234_v19 }
 0x38e   : > { %3357 = vmatpush3.bf16.xpose.msra.mxu1 %v1248_v5 }
 0x38f   : > { %3362 = vmatprep.subr.bf16.mxu1 %v4102_v29  ;;  %v1294_v9 = vsel %vm1243_vm1, %v4662_v7, 0  ;;  %v1428_v62 = vsel %vm1380_vm2, %v4711_v58, 0 }
 0x395   : > { %3359 = vmatmul.mubr.msk.bf16.vlgmr.msra.gmra.mrb[4].mxu1 %vm1243_vm1, %v4664_v8 }
 0x396   : > { %3363 = vmatpush3.bf16.xpose.msra.mxu1 %v1294_v9  ;;  %3364 = vmatprep.mubr.msk.bf16.mxu1 %vm4103_vm0, %v4102_v29 }
 0x397   : > { %3368 = vmatprep.subr.bf16.mxu1 %v4102_v29 }
 0x39d   : > { %3365 = vmatmul.mubr.msk.bf16.vlgmr.msra.gmra.mrb[8].mxu1 %vm1243_vm1, %v4673_v11 }
 0x39e   : > { %3370 = vmatprep.mubr.msk.bf16.mxu1 %vm4103_vm0, %v4102_v29  ;;  %3369 = vmatpush3.bf16.msra.mxu1 %v1382_v21 }
 0x39f   : > { %3374 = vmatprep.subr.bf16.mxu1 %v4102_v29 }
 0x468   : > { %v1284_v22 = vpop.f32.mrb[4].mxu1 }
 0x469   : > { %v1336_v24 = vmul.f32 0.17677669, %v1284_v22  ;;  %v3360_v25 = vpop.f32.mrb[5].mxu1 }
 0x46a   : > { %v1287_v26 = vpop.f32.mrb[6].mxu1 }
 0x46b   : > { %v3361_v27 = vpop.f32.mrb[7].mxu1  ;;  %v1350_v30 = vadd.f32 %v4688_v23, %v1336_v24 }
 0x46d   : > { %v1353_v31 = vsel %vm1352_vm3, %v1350_v30, -inf }
 0x46e   : > { %1354 = vmax.xlane.f32.xlu0 %v1353_v31 }
 0x470   : > { %v1330_v32 = vpop.f32.mrb[8].mxu1 }
 0x471   : > { %v1337_v34 = vmul.f32 0.17677669, %v1330_v32  ;;  %v3366_v35 = vpop.f32.mrb[9].mxu1 }
 0x472   : > { %v1333_v36 = vpop.f32.mrb[10].mxu1 }
 0x473   : > { %v3367_v37 = vpop.f32.mrb[11].mxu1  ;;  %v1351_v38 = vadd.f32 %v4695_v33, %v1337_v34 }
 0x475   : > { %v1356_v39 = vsel %vm1352_vm3, %v1351_v38, -inf }
 0x476   : > { %1357 = vmax.xlane.f32.xlu0 %v1356_v39 }
 0x48c   : > { %1476 = vrot.lane.b32.xlu0 %v4657_v3, %s4104_s8 }
 0x4fb   : > { %v1355_v40 = vpop.xlane.xlu0 %1354 }
 0x4fc   : > { %v1359_v41 = vsub.f32 %v1350_v30, %v1355_v40 }
 0x4fe   : > { %v1361_v42 = vmul.f32 1.442695, %v1359_v41 }
 0x500   : > { %3677 = vpow2.f32 %v1361_v42 }
 0x503   : > { %v1358_v43 = vpop.xlane.xlu0 %1357 }
 0x504   : > { %v1360_v48 = vsub.f32 %v1351_v38, %v1358_v43 }
 0x506   : > { %v1363_v51 = vmul.f32 1.442695, %v1360_v48 }
 0x507   : > { %v1477_v44 = vpop.permute.xlu0 %1476 }
 0x508   : > { %v1482_v45 = vsel %vm1243_vm1, %v1477_v44, 0  ;;  %3679 = vpow2.f32 %v1363_v51 }
 0x509   : > { %3381 = vmatpush3.bf16.xpose.msra.mxu0 %v1482_v45 }
 0x50a   : > { %v3678_v46 = vpop.eup %3677  ;;  %3392 = vmatprep.subr.bf16.mxu0 %v4102_v29 }
 0x50b   : > { %v1365_v47 = vsel %vm1352_vm3, %v3678_v46, 0.0 }
 0x50c   : > { %1366 = vadd.xlane.f32.xlu1 %v1365_v47 }
 0x512   : > { %v3680_v52 = vpop.eup %3679 }
 0x513   : > { %v1368_v53 = vsel %vm1352_vm3, %v3680_v52, 0.0 }
 0x51d   : > { %1528 = vrot.lane.b32.xlu1 %v4662_v7, %s4104_s8 }
 0x541   : > { %1369 = vadd.xlane.f32.xlu1 %v1368_v53 }
 0x552   : > { %1473 = vrot.lane.b32.xlu1 %v4664_v8, %s4104_s8 }
 0x556   : > { %1525 = vrot.lane.b32.xlu1 %v4673_v11, %s4104_s8 }
 0x599   : > { %v1367_v54 = vpop.xlane.xlu1 %1366 }
 0x59a   : > { %3681 = vrcp.f32 %v1367_v54 }
 0x59d   : > { %v1529_v63 = vpop.permute.xlu1 %1528 }
 0x59e   : > { %v1534_v6 = vsel %vm1243_vm1, %v1529_v63, 0 }
 0x5a4   : > { %v3682_v55 = vpop.eup %3681 }
 0x5a5   : > { %v1373_v59 = vmul.f32 %v3682_v55, %v3678_v46 }
 0x5a7   : > { %v1375_v61 = vpack.c.bf16 %v1373_v59, %v1373_v59 }
 0x5a9   : > { %3371 = vmatmul.mubr.msk.bf16.vlgmr.msra.gmra.mrb[12].mxu1 %vm1352_vm3, %v1375_v61 }
 0x5aa   : > { %3375 = vmatpush3.bf16.msra.mxu1 %v1428_v62  ;;  %3376 = vmatprep.mubr.msk.bf16.mxu1 %vm4103_vm0, %v4102_v29 }
 0x5ab   : > { %3386 = vmatprep.subr.bf16.mxu1 %v4102_v29 }
 0x5ce   : > { %v1370_v0 = vpop.xlane.xlu1 %1369 }
 0x5cf   : > { %3683 = vrcp.f32 %v1370_v0 }
 0x5d2   : > { %v1474_v1 = vpop.permute.xlu1 %1473 }
 0x5d3   : > { %3383 = vmatmul.mubr.msk.bf16.vlgmr.msra.gmra.mrb[4].mxu0 %vm1243_vm1, %v1474_v1 }
 0x5d4   : > { %3394 = vmatprep.mubr.msk.bf16.mxu0 %vm4103_vm0, %v4102_v29 }
 0x5d6   : > { %v1526_v9 = vpop.permute.xlu1 %1525 }
 0x5d9   : > { %v3684_v2 = vpop.eup %3683 }
 0x5da   : > { %v1374_v4 = vmul.f32 %v3684_v2, %v3680_v52 }
 0x5dc   : > { %v1376_v5 = vpack.c.bf16 %v1374_v4, %v1374_v4 }
 0x5de   : > { %3377 = vmatmul.mubr.msk.bf16.vlgmr.msra.gmra.mrb[16].mxu1 %vm1352_vm3, %v1376_v5 }
 0x5df   : > { %3387 = vmatpush3.bf16.xpose.msra.mxu1 %v1534_v6  ;;  %3388 = vmatprep.mubr.msk.bf16.mxu1 %vm4103_vm0, %v4102_v29 }
 0x5e0   : > { %3398 = vmatprep.subr.bf16.mxu1 %v4102_v29 }
 0x5e6   : > { %3389 = vmatmul.mubr.msk.bf16.vlgmr.msra.gmra.mrb[20].mxu1 %vm1243_vm1, %v1526_v9 }
 0x5e7   : > { %3400 = vmatprep.mubr.msk.bf16.mxu1 %vm4103_vm0, %v4102_v29 }
 0x67c   : > { %v1418_v10 = vpop.f32.mrb[12].mxu1 }
 0x67d   : > { %1470 = vst.msk [vmem:[#allocation3] sm:$0xff] %vm1243_vm1, %v1418_v10  ;;  %v3372_v12 = vpop.f32.mrb[13].mxu1 }
 0x67e   : > { %v1421_v13 = vpop.f32.mrb[14].mxu1 }
 0x67f   : > { %v3373_v14 = vpop.f32.mrb[15].mxu1 }
 0x6a6   : > { %v1518_v15 = vpop.f32.mrb[4].mxu0 }
 0x6a7   : > { %v1576_v16 = vmul.f32 0.17677669, %v1518_v15  ;;  %v3384_v17 = vpop.f32.mrb[5].mxu0 }
 0x6a8   : > { %v1521_v19 = vpop.f32.mrb[6].mxu0 }
 0x6a9   : > { %v3385_v20 = vpop.f32.mrb[7].mxu0  ;;  %v1578_v21 = vadd.f32 %v4688_v23, %v1576_v16 }
 0x6ab   : > { %v1580_v22 = vsel %vm1352_vm3, %v1578_v21, -inf }
 0x6ac   : > { %1581 = vmax.xlane.f32.xlu0 %v1580_v22 }
 0x6b1   : > { %v1464_v24 = vpop.f32.mrb[16].mxu1 }
 0x6b2   : > { %1471 = vst.msk [vmem:[#allocation3 + $0x8] sm:$0xff] %vm1243_vm1, %v1464_v24  ;;  %v3378_v25 = vpop.f32.mrb[17].mxu1 }
 0x6b3   : > { %v1467_v26 = vpop.f32.mrb[18].mxu1 }
 0x6b4   : > { %v3379_v27 = vpop.f32.mrb[19].mxu1 }
 0x6b9   : > { %v1570_v30 = vpop.f32.mrb[20].mxu1 }
 0x6ba   : > { %v1577_v31 = vmul.f32 0.17677669, %v1570_v30  ;;  %v3390_v32 = vpop.f32.mrb[21].mxu1 }
 0x6bb   : > { %v1573_v34 = vpop.f32.mrb[22].mxu1 }
 0x6bc   : > { %v3391_v35 = vpop.f32.mrb[23].mxu1  ;;  %v1579_v36 = vadd.f32 %v4695_v33, %v1577_v31 }
 0x6be   : > { %v1583_v37 = vsel %vm1352_vm3, %v1579_v36, -inf }
 0x6bf   : > { %1584 = vmax.xlane.f32.xlu1 %v1583_v37 }
 0x6d0   : > { %1654 = vrot.lane.b32.xlu1 %v4711_v58, %s4104_s8 }
 0x6d4   : > { %1715 = vrot.lane.b32.xlu1 %v4657_v3, %s4105_s9 }
 0x6d8   : > { %1765 = vrot.lane.b32.xlu1 %v4662_v7, %s4105_s9 }
 0x6dc   : > { %1763 = vrot.lane.b32.xlu1 %v4673_v11, %s4105_s9 }
 0x739   : > { %v1582_v38 = vpop.xlane.xlu0 %1581 }
 0x73a   : > { %v1586_v39 = vsub.f32 %v1578_v21, %v1582_v38 }
 0x73c   : > { %v1588_v40 = vmul.f32 1.442695, %v1586_v39 }
 0x73e   : > { %3685 = vpow2.f32 %v1588_v40 }
 0x748   : > { %v3686_v41 = vpop.eup %3685 }
 0x749   : > { %v1592_v42 = vsel %vm1352_vm3, %v3686_v41, 0.0 }
 0x74a   : > { %1593 = vadd.xlane.f32.xlu0 %v1592_v42 }
 0x74c   : > { %v1585_v43 = vpop.xlane.xlu1 %1584 }
 0x74d   : > { %v1587_v44 = vsub.f32 %v1579_v36, %v1585_v43 }
 0x74f   : > { %v1590_v45 = vmul.f32 1.442695, %v1587_v44 }
 0x750   : > { %v1655_v46 = vpop.permute.xlu1 %1654 }
 0x751   : > { %3687 = vpow2.f32 %v1590_v45  ;;  %v1660_v47 = vsel %vm1380_vm2, %v1655_v46, 0 }
 0x752   : > { %3399 = vmatpush3.bf16.msra.mxu1 %v1660_v47 }
 0x753   : > { %3410 = vmatprep.subr.bf16.mxu1 %v4102_v29 }
 0x754   : > { %v1716_v62 = vpop.permute.xlu1 %1715 }
 0x755   : > { %v1721_v4 = vsel %vm1243_vm1, %v1716_v62, 0 }
 0x758   : > { %v1766_v2 = vpop.permute.xlu1 %1765 }
 0x759   : > { %v1771_v6 = vsel %vm1243_vm1, %v1766_v2, 0 }
 0x75b   : > { %v3688_v48 = vpop.eup %3687 }
 0x75c   : > { %v1595_v51 = vsel %vm1352_vm3, %v3688_v48, 0.0  ;;  %v1764_v10 = vpop.permute.xlu1 %1763 }
 0x75d   : > { %1596 = vadd.xlane.f32.xlu0 %v1595_v51 }
 0x773   : > { %1605 = vrot.lane.b32.xlu0 %v4680_v18, %s4104_s8 }
 0x777   : > { %1713 = vrot.lane.b32.xlu0 %v4664_v8, %s4105_s9 }
 0x7d7   : > { %v1594_v52 = vpop.xlane.xlu0 %1593 }
 0x7d8   : > { %3689 = vrcp.f32 %v1594_v52 }
 0x7e2   : > { %v3690_v53 = vpop.eup %3689 }
 0x7e3   : > { %v1600_v55 = vmul.f32 %v3690_v53, %v3686_v41 }
 0x7e5   : > { %v1602_v63 = vpack.c.bf16 %v1600_v55, %v1600_v55 }
 0x7ea   : > { %v1597_v54 = vpop.xlane.xlu0 %1596 }
 0x7eb   : > { %3691 = vrcp.f32 %v1597_v54 }
 0x7ee   : > { %v1606_v59 = vpop.permute.xlu0 %1605 }
 0x7ef   : > { %v1611_v61 = vsel %vm1380_vm2, %v1606_v59, 0 }
 0x7f0   : > { %3393 = vmatpush3.bf16.msra.mxu0 %v1611_v61 }
 0x7f1   : > { %3404 = vmatprep.subr.bf16.mxu0 %v4102_v29 }
 0x7f2   : > { %v1714_v9 = vpop.permute.xlu0 %1713 }
 0x7f3   : > { %3395 = vmatmul.mubr.msk.bf16.vlgmr.msra.gmra.mrb[8].mxu0 %vm1352_vm3, %v1602_v63 }
 0x7f4   : > { %3406 = vmatprep.mubr.msk.bf16.mxu0 %vm4103_vm0, %v4102_v29 }
 0x7f5   : > { %v3692_v0 = vpop.eup %3691 }
 0x7f6   : > { %v1601_v1 = vmul.f32 %v3692_v0, %v3688_v48 }
 0x7f8   : > { %v1603_v5 = vpack.c.bf16 %v1601_v1, %v1601_v1 }
 0x7f9   : > { %3405 = vmatpush3.bf16.xpose.msra.mxu0 %v1721_v4 }
 0x7fa   : > { %3401 = vmatmul.mubr.msk.bf16.vlgmr.msra.gmra.mrb[24].mxu1 %vm1352_vm3, %v1603_v5  ;;  %3416 = vmatprep.subr.bf16.mxu0 %v4102_v29 }
 0x7fb   : > { %3411 = vmatpush3.bf16.xpose.msra.mxu1 %v1771_v6  ;;  %3412 = vmatprep.mubr.msk.bf16.mxu1 %vm4103_vm0, %v4102_v29 }
 0x7fc   : > { %3422 = vmatprep.subr.bf16.mxu1 %v4102_v29 }
 0x800   : > { %3407 = vmatmul.mubr.msk.bf16.vlgmr.msra.gmra.mrb[12].mxu0 %vm1243_vm1, %v1714_v9 }
 0x801   : > { %3418 = vmatprep.mubr.msk.bf16.mxu0 %vm4103_vm0, %v4102_v29 }
 0x802   : > { %3413 = vmatmul.mubr.msk.bf16.vlgmr.msra.gmra.mrb[28].mxu1 %vm1243_vm1, %v1764_v10 }
 0x803   : > { %3424 = vmatprep.mubr.msk.bf16.mxu1 %vm4103_vm0, %v4102_v29 }
 0x8c6   : > { %v4770_v12 = vpop.f32.mrb[8].mxu0 }
 0x8c7   : > { %v3396_v13 = vpop.f32.mrb[9].mxu0 }
 0x8c8   : > { %v1650_v14 = vpop.f32.mrb[10].mxu0 }
 0x8c9   : > { %v3397_v15 = vpop.f32.mrb[11].mxu0 }
 0x8cd   : > { %v4772_v16 = vpop.f32.mrb[24].mxu1 }
 0x8ce   : > { %v3402_v17 = vpop.f32.mrb[25].mxu1 }
 0x8cf   : > { %v1699_v19 = vpop.f32.mrb[26].mxu1 }
 0x8d0   : > { %v3403_v20 = vpop.f32.mrb[27].mxu1 }
 0x8d3   : > { %v1757_v21 = vpop.f32.mrb[12].mxu0 }
 0x8d4   : > { %v1813_v22 = vmul.f32 0.17677669, %v1757_v21  ;;  %v3408_v24 = vpop.f32.mrb[13].mxu0 }
 0x8d5   : > { %v1760_v25 = vpop.f32.mrb[14].mxu0  ;;  %v1807_v26 = vpop.f32.mrb[28].mxu1 }
 0x8d6   : > { %v1814_v27 = vmul.f32 0.17677669, %v1807_v26  ;;  %v3409_v30 = vpop.f32.mrb[15].mxu0  ;;  %v3414_v31 = vpop.f32.mrb[29].mxu1  ;;  %v1815_v32 = vadd.f32 %v4688_v23, %v1813_v22 }
 0x8d7   : > { %v1810_v34 = vpop.f32.mrb[30].mxu1 }
 0x8d8   : > { %v3415_v35 = vpop.f32.mrb[31].mxu1  ;;  %v1817_v36 = vsel %vm1352_vm3, %v1815_v32, -inf  ;;  %v1816_v37 = vadd.f32 %v4695_v33, %v1814_v27 }
 0x8d9   : > { %1818 = vmax.xlane.f32.xlu0 %v1817_v36 }
 0x8da   : > { %v1820_v38 = vsel %vm1352_vm3, %v1816_v37, -inf }
 0x8db   : > { %1821 = vmax.xlane.f32.xlu1 %v1820_v38 }
 0x8ec   : > { %1889 = vrot.lane.b32.xlu1 %v4711_v58, %s4105_s9 }
 0x8f0   : > { %1950 = vrot.lane.b32.xlu1 %v4657_v3, %s4106_s28 }
 0x8f4   : > { %2000 = vrot.lane.b32.xlu1 %v4662_v7, %s4106_s28 }
 0x8f8   : > { %1998 = vrot.lane.b32.xlu1 %v4673_v11, %s4106_s28 }
 0x966   : > { %v1819_v39 = vpop.xlane.xlu0 %1818 }
 0x967   : > { %v1823_v40 = vsub.f32 %v1815_v32, %v1819_v39 }
 0x968   : > { %v1822_v41 = vpop.xlane.xlu1 %1821 }
 0x969   : > { %v1825_v42 = vmul.f32 1.442695, %v1823_v40  ;;  %v1824_v43 = vsub.f32 %v1816_v37, %v1822_v41 }
 0x96b   : > { %3693 = vpow2.f32 %v1825_v42  ;;  %v1827_v44 = vmul.f32 1.442695, %v1824_v43 }
 0x96c   : > { %v1890_v45 = vpop.permute.xlu1 %1889 }
 0x96d   : > { %3695 = vpow2.f32 %v1827_v44  ;;  %v1895_v46 = vsel %vm1380_vm2, %v1890_v45, 0 }
 0x96e   : > { %3423 = vmatpush3.bf16.msra.mxu1 %v1895_v46 }
 0x96f   : > { %3434 = vmatprep.subr.bf16.mxu1 %v4102_v29 }
 0x970   : > { %v1951_v55 = vpop.permute.xlu1 %1950 }
 0x974   : > { %v2001_v0 = vpop.permute.xlu1 %2000 }
 0x975   : > { %v3694_v3 = vpop.eup %3693  ;;  %v2006_v2 = vsel %vm1243_vm1, %v2001_v0, 0  ;;  %v3632_v0 = vld [vmem:[%s4568_s10 + $0x18] sm:$0xff]  }
 0x976   : > { %v1829_v7 = vsel %vm1352_vm3, %v3694_v3, 0.0 }
 0x977   : > { %v3696_v47 = vpop.eup %3695  ;;  %1830 = vadd.xlane.f32.xlu0 %v1829_v7 }
 0x978   : > { %v1832_v11 = vsel %vm1352_vm3, %v3696_v47, 0.0  ;;  %v1999_v5 = vpop.permute.xlu1 %1998 }
 0x97b   : > { %1833 = vadd.xlane.f32.xlu0 %v1832_v11 }
 0x991   : > { %1841 = vrot.lane.b32.xlu0 %v4680_v18, %s4105_s9 }
 0x995   : > { %1948 = vrot.lane.b32.xlu0 %v4664_v8, %s4106_s28  ;;  %v1956_v8 = vsel %vm1243_vm1, %v1951_v55, 0 }
 0xa04   : > { %v1831_v48 = vpop.xlane.xlu0 %1830 }
 0xa05   : > { %3697 = vrcp.f32 %v1831_v48 }
 0xa08   : > { %v1834_v51 = vpop.xlane.xlu0 %1833 }
 0xa09   : > { %3699 = vrcp.f32 %v1834_v51 }
 0xa0c   : > { %v1842_v52 = vpop.permute.xlu0 %1841 }
 0xa0d   : > { %v1847_v53 = vsel %vm1380_vm2, %v1842_v52, 0 }
 0xa0e   : > { %3417 = vmatpush3.bf16.msra.mxu0 %v1847_v53 }
 0xa0f   : > { %v3698_v54 = vpop.eup %3697  ;;  %3428 = vmatprep.subr.bf16.mxu0 %v4102_v29 }
 0xa10   : > { %v1837_v59 = vmul.f32 %v3698_v54, %v3694_v3  ;;  %v1949_v4 = vpop.permute.xlu0 %1948 }
 0xa12   : > { %v1839_v61 = vpack.c.bf16 %v1837_v59, %v1837_v59 }
 0xa13   : > { %v3700_v62 = vpop.eup %3699 }
 0xa14   : > { %v1838_v63 = vmul.f32 %v3700_v62, %v3696_v47  ;;  %3419 = vmatmul.mubr.msk.bf16.vlgmr.msra.gmra.mrb[16].mxu0 %vm1352_vm3, %v1839_v61  ;;  %v3629_v61 = vld [vmem:[%s4568_s10] sm:$0xff]   ;;  %v3630_v62 = vld [vmem:[%s4568_s10 + $0x8] sm:$0xff]  }
 0xa15   : > { %3430 = vmatprep.mubr.msk.bf16.mxu0 %vm4103_vm0, %v4102_v29 }
 0xa16   : > { %v1840_v1 = vpack.c.bf16 %v1838_v63, %v1838_v63  ;;  %v3631_v63 = vld [vmem:[%s4568_s10 + $0x10] sm:$0xff]  }
 0xa17   : > { %3429 = vmatpush3.bf16.xpose.msra.mxu0 %v1956_v8  ;;  %v3633_v8 = vld [vmem:[%s4568_s10 + $0x20] sm:$0xff]  }
 0xa18   : > { %3425 = vmatmul.mubr.msk.bf16.vlgmr.msra.gmra.mrb[32].mxu1 %vm1352_vm3, %v1840_v1  ;;  %3440 = vmatprep.subr.bf16.mxu0 %v4102_v29  ;;  %v3635_v1 = vld [vmem:[%s4568_s10 + $0x30] sm:$0xff]  }
 0xa19   : > { %3435 = vmatpush3.bf16.xpose.msra.mxu1 %v2006_v2  ;;  %3436 = vmatprep.mubr.msk.bf16.mxu1 %vm4103_vm0, %v4102_v29  ;;  %v3636_v2 = vld [vmem:[%s4568_s10 + $0x38] sm:$0xff]  }
 0xa1a   : > { %3446 = vmatprep.subr.bf16.mxu1 %v4102_v29 }
 0xa1e   : > { %3431 = vmatmul.mubr.msk.bf16.vlgmr.msra.gmra.mrb[20].mxu0 %vm1243_vm1, %v1949_v4 }
 0xa1f   : > { %3442 = vmatprep.mubr.msk.bf16.mxu0 %vm4103_vm0, %v4102_v29 }
 0xa20   : > { %3437 = vmatmul.mubr.msk.bf16.vlgmr.msra.gmra.mrb[36].mxu1 %vm1243_vm1, %v1999_v5 }
 0xa21   : > { %3448 = vmatprep.mubr.msk.bf16.mxu1 %vm4103_vm0, %v4102_v29 }
 0xae7   : > { %v1883_v6 = vpop.f32.mrb[16].mxu0 }
 0xae8   : > { %v3420_v9 = vpop.f32.mrb[17].mxu0 }
 0xae9   : > { %v1886_v10 = vpop.f32.mrb[18].mxu0 }
 0xaea   : > { %v3421_v13 = vpop.f32.mrb[19].mxu0 }
 0xaeb   : > { %v1931_v14 = vpop.f32.mrb[32].mxu1 }
 0xaec   : > { %v3426_v15 = vpop.f32.mrb[33].mxu1 }
 0xaed   : > { %v1934_v17 = vpop.f32.mrb[34].mxu1 }
 0xaee   : > { %v3427_v19 = vpop.f32.mrb[35].mxu1 }
 0xaf1   : > { %v1992_v20 = vpop.f32.mrb[20].mxu0 }
 0xaf2   : > { %v2048_v21 = vmul.f32 0.17677669, %v1992_v20  ;;  %v3432_v22 = vpop.f32.mrb[21].mxu0 }
 0xaf3   : > { %v1995_v24 = vpop.f32.mrb[22].mxu0  ;;  %v2042_v25 = vpop.f32.mrb[36].mxu1 }
 0xaf4   : > { %v2049_v26 = vmul.f32 0.17677669, %v2042_v25  ;;  %v3433_v27 = vpop.f32.mrb[23].mxu0  ;;  %v3438_v30 = vpop.f32.mrb[37].mxu1  ;;  %v2050_v31 = vadd.f32 %v4688_v23, %v2048_v21 }
 0xaf5   : > { %v2045_v32 = vpop.f32.mrb[38].mxu1 }
 0xaf6   : > { %v3439_v34 = vpop.f32.mrb[39].mxu1  ;;  %v2052_v35 = vsel %vm1352_vm3, %v2050_v31, -inf  ;;  %v2051_v36 = vadd.f32 %v4695_v33, %v2049_v26 }
 0xaf7   : > { %2053 = vmax.xlane.f32.xlu0 %v2052_v35  ;;  %v3637_v35 = vld [vmem:[%s4583_s12] ss:$8 sps:$4 sm:$0xff]  }
 0xaf8   : > { %v2055_v37 = vsel %vm1352_vm3, %v2051_v36, -inf }
 0xaf9   : > { %2056 = vmax.xlane.f32.xlu1 %v2055_v37  ;;  %v3642_v37 = vld [vmem:[%s4583_s12 + $0x14] ss:$8 sps:$4 sm:$0xff]  }
 0xb0a   : > { %2124 = vrot.lane.b32.xlu1 %v4711_v58, %s4106_s28 }
 0xb0e   : > { %1704 = vrot.lane.b32.xlu1 %v4770_v12, %s4106_s28 }
 0xb12   : > { %1706 = vrot.lane.b32.xlu1 %v4772_v16, %s4106_s28 }
 0xb16   : > { %1941 = vrot.lane.b32.xlu1 %v1931_v14, %s4105_s9 }
 0xb84   : > { %v2054_v23 = vpop.xlane.xlu0 %2053 }
 0xb85   : > { %v2058_v38 = vsub.f32 %v2050_v31, %v2054_v23  ;;  %v3640_v23 = vld [vmem:[%s4583_s12 + $0x10] ss:$8 sps:$4 sm:$0xff]  }
 0xb86   : > { %v2057_v39 = vpop.xlane.xlu1 %2056 }
 0xb87   : > { %v2060_v40 = vmul.f32 1.442695, %v2058_v38  ;;  %v2059_v33 = vsub.f32 %v2051_v36, %v2057_v39  ;;  %v3639_v36 = vld [vmem:[%s4583_s12 + $0x4] ss:$8 sps:$4 sm:$0xff]  }
 0xb89   : > { %3701 = vpow2.f32 %v2060_v40  ;;  %v2062_v41 = vmul.f32 1.442695, %v2059_v33 }
 0xb8a   : > { %v2125_v42 = vpop.permute.xlu1 %2124 }
 0xb8b   : > { %3703 = vpow2.f32 %v2062_v41  ;;  %v2130_v43 = vsel %vm1380_vm2, %v2125_v42, 0 }
 0xb8c   : > { %3447 = vmatpush3.bf16.msra.mxu1 %v2130_v43  ;;  %v3645_v43 = vld [vmem:[%s4583_s12 + $0x24] ss:$8 sps:$4 sm:$0xff]  }
 0xb8d   : > { %2464 = vmatprep.subr.bf16.mxu1 %v3639_v36 }
 0xb8e   : > { %v1705_v58 = vpop.permute.xlu1 %1704 }
 0xb8f   : > { %1711 = vst.msk [vmem:[#allocation3] sm:$0xff] %vm1710_vm4, %v1705_v58  ;;  %v3643_v58 = vld [vmem:[%s4583_s12 + $0x20] ss:$8 sps:$4 sm:$0xff]  }
 0xb92   : > { %v1707_v12 = vpop.permute.xlu1 %1706 }
 0xb93   : > { %v3702_v44 = vpop.eup %3701  ;;  %1712 = vst.msk [vmem:[#allocation3 + $0x8] sm:$0xff] %vm1710_vm4, %v1707_v12  ;;  %v3648_v12 = vld [vmem:[%s4583_s12 + $0x34] ss:$8 sps:$4 sm:$0xff]  }
 0xb94   : > { %v2064_v16 = vsel %vm1352_vm3, %v3702_v44, 0.0 }
 0xb95   : > { %v3704_v45 = vpop.eup %3703  ;;  %2065 = vadd.xlane.f32.xlu0 %v2064_v16  ;;  %v3651_v16 = vld [vmem:[%s4583_s12 + $0x44] ss:$8 sps:$4 sm:$0xff]  }
 0xb96   : > { %v1942_v46 = vpop.permute.xlu1 %1941  ;;  %v2067_v3 = vsel %vm1352_vm3, %v3704_v45, 0.0 }
 0xb97   : > { %1947 = vst.msk [vmem:[#allocation3 + $0x8] sm:$0xff] %vm1945_vm5, %v1942_v46  ;;  %v3654_v46 = vld [vmem:[%s4583_s12 + $0x54] ss:$8 sps:$4 sm:$0xff]  }
 0xb99   : > { %2068 = vadd.xlane.f32.xlu0 %v2067_v3  ;;  %v3652_v3 = vld [vmem:[%s4583_s12 + $0x50] ss:$8 sps:$4 sm:$0xff]  }
 0xbaf   : > { %2076 = vrot.lane.b32.xlu0 %v4680_v18, %s4106_s28 }
 0xbb3   : > { %1939 = vrot.lane.b32.xlu0 %v1883_v6, %s4105_s9 }
 0xc22   : > { %v2066_v7 = vpop.xlane.xlu0 %2065 }
 0xc23   : > { %3705 = vrcp.f32 %v2066_v7  ;;  %v3657_v7 = vld [vmem:[%s4583_s12 + $0x64] ss:$8 sps:$4 sm:$0xff]  }
 0xc26   : > { %v2069_v47 = vpop.xlane.xlu0 %2068 }
 0xc27   : > { %3707 = vrcp.f32 %v2069_v47  ;;  %v3655_v47 = vld [vmem:[%s4583_s12 + $0x60] ss:$8 sps:$4 sm:$0xff]  }
 0xc2a   : > { %v2077_v11 = vpop.permute.xlu0 %2076 }
 0xc2b   : > { %v2082_v48 = vsel %vm1380_vm2, %v2077_v11, 0  ;;  %v3660_v11 = vld [vmem:[%s4583_s12 + $0x74] ss:$8 sps:$4 sm:$0xff]  }
 0xc2c   : > { %3441 = vmatpush3.bf16.msra.mxu0 %v2082_v48  ;;  %v3658_v48 = vld [vmem:[%s4583_s12 + $0x70] ss:$8 sps:$4 sm:$0xff]  }
 0xc2d   : > { %v3706_v51 = vpop.eup %3705  ;;  %3452 = vmatprep.subr.bf16.mxu0 %v4102_v29 }
 0xc2e   : > { %v2072_v52 = vmul.f32 %v3706_v51, %v3702_v44  ;;  %v1940_v53 = vpop.permute.xlu0 %1939  ;;  %v3646_v44 = vld [vmem:[%s4583_s12 + $0x30] ss:$8 sps:$4 sm:$0xff]  }
 0xc2f   : > { %1946 = vst.msk [vmem:[#allocation3] sm:$0xff] %vm1945_vm5, %v1940_v53 }
 0xc30   : > { %v2074_v18 = vpack.c.bf16 %v2072_v52, %v2072_v52 }
 0xc31   : > { %v3708_v54 = vpop.eup %3707 }
 0xc32   : > { %v2073_v55 = vmul.f32 %v3708_v54, %v3704_v45  ;;  %3443 = vmatmul.mubr.msk.bf16.vlgmr.msra.gmra.mrb[24].mxu0 %vm1352_vm3, %v2074_v18  ;;  %v3649_v45 = vld [vmem:[%s4583_s12 + $0x40] ss:$8 sps:$4 sm:$0xff]   ;;  %s5064_s12 = sld [smem:[#allocation20_spill]] }
 0xc33   : > { %3468 = vmatprep.mubr.msk.bf16.mxu0 %vm4103_vm0, %v4102_v29  ;;  %3453 = vmatpush3.bf16.msra.mxu0 %v3629_v61 }
 0xc34   : > { %v2075_v59 = vpack.c.bf16 %v2073_v55, %v2073_v55  ;;  %3454 = vmatprep.subr.bf16.mxu0 %v4102_v29 }
 0xc36   : > { %3449 = vmatmul.mubr.msk.bf16.vlgmr.msra.gmra.mrb[40].mxu1 %vm1352_vm3, %v2075_v59 }
 0xc37   : > { %2496 = vmatprep.mubr.bf16.mxu1 %v4101_v28  ;;  %3455 = vmatpush3.bf16.msra.mxu0 %v3630_v62  ;;  %v3634_v28 = vld [vmem:[%s4568_s10 + $0x28] sm:$0xff]   ;;  %s5063_s10 = scalar_lea.vmem [#allocation8], %s4554_s6  ;;  %v3215_v62 = vld [vmem:[%s725_s13] ss:$0 sm:$0xff] }
 0xc38   : > { %3456 = vmatprep.subr.bf16.mxu0 %v4102_v29  ;;  %v3205_v22 = vld [vmem:[%s5063_s10] ss:$0 sm:$0xff]  ;;  %2465 = vmatpush1.bf16.msra.mxu1 %v3637_v35  ;;  %p3253_p4 = scmp.ne.s32.totalorder %s5064_s12, 1 }
 0xc39   : > { %2466 = vmatprep.subr.bf16.mxu1 %v3642_v37  ;;  %vm2840_vm11 = vcmask (!%p3253_p4), 1041409   ;;  %s5065_s1 = sld [smem:[#allocation38_spill]] (!%p3253_p4) }
 0xc3b   : > { %3457 = vmatpush3.bf16.msra.mxu0 %v3631_v63 }
 0xc3c   : > { %3458 = vmatprep.subr.bf16.mxu0 %v4102_v29  ;;  %2467 = vmatpush1.bf16.msra.mxu1 %v3640_v23 }
 0xc3d   : > { %2468 = vmatprep.subr.bf16.mxu1 %v3645_v43 }
 0xc3f   : > { %3459 = vmatpush3.bf16.msra.mxu0 %v3632_v0 }
 0xc40   : > { %3460 = vmatprep.subr.bf16.mxu0 %v4102_v29  ;;  %2469 = vmatpush1.bf16.msra.mxu1 %v3643_v58 }
 0xc41   : > { %2470 = vmatprep.subr.bf16.mxu1 %v3648_v12 }
 0xc43   : > { %3461 = vmatpush3.bf16.msra.mxu0 %v3633_v8 }
 0xc44   : > { %3462 = vmatprep.subr.bf16.mxu0 %v4102_v29  ;;  %2471 = vmatpush1.bf16.msra.mxu1 %v3646_v44 }
 0xc45   : > { %2472 = vmatprep.subr.bf16.mxu1 %v3651_v16 }
 0xc47   : > { %3463 = vmatpush3.bf16.msra.mxu0 %v3634_v28  ;;  %v3216_v28 = vld [vmem:[%s733_s24] ss:$0 sm:$0xff] }
 0xc48   : > { %3464 = vmatprep.subr.bf16.mxu0 %v4102_v29  ;;  %2473 = vmatpush1.bf16.msra.mxu1 %v3649_v45 }
 0xc49   : > { %2474 = vmatprep.subr.bf16.mxu1 %v3654_v46 }
 0xc4b   : > { %3465 = vmatpush3.bf16.msra.mxu0 %v3635_v1 }
 0xc4c   : > { %3466 = vmatprep.subr.bf16.mxu0 %v4102_v29  ;;  %2475 = vmatpush1.bf16.msra.mxu1 %v3652_v3 }
 0xc4d   : > { %2476 = vmatprep.subr.bf16.mxu1 %v3657_v7 }
 0xc4f   : > { %3467 = vmatpush3.bf16.msra.mxu0 %v3636_v2 }
 0xc50   : > { %2477 = vmatpush1.bf16.msra.mxu1 %v3655_v47 }
 0xc51   : > { %2478 = vmatprep.subr.bf16.mxu1 %v3660_v11 }
 0xc54   : > { %2479 = vmatpush1.bf16.msra.mxu1 %v3658_v48 }
 0xd05   : > { %v2118_v4 = vpop.f32.mrb[24].mxu0 }
 0xd06   : > { %2174 = vrot.lane.b32.xlu0 %v2118_v4, %s4104_s8  ;;  %v3444_v5 = vpop.f32.mrb[25].mxu0 }
 0xd07   : > { %v2121_v6 = vpop.f32.mrb[26].mxu0 }
 0xd08   : > { %v3445_v9 = vpop.f32.mrb[27].mxu0  ;;  %v3661_v6 = vld [vmem:[%s4589_s7 + $0x40] sm:$0xff]  }
 0xd09   : > { %v2166_v10 = vpop.f32.mrb[40].mxu1  ;;  %v3662_v9 = vld [vmem:[%s4589_s7] sm:$0xff]   ;;  %3314 = vmatprep.subr.bf16.mxu0 %v3661_v6 }
 0xd0a   : > { %2176 = vrot.lane.b32.xlu1 %v2166_v10, %s4104_s8  ;;  %v3450_v13 = vpop.f32.mrb[41].mxu1  ;;  %v3663_v10 = vld [vmem:[%s4589_s7 + $0x48] sm:$0xff]  }
 0xd0b   : > { %v2169_v14 = vpop.f32.mrb[42].mxu1  ;;  %v3664_v13 = vld [vmem:[%s4589_s7 + $0x8] sm:$0xff]  }
 0xd0c   : > { %v3451_v15 = vpop.f32.mrb[43].mxu1  ;;  %v3665_v14 = vld [vmem:[%s4589_s7 + $0x50] sm:$0xff]  }
 0xd0d   : > { %v3666_v15 = vld [vmem:[%s4589_s7 + $0x10] sm:$0xff]  }
 0xd78   : > { %v2175_v17 = vpop.permute.xlu0 %2174 }
 0xd79   : > { %2181 = vst.msk [vmem:[#allocation3] sm:$0xff] %vm2180_vm6, %v2175_v17  ;;  %v3667_v17 = vld [vmem:[%s4589_s7 + $0x58] sm:$0xff]  }
 0xd7c   : > { %v2177_v19 = vpop.permute.xlu1 %2176 }
 0xd7d   : > { %2182 = vst.msk [vmem:[#allocation3 + $0x8] sm:$0xff] %vm2180_vm6, %v2177_v19  ;;  %v3668_v19 = vld [vmem:[%s4589_s7 + $0x18] sm:$0xff]  }
 0xd80   : > { %v2183_v29 = vld [vmem:[#allocation3] sm:$0xff] }
 0xd84   : > { %v2184_v20 = vld [vmem:[#allocation3 + $0x8] sm:$0xff] }
 0xd85   : > { %v3262_v21 = vpack.c.bf16 %v2184_v20, %v2183_v29  ;;  %v3669_v29 = vld [vmem:[%s4589_s7 + $0x60] sm:$0xff]  }
 0xd86   : > { %v3670_v20 = vld [vmem:[%s4589_s7 + $0x20] sm:$0xff]  }
 0xd87   : > { %3469 = vmatmul.mubr.bf16.vlgmr.msra.gmra.mrb[28].mxu0 %v3262_v21  ;;  %v3671_v21 = vld [vmem:[%s4589_s7 + $0x68] sm:$0xff]  }
 0xd88   : > { %3315 = vmatpush3.bf16.msra.mxu0 %v3662_v9 }
 0xd89   : > { %3316 = vmatprep.subr.bf16.mxu0 %v3663_v10 }
 0xd8c   : > { %3317 = vmatpush3.bf16.msra.mxu0 %v3664_v13 }
 0xd8d   : > { %3318 = vmatprep.subr.bf16.mxu0 %v3665_v14 }
 0xd90   : > { %3319 = vmatpush3.bf16.msra.mxu0 %v3666_v15 }
 0xd91   : > { %3320 = vmatprep.subr.bf16.mxu0 %v3667_v17 }
 0xd94   : > { %3321 = vmatpush3.bf16.msra.mxu0 %v3668_v19 }
 0xd95   : > { %3322 = vmatprep.subr.bf16.mxu0 %v3669_v29 }
 0xd98   : > { %3323 = vmatpush3.bf16.msra.mxu0 %v3670_v20 }
 0xd99   : > { %3324 = vmatprep.subr.bf16.mxu0 %v3671_v21 }
 0xe5a   : > { %v2298_v24 = vpop.f32.mrb[28].mxu0 }
 0xe5b   : > { %v2299_v25 = vadd.f32 %v3205_v22, %v2298_v24  ;;  %v3470_v26 = vpop.f32.mrb[29].mxu0  ;;  %v3673_v24 = vld [vmem:[%s4589_s7 + $0x70] sm:$0xff]  }
 0xe5c   : > { %v2301_v27 = vpop.f32.mrb[30].mxu0  ;;  %v3675_v26 = vld [vmem:[%s4589_s7 + $0x78] sm:$0xff]  }
 0xe5d   : > { %v2302_v30 = vadd.f32 %v3205_v22, %v2301_v27  ;;  %v3471_v31 = vpop.f32.mrb[31].mxu0  ;;  %v2305_v32 = vadd.f32 %v2299_v25, %v4627_v49  ;;  %v3672_v22 = vld [vmem:[%s4589_s7 + $0x28] sm:$0xff]   ;;  %v3674_v25 = vld [vmem:[%s4589_s7 + $0x30] sm:$0xff]   ;;  %v3676_v27 = vld [vmem:[%s4589_s7 + $0x38] sm:$0xff]  }
 0xe5e   : > { %3325 = vmatpush3.bf16.msra.mxu0 %v3672_v22 }
 0xe5f   : > { %2309 = vadd.xlane.f32.xlu0 %v2305_v32  ;;  %v2306_v34 = vadd.f32 %v2302_v30, %v4629_v50  ;;  %3326 = vmatprep.subr.bf16.mxu0 %v3673_v24  ;;  %v2366_v30 = vld [vmem:[%s4587_s21] sm:$0x3] }
 0xe60   : > { %v2371_v31 = vrot.slane %v2366_v30, %v1006_v60 }
 0xe61   : > { %2311 = vadd.xlane.f32.xlu1 %v2306_v34 }
 0xe62   : > { %3327 = vmatpush3.bf16.msra.mxu0 %v3674_v25 }
 0xe63   : > { %3328 = vmatprep.subr.bf16.mxu0 %v3675_v26 }
 0xe66   : > { %3329 = vmatpush3.bf16.msra.mxu0 %v3676_v27 }
 0xeec   : > { %v2310_v38 = vpop.xlane.xlu0 %2309 }
 0xeed   : > { %v2314_v39 = vmul.f32 0.0078125, %v2310_v38 }
 0xeee   : > { %v2312_v40 = vpop.xlane.xlu1 %2311 }
 0xeef   : > { %v2316_v49 = vsub.f32 %v2305_v32, %v2314_v39  ;;  %v2315_v50 = vmul.f32 0.0078125, %v2312_v40  ;;  %v2375_v32 = vrot.slane %v2366_v30, %v1010_v57 }
 0xef1   : > { %v2317_v33 = vsub.f32 %v2306_v34, %v2315_v50  ;;  %v2318_v41 = vmul.f32 %v2316_v49, %v2316_v49 }
 0xef3   : > { %2320 = vadd.xlane.f32.xlu0 %v2318_v41  ;;  %v2319_v42 = vmul.f32 %v2317_v33, %v2317_v33 }
 0xef7   : > { %2322 = vadd.xlane.f32.xlu0 %v2319_v42 }
 0xf80   : > { %v2321_v51 = vpop.xlane.xlu0 %2320 }
 0xf81   : > { %v2324_v52 = vmul.f32 0.0078125, %v2321_v51 }
 0xf83   : > { %v2326_v53 = vadd.f32 1e-12, %v2324_v52 }
 0xf84   : > { %v2323_v18 = vpop.xlane.xlu0 %2322 }
 0xf85   : > { %3709 = vrsqrt.f32 %v2326_v53  ;;  %v2325_v54 = vmul.f32 0.0078125, %v2323_v18 }
 0xf87   : > { %v2327_v55 = vadd.f32 1e-12, %v2325_v54 }
 0xf89   : > { %3711 = vrsqrt.f32 %v2327_v55 }
 0xf8f   : > { %v3710_v59 = vpop.eup %3709 }
 0xf90   : > { %v2330_v61 = vmul.f32 %v3710_v59, %v2316_v49 }
 0xf92   : > { %v2338_v8 = vmul.f32 %v3215_v62, %v2330_v61 }
 0xf93   : > { %v3712_v63 = vpop.eup %3711 }
 0xf94   : > { %v2331_v0 = vmul.f32 %v3712_v63, %v2317_v33  ;;  %v4879_v2 = vadd.f32 %v3216_v28, %v2338_v8 }
 0xf96   : > { %v2339_v1 = vmul.f32 %v3215_v62, %v2331_v0 }
 0xf98   : > { %v4881_v4 = vadd.f32 %v3216_v28, %v2339_v1 }
 0xf9a   : > { %v3263_v5 = vpack.c.bf16 %v4881_v4, %v4879_v2 }
 0xf9c   : > { %2497 = vmatmul.mubr.bf16.vlgmr.msra.gmra.mrb[44].mxu1 %v3263_v5 }
0x106f   : > { %v2498_v34 = vpop.f32.mrb[44].mxu1 }
0x1070   : > { %v4906_v35 = vadd.f32 %v2498_v34, %v2371_v31  ;;  %v2500_v36 = vpop.f32.mrb[45].mxu1 }
0x1071   : > { %v4908_v37 = vadd.f32 %v2500_v36, %v2375_v32  ;;  %v2502_v23 = vpop.f32.mrb[46].mxu1 }
0x1072   : > { %v4911_v38 = vmul.f32 0.70710677, %v4906_v35  ;;  %v4913_v39 = vadd.f32 %v2502_v23, %v2371_v31  ;;  %v2504_v40 = vpop.f32.mrb[47].mxu1 }
0x1073   : > { %v4916_v49 = vmul.f32 0.70710677, %v4908_v37  ;;  %v4918_v60 = vadd.f32 %v2504_v40, %v2375_v32 }
0x1074   : > { %v2515_v56 = vand.u32 2147483647, %v4911_v38  ;;  %v4922_v57 = vmul.f32 0.70710677, %v4913_v39  ;;  %vm2591_vm7 = vcmp.ge.f32.partialorder %v4911_v38, 0.0 }
0x1075   : > { %v2516_v50 = vand.u32 2147483647, %v4916_v49  ;;  %v4926_v33 = vmul.f32 0.70710677, %v4918_v60  ;;  %vm2592_vm8 = vcmp.ge.f32.partialorder %v4916_v49, 0.0 }
0x1076   : > { %v2519_v41 = vmul.f32 0.3275911, %v2515_v56  ;;  %v2517_v42 = vand.u32 2147483647, %v4922_v57  ;;  %v2567_v7 = vsub.f32 0.0, %v2515_v56  ;;  %vm2593_vm9 = vcmp.ge.f32.partialorder %v4922_v57, 0.0 }
0x1077   : > { %v2520_v43 = vmul.f32 0.3275911, %v2516_v50  ;;  %v2518_v58 = vand.u32 2147483647, %v4926_v33  ;;  %v2568_v47 = vsub.f32 0.0, %v2516_v50  ;;  %vm2594_vm10 = vcmp.ge.f32.partialorder %v4926_v33, 0.0 }
0x1078   : > { %v2523_v12 = vadd.f32 1.0, %v2519_v41  ;;  %v2521_v44 = vmul.f32 0.3275911, %v2517_v42  ;;  %v2571_v48 = vmul.f32 %v2567_v7, %v2515_v56  ;;  %v2569_v51 = vsub.f32 0.0, %v2517_v42 }
0x1079   : > { %v2524_v16 = vadd.f32 1.0, %v2520_v43  ;;  %v2522_v45 = vmul.f32 0.3275911, %v2518_v58  ;;  %v2572_v18 = vmul.f32 %v2568_v47, %v2516_v50  ;;  %v2570_v55 = vsub.f32 0.0, %v2518_v58 }
0x107a   : > { %3713 = vrcp.f32 %v2523_v12  ;;  %v2525_v46 = vadd.f32 1.0, %v2521_v44  ;;  %v2575_v62 = vmul.f32 1.442695, %v2571_v48  ;;  %v2573_v0 = vmul.f32 %v2569_v51, %v2517_v42 }
0x107b   : > { %3715 = vrcp.f32 %v2524_v16  ;;  %v2526_v3 = vadd.f32 1.0, %v2522_v45  ;;  %v2577_v28 = vmul.f32 1.442695, %v2572_v18  ;;  %v2574_v9 = vmul.f32 %v2570_v55, %v2518_v58 }
0x107c   : > { %3717 = vrcp.f32 %v2525_v46  ;;  %v2579_v17 = vmul.f32 1.442695, %v2573_v0 }
0x107d   : > { %3719 = vrcp.f32 %v2526_v3  ;;  %v2581_v22 = vmul.f32 1.442695, %v2574_v9  ;;  %v2509_v9 = vmul.f32 0.5, %v4913_v39  ;;  %v3234_v39 = vld [vmem:[%s759_s23] ss:$0 sm:$0xff] }
0x107e   : > { %3721 = vpow2.f32 %v2575_v62 }
0x107f   : > { %3723 = vpow2.f32 %v2577_v28 }
0x1080   : > { %3725 = vpow2.f32 %v2579_v17 }
0x1081   : > { %3727 = vpow2.f32 %v2581_v22 }
0x1084   : > { %v3714_v11 = vpop.eup %3713 }
0x1085   : > { %v3716_v52 = vpop.eup %3715  ;;  %v2531_v53 = vmul.f32 1.0614054, %v3714_v11 }
0x1086   : > { %v2532_v54 = vmul.f32 1.0614054, %v3716_v52  ;;  %v3718_v61 = vpop.eup %3717 }
0x1087   : > { %v2535_v59 = vadd.f32 -1.4531521, %v2531_v53  ;;  %v2533_v1 = vmul.f32 1.0614054, %v3718_v61  ;;  %v3720_v5 = vpop.eup %3719 }
0x1088   : > { %v2536_v63 = vadd.f32 -1.4531521, %v2532_v54  ;;  %v2534_v14 = vmul.f32 1.0614054, %v3720_v5  ;;  %v3722_v43 = vpop.eup %3721 }
0x1089   : > { %v2539_v8 = vmul.f32 %v3714_v11, %v2535_v59  ;;  %v2537_v13 = vadd.f32 -1.4531521, %v2533_v1  ;;  %v3724_v12 = vpop.eup %3723 }
0x108a   : > { %v2540_v6 = vmul.f32 %v3716_v52, %v2536_v63  ;;  %v2538_v20 = vadd.f32 -1.4531521, %v2534_v14  ;;  %v3726_v48 = vpop.eup %3725 }
0x108b   : > { %v2543_v10 = vadd.f32 1.4214138, %v2539_v8  ;;  %v2541_v29 = vmul.f32 %v3718_v61, %v2537_v13  ;;  %v3728_v55 = vpop.eup %3727 }
0x108c   : > { %v2544_v15 = vadd.f32 1.4214138, %v2540_v6  ;;  %v2542_v26 = vmul.f32 %v3720_v5, %v2538_v20 }
0x108d   : > { %v2547_v19 = vmul.f32 %v3714_v11, %v2543_v10  ;;  %v2545_v25 = vadd.f32 1.4214138, %v2541_v29  ;;  %v2508_v10 = vmul.f32 0.5, %v4908_v37 }
0x108e   : > { %v2548_v21 = vmul.f32 %v3716_v52, %v2544_v15  ;;  %v2546_v32 = vadd.f32 1.4214138, %v2542_v26  ;;  %v2510_v15 = vmul.f32 0.5, %v4918_v60 }
0x108f   : > { %v2551_v24 = vadd.f32 -0.28449672, %v2547_v19  ;;  %v2549_v31 = vmul.f32 %v3718_v61, %v2545_v25 }
0x1090   : > { %v2552_v27 = vadd.f32 -0.28449672, %v2548_v21  ;;  %v2550_v40 = vmul.f32 %v3720_v5, %v2546_v32 }
0x1091   : > { %v2555_v30 = vmul.f32 %v3714_v11, %v2551_v24  ;;  %v2553_v23 = vadd.f32 -0.28449672, %v2549_v31 }
0x1092   : > { %v2556_v34 = vmul.f32 %v3716_v52, %v2552_v27  ;;  %v2554_v42 = vadd.f32 -0.28449672, %v2550_v40 }
0x1093   : > { %v2559_v36 = vadd.f32 0.2548296, %v2555_v30  ;;  %v2557_v41 = vmul.f32 %v3718_v61, %v2553_v23 }
0x1094   : > { %v2560_v56 = vadd.f32 0.2548296, %v2556_v34  ;;  %v2558_v45 = vmul.f32 %v3720_v5, %v2554_v42 }
0x1095   : > { %v2563_v50 = vmul.f32 %v3714_v11, %v2559_v36  ;;  %v2561_v16 = vadd.f32 0.2548296, %v2557_v41 }
0x1096   : > { %v2564_v58 = vmul.f32 %v3716_v52, %v2560_v56  ;;  %v2562_v47 = vadd.f32 0.2548296, %v2558_v45  ;;  %v3252_v45 = vld [vmem:[%s775_s18] ss:$0 sm:$0xff] }
0x1097   : > { %v2583_v44 = vmul.f32 %v3722_v43, %v2563_v50  ;;  %v2565_v7 = vmul.f32 %v3718_v61, %v2561_v16  ;;  %v2507_v61 = vmul.f32 0.5, %v4906_v35 }
0x1098   : > { %v2584_v46 = vmul.f32 %v3724_v12, %v2564_v58  ;;  %v2566_v54 = vmul.f32 %v3720_v5, %v2562_v47  ;;  %v3251_v12 = vld [vmem:[%s767_s2] ss:$0 sm:$0xff] }
0x1099   : > { %v2587_v3 = vsub.f32 1.0, %v2583_v44  ;;  %v2585_v18 = vmul.f32 %v3726_v48, %v2565_v7 }
0x109a   : > { %v2588_v51 = vsub.f32 1.0, %v2584_v46  ;;  %v2586_v52 = vmul.f32 %v3728_v55, %v2566_v54 }
0x109b   : > { %v2595_v53 = vsub.f32 0.0, %v2587_v3  ;;  %v2589_v62 = vsub.f32 1.0, %v2585_v18 }
0x109c   : > { %v2596_v11 = vsub.f32 0.0, %v2588_v51  ;;  %v2590_v8 = vsub.f32 1.0, %v2586_v52 }
0x109d   : > { %v2599_v59 = vsel %vm2591_vm7, %v2587_v3, %v2595_v53  ;;  %v2597_v0 = vsub.f32 0.0, %v2589_v62 }
0x109e   : > { %v2600_v63 = vsel %vm2592_vm8, %v2588_v51, %v2596_v11  ;;  %v2603_v28 = vadd.f32 1.0, %v2599_v59  ;;  %v2598_v6 = vsub.f32 0.0, %v2590_v8 }
0x109f   : > { %v2601_v1 = vsel %vm2593_vm9, %v2589_v62, %v2597_v0  ;;  %v2604_v5 = vadd.f32 1.0, %v2600_v63 }
0x10a0   : > { %v2605_v38 = vadd.f32 1.0, %v2601_v1  ;;  %v2602_v49 = vsel %vm2594_vm10, %v2590_v8, %v2598_v6  ;;  %v2607_v13 = vmul.f32 %v2603_v28, %v2507_v61 }
0x10a1   : > { %v2606_v17 = vadd.f32 1.0, %v2602_v49  ;;  %v2608_v57 = vmul.f32 %v2604_v5, %v2508_v10 }
0x10a2   : > { %v2609_v14 = vmul.f32 %v2605_v38, %v2509_v9 }
0x10a3   : > { %v2610_v35 = vmul.f32 %v2606_v17, %v2510_v15 }
0x10a4   : > { %v2611_v19 = vpack.c.bf16 %v2609_v14, %v2607_v13 }
0x10a5   : > { %v2612_v29 = vpack.c.bf16 %v2610_v35, %v2608_v57 }
0x10a7   : > { %2780 = vmatprep.mubr.bf16.mxu0 %v2612_v29 }
0x10a8   : > { %2781 = vmatmul.mubr.bf16.vlgmr.msra.gmra.mrb[32].mxu0 %v2611_v19 }
0x117b   : > { %v3330_v20 = vpop.f32.mrb[32].mxu0 }
0x117c   : > { %v3331_v21 = vpop.f32.mrb[33].mxu0 }
0x117d   : > { %v3332_v22 = vadd.f32 %v3331_v21, %v3330_v20  ;;  %v3333_v33 = vpop.f32.mrb[34].mxu0 }
0x117e   : > { %v3334_v24 = vpop.f32.mrb[35].mxu0 }
0x117f   : > { %v2783_v37 = vadd.f32 %v3332_v22, %v3234_v39  ;;  %v3335_v25 = vadd.f32 %v3334_v24, %v3333_v33 }
0x1181   : > { %v2786_v26 = vadd.f32 %v3335_v25, %v3234_v39  ;;  %v2789_v27 = vadd.f32 %v2783_v37, %v4879_v2 }
0x1183   : > { %2793 = vadd.xlane.f32.xlu0 %v2789_v27  ;;  %v2790_v60 = vadd.f32 %v2786_v26, %v4881_v4 }
0x1185   : > { %2795 = vadd.xlane.f32.xlu1 %v2790_v60 }
0x1210   : > { %v2794_v30 = vpop.xlane.xlu0 %2793 }
0x1211   : > { %v2797_v31 = vmul.f32 0.0078125, %v2794_v30 }
0x1212   : > { %v2796_v32 = vpop.xlane.xlu1 %2795 }
0x1213   : > { %v2799_v34 = vsub.f32 %v2789_v27, %v2797_v31  ;;  %v2798_v36 = vmul.f32 0.0078125, %v2796_v32 }
0x1215   : > { %v2800_v23 = vsub.f32 %v2790_v60, %v2798_v36  ;;  %v2801_v40 = vmul.f32 %v2799_v34, %v2799_v34 }
0x1217   : > { %2803 = vadd.xlane.f32.xlu0 %v2801_v40  ;;  %v2802_v56 = vmul.f32 %v2800_v23, %v2800_v23 }
0x1219   : > { %2805 = vadd.xlane.f32.xlu1 %v2802_v56 }
0x12a4   : > { %v2804_v50 = vpop.xlane.xlu0 %2803 }
0x12a5   : > { %v2807_v41 = vmul.f32 0.0078125, %v2804_v50 }
0x12a6   : > { %v2806_v42 = vpop.xlane.xlu1 %2805 }
0x12a7   : > { %v2809_v2 = vadd.f32 1e-12, %v2807_v41  ;;  %v2808_v43 = vmul.f32 0.0078125, %v2806_v42 }
0x12a9   : > { %3729 = vrsqrt.f32 %v2809_v2  ;;  %v2810_v4 = vadd.f32 1e-12, %v2808_v43 }
0x12ab   : > { %3731 = vrsqrt.f32 %v2810_v4 }
0x12b3   : > { %v3730_v58 = vpop.eup %3729 }
0x12b4   : > { %v2813_v44 = vmul.f32 %v3730_v58, %v2799_v34 }
0x12b5   : > { %v3732_v16 = vpop.eup %3731 }
0x12b6   : > { %v2821_v46 = vmul.f32 %v3251_v12, %v2813_v44  ;;  %v2814_v3 = vmul.f32 %v3732_v16, %v2800_v23  ;;  %2836 = sbr.rel (%p3253_p4) target bundleno = 4800 (0x12c0), region = 132 }
0x12b8   : > { %v2829_v7 = vadd.f32 %v3252_v45, %v2821_v46  ;;  %v2822_v47 = vmul.f32 %v3251_v12, %v2814_v3 }
0x12ba   : > { %2831 = vst [vmem:[#allocation2] sm:$0xff] %v2829_v7  ;;  %v2830_v48 = vadd.f32 %v3252_v45, %v2822_v47 }
0x12bc   : > { %2832 = vst [vmem:[#allocation2 + $0x8] sm:$0xff] %v2830_v48  ;;  %v2839_v51 = vrot.slane (!%p3253_p4), %v2830_v48, 7 }
0x12be   : > { %v2841_v53 = vsel %vm2840_vm11, %v2839_v51, %v2829_v7 }
0x12bf   : > { %2843 = vst [vmem:[%s5065_s1] sm:$0x3] %v2841_v53 }
0x12c0 PF: > { %s28_s26 = sadd.s32 1, %s4087_s26   ;;  %s5066_s6 = sld [smem:[#allocation19_spill]] }
0x12c1   : > { %p25_p1 = scmp.ge.s32.totalorder %s28_s26, 4   ;;  %s5067_s23 = sld [smem:[#allocation23_spill]] }
0x12c2   : > { %s5068_s20 = sld [smem:[#allocation21_spill]]  ;;  %s5069_s21 = smov %s4071_s22 }
0x12c3   : > { %s5071_s24 = smov %s4083_s25  ;;  %27 = sbr.rel (!%p25_p1) target bundleno = 20 (0x14), region = 234 }
0x12c6   : > { %s5070_s22 = smov %s5066_s6 }
0x12c8   : > { %s5072_s25 = smov %s5068_s20 }
0x12ca   :  { %2863 = vsyncpa [#allocation5], 1 }
0x12cb   :  { %2865 = vsyncpa [#allocation5 + $0x1], 1 }
0x12cc   :  { %2866 = vsyncpa [#allocation7], 1 }

</bundles_post_ra>
